<compile_context>
chip_gen: v5e
topology: v5e:2x2
jax: 0.10.0
libtpu: 0.0.40
codegen_flags: <defaults>
</compile_context>

<pallas_src>
import math

import numpy as np
import jax
import jax.numpy as jnp
from jax.experimental import pallas as pl
from jax.experimental.pallas import tpu as pltpu


# Output-column chunk of W2 / contraction-row chunk of W3 streamed per grid step.
TN = 256
_INV_SQRT2 = 1.0 / math.sqrt(2.0)


# ---------------------------------------------------------------------------
# Fused Pallas kernel:
#   step 0          : h1 = gelu(x @ W1 + b1)   (resident, 128 KiB bf16 W1)
#   every step n    : h2_n = gelu(h1 @ W2[:, nTN:(n+1)TN] + b2[nTN:(n+1)TN])
#                     acc += h2_n @ W3[nTN:(n+1)TN, :]
#   last step       : out = gelu(acc + b3)
# Weights are stored bf16 (halve HBM bytes), upcast to f32 in-kernel; activations and
# accumulation stay f32.
# ---------------------------------------------------------------------------
def _fused_kernel(x_ref, w1_ref, b1_ref, w2_ref, b2_ref, w3_ref, b3_ref,
                  o_ref, h1_ref, acc_ref):
    n = pl.program_id(0)

    def gelu(v):
        # torch.nn.functional.gelu default ('none') == exact erf formulation
        return 0.5 * v * (1.0 + jax.lax.erf(v * _INV_SQRT2))

    @pl.when(n == 0)
    def _():
        h1 = jnp.dot(x_ref[...], w1_ref[...].astype(jnp.float32),
                     preferred_element_type=jnp.float32) + b1_ref[...]
        h1_ref[...] = gelu(h1)
        acc_ref[...] = jnp.zeros_like(acc_ref)

    # fc2 column chunk + GELU, then its fc3 contribution (accumulated in f32 scratch).
    h2 = gelu(jnp.dot(h1_ref[...], w2_ref[...].astype(jnp.float32),
                      preferred_element_type=jnp.float32) + b2_ref[...])
    acc_ref[...] += jnp.dot(h2, w3_ref[...].astype(jnp.float32),
                            preferred_element_type=jnp.float32)

    @pl.when(n == pl.num_programs(0) - 1)
    def _():
        o_ref[...] = gelu(acc_ref[...] + b3_ref[...])


def _fused_forward(x_pad, w1, b1, w2, b2, w3, b3):
    M = x_pad.shape[0]            # padded batch (multiple of 8 -> unmasked f32 stores)
    H2 = w2.shape[1]              # 2048
    H3 = w3.shape[1]              # 1024
    n_steps = H2 // TN

    grid_spec = pltpu.PrefetchScalarGridSpec(
        num_scalar_prefetch=0,
        grid=(n_steps,),
        in_specs=[
            # Small resident operands (fetched once; index does not change across steps).
            pl.BlockSpec(x_pad.shape, lambda n: (0, 0)),
            pl.BlockSpec(w1.shape, lambda n: (0, 0)),
            pl.BlockSpec(b1.shape, lambda n: (0, 0)),
            # Streamed dominant weights: W2 output-column chunks, matching b2 chunk,
            # W3 contraction-row chunks.
            pl.BlockSpec((w2.shape[0], TN), lambda n: (0, n)),
            pl.BlockSpec((1, TN), lambda n: (0, n)),
            pl.BlockSpec((TN, H3), lambda n: (n, 0)),
            pl.BlockSpec(b3.shape, lambda n: (0, 0)),
        ],
        out_specs=pl.BlockSpec((M, H3), lambda n: (0, 0)),
        scratch_shapes=[
            pltpu.VMEM((M, H2), jnp.float32),   # h1 = gelu(fc1)
            pltpu.VMEM((M, H3), jnp.float32),   # fc3 accumulator
        ],
    )
    return pl.pallas_call(
        _fused_kernel,
        out_shape=jax.ShapeDtypeStruct((M, H3), jnp.float32),
        grid_spec=grid_spec,
        compiler_params=pltpu.CompilerParams(
            dimension_semantics=("arbitrary",),     # accumulation across the grid axis
            vmem_limit_bytes=20 * 1024 * 1024,      # ~7 MiB actual footprint + headroom
        ),
    )(x_pad, w1, b1, w2, b2, w3, b3)


# ---------------------------------------------------------------------------
# ConvTranspose2d(16, 4, kernel_size=4, stride=2, padding=1) on the (B,16,8,8) activation,
# executed in the wrapper (per perf review): transposed conv == conv on the stride-dilated
# input with the spatially-flipped, channel-transposed kernel and padding k-1-p = 2.
# ---------------------------------------------------------------------------
def _deconv(h_nchw, wc_oihw_flipped, bc):
    out = jax.lax.conv_general_dilated(
        h_nchw, wc_oihw_flipped,
        window_strides=(1, 1),
        padding=((2, 2), (2, 2)),
        lhs_dilation=(2, 2),
        rhs_dilation=(1, 1),
        dimension_numbers=("NCHW", "OIHW", "NCHW"),
        precision=jax.lax.Precision.HIGHEST,
    )
    return out + bc[None, :, None, None]


# ---------------------------------------------------------------------------
# Model build (one-time) + forward
# ---------------------------------------------------------------------------
def prepare_params(W1, b1, W2, b2, W3, b3, Wc, bc):
    """bf16 weight storage for the fused kernel; deconv kernel pre-flipped/transposed (hoisted)."""
    wc = jnp.asarray(Wc, jnp.float32)                      # torch layout (Cin, Cout, kh, kw)
    wc_oihw_flipped = jnp.transpose(jnp.flip(wc, axis=(2, 3)), (1, 0, 2, 3))  # (Cout, Cin, kh, kw)
    return dict(
        w1=jnp.asarray(W1).astype(jnp.bfloat16),
        b1=jnp.asarray(b1, jnp.float32).reshape(1, -1),
        w2=jnp.asarray(W2).astype(jnp.bfloat16),
        b2=jnp.asarray(b2, jnp.float32).reshape(1, -1),
        w3=jnp.asarray(W3).astype(jnp.bfloat16),
        b3=jnp.asarray(b3, jnp.float32).reshape(1, -1),
        wc=wc_oihw_flipped,
        bc=jnp.asarray(bc, jnp.float32),
    )


def fmri_encoder_forward(X, params):
    B = X.shape[0]
    pad = (-B) % 8  # pad batch to the f32 sublane count -> unmasked stores in the kernel
    x_pad = jnp.pad(X, ((0, pad), (0, 0))) if pad else X
    h3 = _fused_forward(
        x_pad,
        params["w1"], params["b1"],
        params["w2"], params["b2"],
        params["w3"], params["b3"],
    )
    h3 = h3[:B].reshape(B, 16, 8, 8)
    return _deconv(h3, params["wc"], params["bc"])          # (B, 4, 16, 16) NCHW


# ---------------------------------------------------------------------------
# Pure numpy reference (f64 activations, bf16-rounded fc weights, f32 conv weights).
# ---------------------------------------------------------------------------
def _gelu_exact_np(x):
    return 0.5 * x * (1.0 + np.vectorize(math.erf)(x / math.sqrt(2.0)))


def reference_forward(X, W1, b1, W2, b2, W3, b3, Wc, bc):
    h = _gelu_exact_np(np.asarray(X, np.float64) @ W1 + b1)
    h = _gelu_exact_np(h @ W2 + b2)
    h = _gelu_exact_np(h @ W3 + b3)
    h = h.reshape(-1, 16, 8, 8)
    B = h.shape[0]
    out = np.zeros((B, 4, 16, 16), dtype=np.float64) + np.asarray(bc)[None, :, None, None]
    for kh in range(4):
        for kw in range(4):
            part = np.einsum("bchw,cd->bdhw", h, Wc[:, :, kh, kw])
            for ih in range(8):
                oh = 2 * ih - 1 + kh
                if not (0 <= oh < 16):
                    continue
                for iw in range(8):
                    ow = 2 * iw - 1 + kw
                    if not (0 <= ow < 16):
                        continue
                    out[:, :, oh, ow] += part[:, :, ih, iw]
    return out.astype(np.float32)


if __name__ == "__main__":
    B, Din = 2, 32
    key = jax.random.PRNGKey(0)
    ks = jax.random.split(key, 9)

    X = jax.random.normal(ks[0], (B, Din), jnp.float32)
    W1 = jax.random.normal(ks[1], (Din, 2048), jnp.float32) / np.sqrt(Din)
    b1 = 0.01 * jax.random.normal(ks[2], (2048,), jnp.float32)
    W2 = jax.random.normal(ks[3], (2048, 2048), jnp.float32) / np.sqrt(2048)
    b2 = 0.01 * jax.random.normal(ks[4], (2048,), jnp.float32)
    W3 = jax.random.normal(ks[5], (2048, 1024), jnp.float32) / np.sqrt(2048)
    b3 = 0.01 * jax.random.normal(ks[6], (1024,), jnp.float32)
    Wc = jax.random.normal(ks[7], (16, 4, 4, 4), jnp.float32) / np.sqrt(16 * 16)  # (Cin,Cout,kh,kw)
    bc = 0.01 * jax.random.normal(ks[8], (4,), jnp.float32)

    params = prepare_params(W1, b1, W2, b2, W3, b3, Wc, bc)

    fwd = jax.jit(fmri_encoder_forward)
    out = jax.block_until_ready(fwd(X, params))
    assert out.shape == (B, 4, 16, 16), out.shape

    # Reference uses the SAME bf16-rounded fc weights (cast back to f64) with full-precision
    # activations; the deconv weights stay f32 in both paths.
    def rq(a):
        return np.asarray(jnp.asarray(a).astype(jnp.bfloat16).astype(jnp.float32), np.float64)

    ref = reference_forward(
        np.asarray(X), rq(W1), np.asarray(b1, np.float64), rq(W2), np.asarray(b2, np.float64),
        rq(W3), np.asarray(b3, np.float64), np.asarray(Wc, np.float64), np.asarray(bc, np.float64))

    np.testing.assert_allclose(np.asarray(out), ref, rtol=1e-2, atol=1e-2)
    print("KERNEL_OK")
</pallas_src>

<mosaic_0001>
module attributes {stable_mosaic.version = 11 : i64} {
  func.func @_fused_kernel(%arg0: i32, %arg1: memref<8x32xf32, #tpu.memory_space<vmem>>, %arg2: memref<32x2048xbf16, #tpu.memory_space<vmem>>, %arg3: memref<1x2048xf32, #tpu.memory_space<vmem>>, %arg4: memref<2048x256xbf16, #tpu.memory_space<vmem>>, %arg5: memref<1x256xf32, #tpu.memory_space<vmem>>, %arg6: memref<256x1024xbf16, #tpu.memory_space<vmem>>, %arg7: memref<1x1024xf32, #tpu.memory_space<vmem>>, %arg8: memref<8x1024xf32, #tpu.memory_space<vmem>>, %arg9: memref<8x2048xf32, #tpu.memory_space<vmem>>, %arg10: memref<8x1024xf32, #tpu.memory_space<vmem>>) attributes {dimension_semantics = [#tpu.dimension_semantics<arbitrary>], iteration_bounds = array<i64: 8>, scalar_prefetch = 0 : i64, scratch_operands = 2 : i64, tpu.core_type = #tpu.core_type<tc>, window_params = [{pipeline_mode = #tpu.pipeline_mode<synchronous>, transform_indices = @transform_0, window_bounds = array<i64: 8, 32>}, {pipeline_mode = #tpu.pipeline_mode<synchronous>, transform_indices = @transform_1, window_bounds = array<i64: 32, 2048>}, {pipeline_mode = #tpu.pipeline_mode<synchronous>, transform_indices = @transform_2, window_bounds = array<i64: 1, 2048>}, {transform_indices = @transform_3, window_bounds = array<i64: 2048, 256>}, {transform_indices = @transform_4, window_bounds = array<i64: 1, 256>}, {transform_indices = @transform_5, window_bounds = array<i64: 256, 1024>}, {pipeline_mode = #tpu.pipeline_mode<synchronous>, transform_indices = @transform_6, window_bounds = array<i64: 1, 1024>}, {pipeline_mode = #tpu.pipeline_mode<synchronous>, transform_indices = @transform_7, window_bounds = array<i64: 8, 1024>}]} {
    %c0_i32 = arith.constant 0 : i32
    %0 = arith.cmpi eq, %arg0, %c0_i32 : i32
    %1 = arith.extui %0 : i1 to i32
    %c0_i32_0 = arith.constant 0 : i32
    %2 = arith.cmpi ne, %1, %c0_i32_0 : i32
    scf.if %2 {
      %c0_17 = arith.constant 0 : index
      %c0_18 = arith.constant 0 : index
      %27 = vector.load %arg1[%c0_17, %c0_18] : memref<8x32xf32, #tpu.memory_space<vmem>>, vector<8x32xf32>
      %c0_19 = arith.constant 0 : index
      %c0_20 = arith.constant 0 : index
      %28 = vector.load %arg2[%c0_19, %c0_20] : memref<32x2048xbf16, #tpu.memory_space<vmem>>, vector<32x2048xbf16>
      %29 = arith.extf %28 : vector<32x2048xbf16> to vector<32x2048xf32>
      %cst_21 = arith.constant dense<0.000000e+00> : vector<8x2048xf32>
      %30 = tpu.matmul %27, %29, %cst_21 {dimension_numbers = #tpu.dot_dimension_numbers<[1], [0], [0], [1], [0, 0, 1, 1], [], []>} : vector<8x32xf32>, vector<32x2048xf32>, vector<8x2048xf32> -> vector<8x2048xf32>
      %c0_22 = arith.constant 0 : index
      %c0_23 = arith.constant 0 : index
      %31 = vector.load %arg3[%c0_22, %c0_23] : memref<1x2048xf32, #tpu.memory_space<vmem>>, vector<1x2048xf32>
      %32 = vector.broadcast %31 : vector<1x2048xf32> to vector<8x2048xf32>
      %33 = arith.addf %30, %32 : vector<8x2048xf32>
      %cst_24 = arith.constant 5.000000e-01 : f32
      %34 = vector.broadcast %cst_24 : f32 to vector<8x2048xf32>
      %35 = arith.mulf %34, %33 : vector<8x2048xf32>
      %cst_25 = arith.constant 0.707106769 : f32
      %36 = vector.broadcast %cst_25 : f32 to vector<8x2048xf32>
      %37 = arith.mulf %33, %36 : vector<8x2048xf32>
      %38 = math.erf %37 : vector<8x2048xf32>
      %cst_26 = arith.constant 1.000000e+00 : f32
      %39 = vector.broadcast %cst_26 : f32 to vector<8x2048xf32>
      %40 = arith.addf %39, %38 : vector<8x2048xf32>
      %41 = arith.mulf %35, %40 : vector<8x2048xf32>
      %c0_27 = arith.constant 0 : index
      %c0_28 = arith.constant 0 : index
      %42 = vector.load %arg9[%c0_27, %c0_28] : memref<8x2048xf32, #tpu.memory_space<vmem>>, vector<8x2048xf32>
      tpu.vector_store %arg9[%c0_27, %c0_28], %41 {strides = array<i32>} : memref<8x2048xf32, #tpu.memory_space<vmem>>, vector<8x2048xf32>,
      %cst_29 = arith.constant 0.000000e+00 : f32
      %43 = vector.broadcast %cst_29 : f32 to vector<8x1024xf32>
      %c0_30 = arith.constant 0 : index
      %c0_31 = arith.constant 0 : index
      %44 = vector.load %arg10[%c0_30, %c0_31] : memref<8x1024xf32, #tpu.memory_space<vmem>>, vector<8x1024xf32>
      tpu.vector_store %arg10[%c0_30, %c0_31], %43 {strides = array<i32>} : memref<8x1024xf32, #tpu.memory_space<vmem>>, vector<8x1024xf32>,
    } else {
    }
    %c0 = arith.constant 0 : index
    %c0_1 = arith.constant 0 : index
    %3 = vector.load %arg9[%c0, %c0_1] : memref<8x2048xf32, #tpu.memory_space<vmem>>, vector<8x2048xf32>
    %c0_2 = arith.constant 0 : index
    %c0_3 = arith.constant 0 : index
    %4 = vector.load %arg4[%c0_2, %c0_3] : memref<2048x256xbf16, #tpu.memory_space<vmem>>, vector<2048x256xbf16>
    %5 = arith.extf %4 : vector<2048x256xbf16> to vector<2048x256xf32>
    %cst = arith.constant dense<0.000000e+00> : vector<8x256xf32>
    %6 = tpu.matmul %3, %5, %cst {dimension_numbers = #tpu.dot_dimension_numbers<[1], [0], [0], [1], [0, 0, 1, 1], [], []>} : vector<8x2048xf32>, vector<2048x256xf32>, vector<8x256xf32> -> vector<8x256xf32>
    %c0_4 = arith.constant 0 : index
    %c0_5 = arith.constant 0 : index
    %7 = vector.load %arg5[%c0_4, %c0_5] : memref<1x256xf32, #tpu.memory_space<vmem>>, vector<1x256xf32>
    %8 = vector.broadcast %7 : vector<1x256xf32> to vector<8x256xf32>
    %9 = arith.addf %6, %8 : vector<8x256xf32>
    %cst_6 = arith.constant 5.000000e-01 : f32
    %10 = vector.broadcast %cst_6 : f32 to vector<8x256xf32>
    %11 = arith.mulf %10, %9 : vector<8x256xf32>
    %cst_7 = arith.constant 0.707106769 : f32
    %12 = vector.broadcast %cst_7 : f32 to vector<8x256xf32>
    %13 = arith.mulf %9, %12 : vector<8x256xf32>
    %14 = math.erf %13 : vector<8x256xf32>
    %cst_8 = arith.constant 1.000000e+00 : f32
    %15 = vector.broadcast %cst_8 : f32 to vector<8x256xf32>
    %16 = arith.addf %15, %14 : vector<8x256xf32>
    %17 = arith.mulf %11, %16 : vector<8x256xf32>
    %c0_9 = arith.constant 0 : index
    %c0_10 = arith.constant 0 : index
    %18 = vector.load %arg10[%c0_9, %c0_10] : memref<8x1024xf32, #tpu.memory_space<vmem>>, vector<8x1024xf32>
    %c0_11 = arith.constant 0 : index
    %c0_12 = arith.constant 0 : index
    %19 = vector.load %arg6[%c0_11, %c0_12] : memref<256x1024xbf16, #tpu.memory_space<vmem>>, vector<256x1024xbf16>
    %20 = arith.extf %19 : vector<256x1024xbf16> to vector<256x1024xf32>
    %cst_13 = arith.constant dense<0.000000e+00> : vector<8x1024xf32>
    %21 = tpu.matmul %17, %20, %cst_13 {dimension_numbers = #tpu.dot_dimension_numbers<[1], [0], [0], [1], [0, 0, 1, 1], [], []>} : vector<8x256xf32>, vector<256x1024xf32>, vector<8x1024xf32> -> vector<8x1024xf32>
    %22 = arith.addf %18, %21 : vector<8x1024xf32>
    %c0_14 = arith.constant 0 : index
    %c0_15 = arith.constant 0 : index
    %23 = vector.load %arg10[%c0_14, %c0_15] : memref<8x1024xf32, #tpu.memory_space<vmem>>, vector<8x1024xf32>
    tpu.vector_store %arg10[%c0_14, %c0_15], %22 {strides = array<i32>} : memref<8x1024xf32, #tpu.memory_space<vmem>>, vector<8x1024xf32>,
    %c7_i32 = arith.constant 7 : i32
    %24 = arith.cmpi eq, %arg0, %c7_i32 : i32
    %25 = arith.extui %24 : i1 to i32
    %c0_i32_16 = arith.constant 0 : i32
    %26 = arith.cmpi ne, %25, %c0_i32_16 : i32
    scf.if %26 {
      %c0_17 = arith.constant 0 : index
      %c0_18 = arith.constant 0 : index
      %27 = vector.load %arg10[%c0_17, %c0_18] : memref<8x1024xf32, #tpu.memory_space<vmem>>, vector<8x1024xf32>
      %c0_19 = arith.constant 0 : index
      %c0_20 = arith.constant 0 : index
      %28 = vector.load %arg7[%c0_19, %c0_20] : memref<1x1024xf32, #tpu.memory_space<vmem>>, vector<1x1024xf32>
      %29 = vector.broadcast %28 : vector<1x1024xf32> to vector<8x1024xf32>
      %30 = arith.addf %27, %29 : vector<8x1024xf32>
      %cst_21 = arith.constant 5.000000e-01 : f32
      %31 = vector.broadcast %cst_21 : f32 to vector<8x1024xf32>
      %32 = arith.mulf %31, %30 : vector<8x1024xf32>
      %cst_22 = arith.constant 0.707106769 : f32
      %33 = vector.broadcast %cst_22 : f32 to vector<8x1024xf32>
      %34 = arith.mulf %30, %33 : vector<8x1024xf32>
      %35 = math.erf %34 : vector<8x1024xf32>
      %cst_23 = arith.constant 1.000000e+00 : f32
      %36 = vector.broadcast %cst_23 : f32 to vector<8x1024xf32>
      %37 = arith.addf %36, %35 : vector<8x1024xf32>
      %38 = arith.mulf %32, %37 : vector<8x1024xf32>
      %c0_24 = arith.constant 0 : index
      %c0_25 = arith.constant 0 : index
      %39 = vector.load %arg8[%c0_24, %c0_25] : memref<8x1024xf32, #tpu.memory_space<vmem>>, vector<8x1024xf32>
      tpu.vector_store %arg8[%c0_24, %c0_25], %38 {strides = array<i32>} : memref<8x1024xf32, #tpu.memory_space<vmem>>, vector<8x1024xf32>,
    } else {
    }
    return
  }
  func.func @transform_0(%arg0: i32) -> (i32, i32) {
    %c0_i32 = arith.constant 0 : i32
    %c0_i32_0 = arith.constant 0 : i32
    %c0_i32_1 = arith.constant 0 : i32
    return %c0_i32, %c0_i32_0 : i32, i32
  }
  func.func @transform_1(%arg0: i32) -> (i32, i32) {
    %c0_i32 = arith.constant 0 : i32
    %c0_i32_0 = arith.constant 0 : i32
    %c0_i32_1 = arith.constant 0 : i32
    return %c0_i32, %c0_i32_0 : i32, i32
  }
  func.func @transform_2(%arg0: i32) -> (i32, i32) {
    %c0_i32 = arith.constant 0 : i32
    %c0_i32_0 = arith.constant 0 : i32
    %c0_i32_1 = arith.constant 0 : i32
    return %c0_i32, %c0_i32_0 : i32, i32
  }
  func.func @transform_3(%arg0: i32) -> (i32, i32) {
    %c0_i32 = arith.constant 0 : i32
    %c0_i32_0 = arith.constant 0 : i32
    return %c0_i32, %arg0 : i32, i32
  }
  func.func @transform_4(%arg0: i32) -> (i32, i32) {
    %c0_i32 = arith.constant 0 : i32
    %c0_i32_0 = arith.constant 0 : i32
    return %c0_i32, %arg0 : i32, i32
  }
  func.func @transform_5(%arg0: i32) -> (i32, i32) {
    %c0_i32 = arith.constant 0 : i32
    %c0_i32_0 = arith.constant 0 : i32
    return %arg0, %c0_i32 : i32, i32
  }
  func.func @transform_6(%arg0: i32) -> (i32, i32) {
    %c0_i32 = arith.constant 0 : i32
    %c0_i32_0 = arith.constant 0 : i32
    %c0_i32_1 = arith.constant 0 : i32
    return %c0_i32, %c0_i32_0 : i32, i32
  }
  func.func @transform_7(%arg0: i32) -> (i32, i32) {
    %c0_i32 = arith.constant 0 : i32
    %c0_i32_0 = arith.constant 0 : i32
    %c0_i32_1 = arith.constant 0 : i32
    return %c0_i32, %c0_i32_0 : i32, i32
  }
}

</mosaic_0001>

<bundles_post_ra>
// kernel: fmri_encoder_forward.1
= control target key start
LH: loop header
LB: loop body
LE: loop exit
PB: predicated region body
PF: predicated region fallthrough
CT: control target
= control target key end

     0   :  { %s6855_s0 = inlined_call_operand.vmem [shape: f32[8,32], index: 0, kind: input, shape index: {}]   ;;  %s6856_s1 = inlined_call_operand.hbm [shape: bf16[32,2048], index: 1, kind: input, shape index: {}]   ;;  %s6857_s2 = inlined_call_operand.hbm [shape: f32[1,2048], index: 2, kind: input, shape index: {}]   ;;  %s6858_s3 = inlined_call_operand.hbm [shape: bf16[2048,2048], index: 3, kind: input, shape index: {}]   ;;  %s6859_s4 = inlined_call_operand.hbm [shape: f32[1,2048], index: 4, kind: input, shape index: {}]   ;;  %s6860_s5 = inlined_call_operand.hbm [shape: bf16[2048,1024], index: 5, kind: input, shape index: {}]   ;;  %s6861_s6 = inlined_call_operand.hbm [shape: f32[1,1024], index: 6, kind: input, shape index: {}]   ;;  %s6862_s7 = inlined_call_operand.vmem [shape: f32[8,1024], index: 7, kind: output, shape index: {}]  }
   0x1   :  { %6867 = sst [smem:[#allocation19_spill]] %s6856_s1 }
   0x2   :  { %6868 = sst [smem:[#allocation20_spill]] %s6858_s3 }
   0x3   :  { %6869 = sst [smem:[#allocation21_spill]] %s6862_s7 }
   0x4   :  { %12 = vsyncpa [#allocation5], 0 }
   0x5   :  { %13 = vsyncpa [#allocation7], 0  ;;  %s5109_s24 = smov 0   ;;  %s5111_s25 = smov 0  }
   0x6   :  { %s5113_s26 = smov 0   ;;  %s5115_s27 = smov 0  }
   0x7 LB: > { %6870 = sst [smem:[#allocation16_spill]] %s5053_s26  ;;  %s5128_s28 = sadd.s32 4294967295, %s5057_s27   ;;  %s5057_s27 = sphi %s5115_s27, %s6911_s27   ;;  %s5053_s26 = sphi %s5113_s26, %s6913_s26   ;;  %s5049_s25 = sphi %s5111_s25, %s6915_s25   ;;  %s5045_s24 = sphi %s5109_s24, %s6914_s24  }
   0x8   : > { %s5131_s29 = sadd.s32 1, %s5057_s27   ;;  %s89_s8 = sadd.s32 1, %s5053_s26 }
   0x9   : > { %6871 = sst [smem:[#allocation17_spill]] %s5131_s29  ;;  %s86_s30 = ssub.s32 %s5057_s27, %s5131_s29 }
   0xa   : > { %p87_p0 = scmp.eq.s32.totalorder %s86_s30, 0  ;;  %p96_p1 = scmp.ne.s32.totalorder %s5053_s26, %s5049_s25 }
   0xb   : > { %p97_p2 = scmp.eq.s32.totalorder %s5057_s27, 0  ;;  %p102_p3 = scmp.ne.s32.totalorder %s5049_s25, %s5045_s24 }
   0xc   : > { %s5141_s9 = scalar_select %p87_p0, %s5053_s26, %s89_s8  }
   0xd   : > { %p5143_p4 = por %p97_p2, %p96_p1  ;;  %p103_p5 = scmp.eq.s32.totalorder %s5128_s28, 0 }
   0xe   : > { %6872 = sst [smem:[#allocation18_spill]] %s5141_s9  ;;  %p4349_p6 = scmp.ge.s32.totalorder %s5057_s27, 1 }
   0xf   : > { %p207_p7 = scmp.lt.s32.totalorder %s5057_s27, 9  ;;  %p5152_p8 = por %p103_p5, %p102_p3 }
  0x10   : > { %p4350_p9 = scmp.ne.s32.totalorder %s5128_s28, 0  ;;  %s6876_s1 = sld [smem:[#allocation19_spill]] }
  0x11   : > { %p5157_p10 = pnand %p4349_p6, %p207_p7  ;;  %s5059_s16 = smov [#allocation4]  }
  0x12   : > { %s223_s17 = sshll.u32 %s5059_s16, 4  ;;  %p4460_p13 = scmp.lt.s32.totalorder %s5057_s27, 8  ;;  %s224_s17 = int_to_ptr.vmem [resolvable:$true] %s223_s17 }
  0x13   : > { %p4437_p11 = pneg %p5157_p10  ;;  %s261_s19 = sand.u32 1, %s5057_s27  }
  0x14   : > { %s5060_s20 = smov 1024   ;;  %s5061_s21 = smov 64  }
  0x15   : > { %p5168_p12 = pnand %p4437_p11, %p103_p5  ;;  %p5180_p0 = pnand %p4460_p13, %p5143_p4 }
  0x16   : > { %s221_s15 = sshll.u32 %s6876_s1, 4  ;;  %s5185_s23 = sand.u32 1, %s5053_s26   ;;  %s222_s15 = int_to_ptr.hbm [resolvable:$true] %s221_s15 }
  0x17   : > { %4440 = dma.hbm_to_vmem [thread:$0]  (!%p5168_p12), %s222_s15, 4096, %s224_s17, [#allocation5], %s5060_s20, %s5060_s20, %s5061_s21  }
  0x18   : > { %s4416_s24 = sshll.u32 %s5057_s27, 3  ;;  %s4354_s30 = sshll.u32 %s5185_s23, 11 }
  0x19   : > { %s6879_s3 = sld [smem:[#allocation20_spill]]  ;;  %s265_s1 = scalar_lea.vmem [#allocation8], %s4354_s30 }
  0x1a   : > { %s273_s9 = sshll.u32 %s265_s1, 4  ;;  %s5192_s10 = scalar_lea.sflag [#allocation5], %s261_s19  ;;  %s274_s9 = int_to_ptr.vmem [resolvable:$true] %s273_s9 }
  0x1b   : > { %p4865_p2 = pneg %p5180_p0 }
  0x1f   : > { %s270_s14 = scalar_lea.hbm %s6879_s3, %s4416_s24  ;;  %s4868_s24 = scalar_lea.hbm %s6879_s3, 16384 }
  0x20   : > { %s271_s16 = sshll.u32 %s270_s14, 4  ;;  %s272_s16 = int_to_ptr.hbm [resolvable:$true] %s271_s16 }
  0x21   : > { %s4861_s15 = sshra.s32 %s272_s16, 4  ;;  %s4862_s15 = int_to_ptr.hbm [resolvable:$true] %s4861_s15 }
  0x22   : > { %s4863_s17 = scalar_lea.hbm %s4862_s15, 2048  ;;  %p4869_p6 = scmp.lt.s32.totalorder %s4862_s15, %s6879_s3 }
  0x23   : > { %p4864_p1 = scmp.ne.s32.totalorder %s4862_s15, %s4863_s17  ;;  %p4870_p7 = scmp.lt.s32.totalorder %s4868_s24, %s4863_s17 }
  0x25   : > { %p4866_p3 = pnand %p4865_p2, %p4864_p1  ;;  %p4871_p11 = por %p4870_p7, %p4869_p6 }
  0x27   : > { %p4867_p4 = pneg %p4866_p3 }
  0x29   : > { %p4872_p13 = pnand %p4871_p11, %p4867_p4 }
  0x2b   : > { %4875 = shalt.err (!%p4872_p13)
}
  0x2c   : > { %s5062_s19 = smov 128   ;;  %s5063_s13 = smov 8  }
  0x2d   : > { %4450 = dma.hbm_to_vmem [thread:$0]  (!%p5180_p0), %s272_s16, 32768, %s274_s9, %s5192_s10, %s5060_s20, %s5062_s19, %s5063_s13  }
  0x2e   : > { %s236_s8 = sshll.u32 %s6857_s2, 4  ;;  %s5064_s15 = smov [#allocation6]   ;;  %s237_s8 = int_to_ptr.hbm [resolvable:$true] %s236_s8 }
  0x2f   : > { %s238_s17 = sshll.u32 %s5064_s15, 4  ;;  %s4357_s24 = sshll.u32 %s5185_s23, 1  ;;  %s239_s17 = int_to_ptr.vmem [resolvable:$true] %s238_s17 }
  0x30   : > { %4443 = dma.hbm_to_vmem [thread:$0]  (!%p5168_p12), %s237_s8, 256, %s239_s17, [#allocation7]  }
  0x31   : > { %s4358_s30 = sshll.u32 %s5057_s27, 1  ;;  %s287_s29 = scalar_lea.vmem [#allocation9], %s4357_s24 }
  0x32   : > { %s291_s26 = scalar_lea.hbm %s6859_s4, %s4358_s30  ;;  %s295_s7 = sshll.u32 %s287_s29, 4  ;;  %s296_s7 = int_to_ptr.vmem [resolvable:$true] %s295_s7 }
  0x33   : > { %s293_s9 = sshll.u32 %s291_s26, 4  ;;  %s248_s19 = sshll.u32 %s6861_s6, 4  ;;  %s294_s9 = int_to_ptr.hbm [resolvable:$true] %s293_s9  ;;  %s249_s19 = int_to_ptr.hbm [resolvable:$true] %s248_s19 }
  0x34   : > { %s4921_s13 = sshra.s32 %s294_s9, 4  ;;  %s4928_s8 = scalar_lea.hbm %s6859_s4, 16  ;;  %s4922_s13 = int_to_ptr.hbm [resolvable:$true] %s4921_s13 }
  0x35   : > { %s4923_s14 = scalar_lea.hbm %s4922_s13, 2  ;;  %p4929_p6 = scmp.lt.s32.totalorder %s4922_s13, %s6859_s4 }
  0x36   : > { %p4924_p1 = scmp.ne.s32.totalorder %s4922_s13, %s4923_s14  ;;  %p4930_p7 = scmp.lt.s32.totalorder %s4928_s8, %s4923_s14 }
  0x38   : > { %p4926_p3 = pnand %p4924_p1, %p4865_p2  ;;  %p4931_p11 = por %p4930_p7, %p4929_p6 }
  0x3a   : > { %p4927_p4 = pneg %p4926_p3 }
  0x3c   : > { %p4932_p13 = pnand %p4931_p11, %p4927_p4 }
  0x3e   : > { %4935 = shalt.err (!%p4932_p13)
}
  0x3f   : > { %4453 = dma.hbm_to_vmem [thread:$0]  (!%p5180_p0), %s294_s9, 32, %s296_s7, %s5192_s10  }
  0x40   : > { %s5065_s15 = smov [#allocation11]   ;;  %s4359_s24 = sshll.u32 %s5185_s23, 10 }
  0x41   : > { %s250_s17 = sshll.u32 %s5065_s15, 4  ;;  %s4418_s30 = sshll.u32 %s5057_s27, 10  ;;  %s251_s17 = int_to_ptr.vmem [resolvable:$true] %s250_s17 }
  0x42   : > { %4446 = dma.hbm_to_vmem [thread:$0]  (!%p5168_p12), %s249_s19, 128, %s251_s17, [#allocation7]  }
  0x43   : > { %s306_s1 = scalar_lea.vmem [#allocation10], %s4359_s24  ;;  %s312_s14 = scalar_lea.hbm %s6860_s5, %s4418_s30 }
  0x44   : > { %s315_s20 = sshll.u32 %s306_s1, 4  ;;  %s313_s21 = sshll.u32 %s312_s14, 4  ;;  %s316_s20 = int_to_ptr.vmem [resolvable:$true] %s315_s20  ;;  %s314_s21 = int_to_ptr.hbm [resolvable:$true] %s313_s21 }
  0x45   : > { %s4981_s3 = sshra.s32 %s314_s21, 4  ;;  %s4988_s27 = scalar_lea.hbm %s6860_s5, 8192  ;;  %s4982_s3 = int_to_ptr.hbm [resolvable:$true] %s4981_s3 }
  0x46   : > { %s4983_s7 = scalar_lea.hbm %s4982_s3, 1024  ;;  %p4989_p12 = scmp.lt.s32.totalorder %s4982_s3, %s6860_s5 }
  0x47   : > { %p4984_p1 = scmp.ne.s32.totalorder %s4982_s3, %s4983_s7  ;;  %p4990_p6 = scmp.lt.s32.totalorder %s4988_s27, %s4983_s7 }
  0x49   : > { %p4986_p3 = pnand %p4984_p1, %p4865_p2  ;;  %p4991_p7 = por %p4990_p6, %p4989_p12 }
  0x4b   : > { %p4987_p4 = pneg %p4986_p3 }
  0x4d   : > { %p4992_p11 = pnand %p4991_p7, %p4987_p4 }
  0x4f   : > { %4995 = shalt.err (!%p4992_p11)
}
  0x50   : > { %s5066_s8 = smov 512   ;;  %s5067_s29 = smov 32  }
  0x51   : > { %4456 = dma.hbm_to_vmem [thread:$0]  (!%p5180_p0), %s314_s21, 16384, %s316_s20, %s5192_s10, %s5066_s8, %s5066_s8, %s5067_s29  }
  0x52   : > { %327 = sbr.rel (%p5157_p10) target bundleno = 1220 (0x4c4), region = 48 }
  0x57   : > { %5028 = dma.done.wait (%p103_p5), [#allocation5], 4096  }
  0x58   : > { %5030 = vsyncadd (%p103_p5), [#allocation5], 4294963200 }
  0x59   : > { %5032 = dma.done.wait (%p103_p5), [#allocation7], 256  }
  0x5a   : > { %5034 = vsyncadd (%p103_p5), [#allocation7], 4294967040  ;;  %s339_s22 = sand.u32 1, %s5128_s28   ;;  %s341_s10 = sand.u32 1, %s5049_s25  }
  0x5b   : > { %s4366_s26 = sshll.u32 %s341_s10, 11  ;;  %s340_s12 = scalar_lea.sflag [#allocation5], %s339_s22 }
  0x5c   : > { %s5265_s15 = scalar_lea.vmem [#allocation8], %s4366_s26 }
  0x5d   : > { %5036 = dma.done.wait (%p5152_p8), %s340_s12, 49184  }
  0x5e   : > { %5038 = vsyncadd (%p5152_p8), %s340_s12, 4294918112  ;;  %s4367_s17 = sshll.u32 %s341_s10, 1  ;;  %s4368_s24 = sshll.u32 %s341_s10, 10 }
  0x5f   : > { %s5271_s30 = scalar_lea.vmem [#allocation9], %s4367_s17  ;;  %s5273_s1 = scalar_lea.vmem [#allocation10], %s4368_s24 }
  0x60   : > { %5040 = dma.done.wait (%p103_p5), [#allocation7], 128  }
  0x61   : > { %5042 = vsyncadd (%p103_p5), [#allocation7], 4294967168  ;;  %411 = sbr.rel (%p4350_p9) target bundleno = 445 (0x1bd), region = 76 }
  0x66   : > { %v437_v0 = vld [vmem:[#allocation4 + $0xc0] sm:$0xff]  ;;  %v438_v1 = vld [vmem:[#allocation4 + $0xc8] sm:$0xff]  ;;  %v440_v24 = vld [vmem:[#allocation4 + $0xd8] sm:$0xff]  ;;  %vm545_vm0 = vcmask 261120  }
  0x67   : > { %v429_v2 = vld [vmem:[#allocation4 + $0x80] sm:$0xff]  ;;  %v493_v3 = vunpack.c.l.bf16 %v437_v0  ;;  %v494_v4 = vunpack.c.h.bf16 %v437_v0  ;;  %v495_v5 = vunpack.c.l.bf16 %v438_v1  ;;  %v496_v6 = vunpack.c.h.bf16 %v438_v1  ;;  %v430_v7 = vld [vmem:[#allocation4 + $0x88] sm:$0xff]  ;;  %v439_v25 = vld [vmem:[#allocation4 + $0xd0] sm:$0xff] }
  0x68   : > { %v421_v8 = vld [vmem:[#allocation4 + $0x40] sm:$0xff]  ;;  %v422_v9 = vld [vmem:[#allocation4 + $0x48] sm:$0xff]  ;;  %v477_v10 = vunpack.c.l.bf16 %v429_v2  ;;  %v478_v11 = vunpack.c.h.bf16 %v429_v2  ;;  %v479_v12 = vunpack.c.l.bf16 %v430_v7  ;;  %v480_v13 = vunpack.c.h.bf16 %v430_v7  ;;  %v432_v27 = vld [vmem:[#allocation4 + $0x98] sm:$0xff] }
  0x69   : > { %v413_v14 = vld [vmem:[#allocation4] sm:$0xff]  ;;  %561 = vmatpush.msra.mxu0 %v493_v3  ;;  %581 = vmatpush.msra.mxu1 %v494_v4  ;;  %v461_v15 = vunpack.c.l.bf16 %v421_v8  ;;  %v462_v16 = vunpack.c.h.bf16 %v421_v8  ;;  %v414_v17 = vld [vmem:[#allocation4 + $0x8] sm:$0xff]  ;;  %v463_v18 = vunpack.c.l.bf16 %v422_v9  ;;  %v464_v19 = vunpack.c.h.bf16 %v422_v9  ;;  %v431_v30 = vld [vmem:[#allocation4 + $0x90] sm:$0xff] }
  0x6a   : > { %601 = vmatpush.msra.mxu2 %v495_v5  ;;  %621 = vmatpush.msra.mxu3 %v496_v6  ;;  %v445_v20 = vunpack.c.l.bf16 %v413_v14  ;;  %v446_v21 = vunpack.c.h.bf16 %v413_v14  ;;  %v447_v22 = vunpack.c.l.bf16 %v414_v17  ;;  %v448_v23 = vunpack.c.h.bf16 %v414_v17  ;;  %v5284_v26 = vld [vmem:[%s6855_s0] sm:$0xff]  ;;  %v424_v33 = vld [vmem:[#allocation4 + $0x58] sm:$0xff]  ;;  %v423_v36 = vld [vmem:[#allocation4 + $0x50] sm:$0xff] }
  0x6b   : > { %562 = vmatpush.msra.mxu0 %v477_v10  ;;  %582 = vmatpush.msra.mxu1 %v478_v11  ;;  %v499_v28 = vunpack.c.l.bf16 %v440_v24  ;;  %v500_v29 = vunpack.c.h.bf16 %v440_v24  ;;  %v497_v31 = vunpack.c.l.bf16 %v439_v25  ;;  %v498_v32 = vunpack.c.h.bf16 %v439_v25  ;;  %v416_v39 = vld [vmem:[#allocation4 + $0x18] sm:$0xff]  ;;  %v415_v42 = vld [vmem:[#allocation4 + $0x10] sm:$0xff]  ;;  %v442_v49 = vld [vmem:[#allocation4 + $0xe8] sm:$0xff] }
  0x6c   : > { %602 = vmatpush.msra.mxu2 %v479_v12  ;;  %622 = vmatpush.msra.mxu3 %v480_v13  ;;  %v483_v34 = vunpack.c.l.bf16 %v432_v27  ;;  %v484_v35 = vunpack.c.h.bf16 %v432_v27  ;;  %v481_v37 = vunpack.c.l.bf16 %v431_v30  ;;  %v482_v38 = vunpack.c.h.bf16 %v431_v30  ;;  %v441_v50 = vld [vmem:[#allocation4 + $0xe0] sm:$0xff]  ;;  %v434_v51 = vld [vmem:[#allocation4 + $0xa8] sm:$0xff]  ;;  %v444_v9 = vld [vmem:[#allocation4 + $0xf8] sm:$0xff] }
  0x6d   : > { %563 = vmatpush.msra.mxu0 %v461_v15  ;;  %583 = vmatpush.msra.mxu1 %v462_v16  ;;  %v467_v40 = vunpack.c.l.bf16 %v424_v33  ;;  %v468_v41 = vunpack.c.h.bf16 %v424_v33  ;;  %v465_v43 = vunpack.c.l.bf16 %v423_v36  ;;  %v466_v44 = vunpack.c.h.bf16 %v423_v36  ;;  %v433_v54 = vld [vmem:[#allocation4 + $0xa0] sm:$0xff]  ;;  %v426_v57 = vld [vmem:[#allocation4 + $0x68] sm:$0xff]  ;;  %v443_v10 = vld [vmem:[#allocation4 + $0xf0] sm:$0xff] }
  0x6e   : > { %603 = vmatpush.msra.mxu2 %v463_v18  ;;  %623 = vmatpush.msra.mxu3 %v464_v19  ;;  %v451_v45 = vunpack.c.l.bf16 %v416_v39  ;;  %v452_v46 = vunpack.c.h.bf16 %v416_v39  ;;  %v449_v47 = vunpack.c.l.bf16 %v415_v42  ;;  %v450_v48 = vunpack.c.h.bf16 %v415_v42  ;;  %v425_v60 = vld [vmem:[#allocation4 + $0x60] sm:$0xff]  ;;  %v418_v63 = vld [vmem:[#allocation4 + $0x28] sm:$0xff]  ;;  %v436_v11 = vld [vmem:[#allocation4 + $0xb8] sm:$0xff] }
  0x6f   : > { %564 = vmatpush.msra.mxu0 %v445_v20  ;;  %584 = vmatpush.msra.mxu1 %v446_v21  ;;  %v503_v52 = vunpack.c.l.bf16 %v442_v49  ;;  %v504_v53 = vunpack.c.h.bf16 %v442_v49  ;;  %v501_v55 = vunpack.c.l.bf16 %v441_v50  ;;  %v502_v56 = vunpack.c.h.bf16 %v441_v50  ;;  %v417_v2 = vld [vmem:[#allocation4 + $0x20] sm:$0xff]  ;;  %v435_v14 = vld [vmem:[#allocation4 + $0xb0] sm:$0xff]  ;;  %v428_v17 = vld [vmem:[#allocation4 + $0x78] sm:$0xff] }
  0x70   : > { %604 = vmatpush.msra.mxu2 %v447_v22  ;;  %624 = vmatpush.msra.mxu3 %v448_v23  ;;  %v487_v58 = vunpack.c.l.bf16 %v434_v51  ;;  %v488_v59 = vunpack.c.h.bf16 %v434_v51  ;;  %v485_v61 = vunpack.c.l.bf16 %v433_v54  ;;  %v486_v62 = vunpack.c.h.bf16 %v433_v54  ;;  %v427_v20 = vld [vmem:[#allocation4 + $0x70] sm:$0xff]  ;;  %v420_v23 = vld [vmem:[#allocation4 + $0x38] sm:$0xff] }
  0x71   : > { %4371 = vmatmul.msk.f32.vlgmr.msra.gmra.mxu0 %vm545_vm0, %v5284_v26  ;;  %4372 = vmatmul.msk.f32.vlgmr.msra.gmra.mxu1 %vm545_vm0, %v5284_v26  ;;  %v471_v0 = vunpack.c.l.bf16 %v426_v57  ;;  %v472_v1 = vunpack.c.h.bf16 %v426_v57  ;;  %v469_v3 = vunpack.c.l.bf16 %v425_v60  ;;  %v470_v4 = vunpack.c.h.bf16 %v425_v60  ;;  %v419_v27 = vld [vmem:[#allocation4 + $0x30] sm:$0xff] }
  0x72   : > { %4373 = vmatmul.msk.f32.vlgmr.msra.gmra.mxu2 %vm545_vm0, %v5284_v26  ;;  %4374 = vmatmul.msk.f32.vlgmr.msra.gmra.mxu3 %vm545_vm0, %v5284_v26  ;;  %v455_v5 = vunpack.c.l.bf16 %v418_v63  ;;  %v456_v6 = vunpack.c.h.bf16 %v418_v63  ;;  %v453_v7 = vunpack.c.l.bf16 %v417_v2  ;;  %v454_v8 = vunpack.c.h.bf16 %v417_v2 }
  0x73   : > { %681 = vmatpush.msrb.mxu2 %v499_v28  ;;  %701 = vmatpush.msrb.mxu3 %v500_v29  ;;  %v507_v12 = vunpack.c.l.bf16 %v444_v9  ;;  %v508_v13 = vunpack.c.h.bf16 %v444_v9  ;;  %v505_v15 = vunpack.c.l.bf16 %v443_v10  ;;  %v506_v16 = vunpack.c.h.bf16 %v443_v10 }
  0x74   : > { %641 = vmatpush.msrb.mxu0 %v497_v31  ;;  %661 = vmatpush.msrb.mxu1 %v498_v32  ;;  %v491_v18 = vunpack.c.l.bf16 %v436_v11  ;;  %v492_v19 = vunpack.c.h.bf16 %v436_v11  ;;  %v489_v21 = vunpack.c.l.bf16 %v435_v14  ;;  %v490_v22 = vunpack.c.h.bf16 %v435_v14 }
  0x75   : > { %682 = vmatpush.msrb.mxu2 %v483_v34  ;;  %702 = vmatpush.msrb.mxu3 %v484_v35  ;;  %v475_v24 = vunpack.c.l.bf16 %v428_v17  ;;  %v476_v25 = vunpack.c.h.bf16 %v428_v17  ;;  %v473_v28 = vunpack.c.l.bf16 %v427_v20  ;;  %v474_v29 = vunpack.c.h.bf16 %v427_v20  ;;  %v5318_v34 = vld [vmem:[#allocation6] sm:$0xff] }
  0x76   : > { %642 = vmatpush.msrb.mxu0 %v481_v37  ;;  %662 = vmatpush.msrb.mxu1 %v482_v38  ;;  %v459_v30 = vunpack.c.l.bf16 %v420_v23  ;;  %v460_v31 = vunpack.c.h.bf16 %v420_v23  ;;  %v457_v32 = vunpack.c.l.bf16 %v419_v27  ;;  %v458_v33 = vunpack.c.h.bf16 %v419_v27 }
  0x77   : > { %683 = vmatpush.msrb.mxu2 %v467_v40  ;;  %703 = vmatpush.msrb.mxu3 %v468_v41  ;;  %v513_v35 = vperm.slane %v5318_v34, 0  ;;  %v514_v36 = vperm.slane %v5318_v34, 1  ;;  %v517_v57 = vperm.slane %v5318_v34, 4 }
  0x78   : > { %643 = vmatpush.msrb.mxu0 %v465_v43  ;;  %663 = vmatpush.msrb.mxu1 %v466_v44  ;;  %v516_v43 = vperm.slane %v5318_v34, 3 }
  0x79   : > { %684 = vmatpush.msrb.mxu2 %v451_v45  ;;  %704 = vmatpush.msrb.mxu3 %v452_v46 }
  0x7a   : > { %644 = vmatpush.msrb.mxu0 %v449_v47  ;;  %664 = vmatpush.msrb.mxu1 %v450_v48 }
  0x7b   : > { %4375 = vmatmul.msk.f32.vlgmr.msrb.gmra.mxu0 %vm545_vm0, %v5284_v26  ;;  %4376 = vmatmul.msk.f32.vlgmr.msrb.gmra.mxu1 %vm545_vm0, %v5284_v26 }
  0x7c   : > { %4377 = vmatmul.msk.f32.vlgmr.msrb.gmra.mxu2 %vm545_vm0, %v5284_v26  ;;  %4378 = vmatmul.msk.f32.vlgmr.msrb.gmra.mxu3 %vm545_vm0, %v5284_v26 }
  0x7d   : > { %761 = vmatpush.msra.mxu2 %v503_v52  ;;  %781 = vmatpush.msra.mxu3 %v504_v53 }
  0x7e   : > { %721 = vmatpush.msra.mxu0 %v501_v55  ;;  %741 = vmatpush.msra.mxu1 %v502_v56 }
  0x7f   : > { %762 = vmatpush.msra.mxu2 %v487_v58  ;;  %782 = vmatpush.msra.mxu3 %v488_v59 }
  0x80   : > { %722 = vmatpush.msra.mxu0 %v485_v61  ;;  %742 = vmatpush.msra.mxu1 %v486_v62 }
  0x81   : > { %763 = vmatpush.msra.mxu2 %v471_v0  ;;  %783 = vmatpush.msra.mxu3 %v472_v1 }
  0x82   : > { %723 = vmatpush.msra.mxu0 %v469_v3  ;;  %743 = vmatpush.msra.mxu1 %v470_v4 }
  0x83   : > { %764 = vmatpush.msra.mxu2 %v455_v5  ;;  %784 = vmatpush.msra.mxu3 %v456_v6 }
  0x84   : > { %724 = vmatpush.msra.mxu0 %v453_v7  ;;  %744 = vmatpush.msra.mxu1 %v454_v8 }
  0x85   : > { %4379 = vmatmul.msk.f32.vlgmr.msra.gmra.mxu0 %vm545_vm0, %v5284_v26  ;;  %4380 = vmatmul.msk.f32.vlgmr.msra.gmra.mxu1 %vm545_vm0, %v5284_v26 }
  0x86   : > { %4381 = vmatmul.msk.f32.vlgmr.msra.gmra.mxu2 %vm545_vm0, %v5284_v26  ;;  %4382 = vmatmul.msk.f32.vlgmr.msra.gmra.mxu3 %vm545_vm0, %v5284_v26 }
  0x87   : > { %841 = vmatpush.msrb.mxu2 %v507_v12  ;;  %861 = vmatpush.msrb.mxu3 %v508_v13 }
  0x88   : > { %801 = vmatpush.msrb.mxu0 %v505_v15  ;;  %821 = vmatpush.msrb.mxu1 %v506_v16 }
  0x89   : > { %842 = vmatpush.msrb.mxu2 %v491_v18  ;;  %862 = vmatpush.msrb.mxu3 %v492_v19 }
  0x8a   : > { %802 = vmatpush.msrb.mxu0 %v489_v21  ;;  %822 = vmatpush.msrb.mxu1 %v490_v22 }
  0x8b   : > { %843 = vmatpush.msrb.mxu2 %v475_v24  ;;  %863 = vmatpush.msrb.mxu3 %v476_v25 }
  0x8c   : > { %803 = vmatpush.msrb.mxu0 %v473_v28  ;;  %823 = vmatpush.msrb.mxu1 %v474_v29 }
  0x8d   : > { %844 = vmatpush.msrb.mxu2 %v459_v30  ;;  %864 = vmatpush.msrb.mxu3 %v460_v31 }
  0x8e   : > { %804 = vmatpush.msrb.mxu0 %v457_v32  ;;  %824 = vmatpush.msrb.mxu1 %v458_v33 }
  0x8f   : > { %4383 = vmatmul.msk.f32.vlgmr.msrb.gmra.mxu0 %vm545_vm0, %v5284_v26  ;;  %4384 = vmatmul.msk.f32.vlgmr.msrb.gmra.mxu1 %vm545_vm0, %v5284_v26 }
  0x90   : > { %4385 = vmatmul.msk.f32.vlgmr.msrb.gmra.mxu2 %vm545_vm0, %v5284_v26  ;;  %4386 = vmatmul.msk.f32.vlgmr.msrb.gmra.mxu3 %vm545_vm0, %v5284_v26  ;;  %v515_v26 = vperm.slane %v5318_v34, 2 }
  0xee   : > { %v566_v37 = vpop.f32.mrf.mxu0  ;;  %v586_v38 = vpop.f32.mrf.mxu1 }
  0xef   : > { %v5322_v39 = vadd.f32 %v566_v37, %v513_v35  ;;  %v5324_v40 = vadd.f32 %v586_v38, %v514_v36 }
  0xf1   : > { %v5327_v41 = vmul.f32 0.70710677, %v5322_v39  ;;  %v5330_v42 = vmul.f32 0.70710677, %v5324_v40 }
  0xf3   : > { %v901_v44 = vmul.f32 %v5327_v41, %v5327_v41  ;;  %v941_v45 = vmul.f32 %v5330_v42, %v5330_v42 }
  0xf5   : > { %v5338_v46 = vmin.f32 %v901_v44, 16.0  ;;  %v5340_v47 = vmin.f32 %v941_v45, 16.0  ;;  %v606_v48 = vpop.f32.mrf.mxu2  ;;  %v626_v49 = vpop.f32.mrf.mxu3 }
  0xf6   : > { %v5342_v50 = vadd.f32 %v606_v48, %v515_v26  ;;  %v5344_v51 = vadd.f32 %v626_v49, %v516_v43 }
  0xf7   : > { %v903_v52 = vmul.f32 2.1237322e-06, %v5338_v46  ;;  %v914_v53 = vmul.f32 3.8918573e-05, %v5338_v46  ;;  %v943_v54 = vmul.f32 2.1237322e-06, %v5340_v47 }
  0xf8   : > { %v954_v55 = vmul.f32 3.8918573e-05, %v5340_v47  ;;  %v5351_v56 = vmul.f32 0.70710677, %v5342_v50  ;;  %v646_v61 = vpop.f32.mrf.mxu0  ;;  %v5357_v0 = vmul.f32 0.70710677, %v5344_v51 }
  0xf9   : > { %v904_v58 = vadd.f32 0.00028619796, %v903_v52  ;;  %v915_v59 = vadd.f32 0.001143296, %v914_v53  ;;  %v944_v60 = vadd.f32 0.00028619796, %v943_v54  ;;  %v5367_v7 = vadd.f32 %v646_v61, %v517_v57 }
  0xfa   : > { %v955_v62 = vadd.f32 0.001143296, %v954_v55  ;;  %v981_v63 = vmul.f32 %v5351_v56, %v5351_v56  ;;  %v1021_v6 = vmul.f32 %v5357_v0, %v5357_v0 }
  0xfb   : > { %v905_v1 = vmul.f32 %v904_v58, %v5338_v46  ;;  %v916_v2 = vmul.f32 %v915_v59, %v5338_v46  ;;  %v945_v3 = vmul.f32 %v944_v60, %v5340_v47  ;;  %v5378_v21 = vmul.f32 0.70710677, %v5367_v7 }
  0xfc   : > { %v956_v4 = vmul.f32 %v955_v62, %v5340_v47  ;;  %v5363_v5 = vmin.f32 %v981_v63, 16.0  ;;  %v5374_v17 = vmin.f32 %v1021_v6, 16.0 }
  0xfd   : > { %v906_v8 = vadd.f32 0.0036580483, %v905_v1  ;;  %v917_v9 = vadd.f32 0.014752088, %v916_v2  ;;  %v946_v10 = vadd.f32 0.0036580483, %v945_v3  ;;  %v1061_v63 = vmul.f32 %v5378_v21, %v5378_v21 }
  0xfe   : > { %v957_v11 = vadd.f32 0.014752088, %v956_v4  ;;  %v983_v12 = vmul.f32 2.1237322e-06, %v5363_v5  ;;  %v994_v13 = vmul.f32 3.8918573e-05, %v5363_v5 }
  0xff   : > { %v907_v14 = vmul.f32 %v906_v8, %v5338_v46  ;;  %v918_v15 = vmul.f32 %v917_v9, %v5338_v46  ;;  %v947_v16 = vmul.f32 %v946_v10, %v5340_v47  ;;  %v1023_v29 = vmul.f32 2.1237322e-06, %v5374_v17  ;;  %v666_v8 = vpop.f32.mrf.mxu1 }
 0x100   : > { %v958_v18 = vmul.f32 %v957_v11, %v5340_v47  ;;  %v984_v19 = vadd.f32 0.00028619796, %v983_v12  ;;  %v995_v20 = vadd.f32 0.001143296, %v994_v13  ;;  %v1034_v33 = vmul.f32 3.8918573e-05, %v5374_v17 }
 0x101   : > { %v908_v22 = vadd.f32 0.05243302, %v907_v14  ;;  %v919_v23 = vadd.f32 0.112945676, %v918_v15  ;;  %v948_v24 = vadd.f32 0.05243302, %v947_v16 }
 0x102   : > { %v959_v25 = vadd.f32 0.112945676, %v958_v18  ;;  %v985_v27 = vmul.f32 %v984_v19, %v5363_v5  ;;  %v996_v28 = vmul.f32 %v995_v20, %v5363_v5  ;;  %v1024_v38 = vadd.f32 0.00028619796, %v1023_v29 }
 0x103   : > { %v909_v30 = vmul.f32 %v908_v22, %v5338_v46  ;;  %v920_v31 = vmul.f32 %v919_v23, %v5338_v46  ;;  %v949_v32 = vmul.f32 %v948_v24, %v5340_v47  ;;  %v1035_v57 = vadd.f32 0.001143296, %v1034_v33 }
 0x104   : > { %v960_v35 = vmul.f32 %v959_v25, %v5340_v47  ;;  %v986_v36 = vadd.f32 0.0036580483, %v985_v27  ;;  %v997_v37 = vadd.f32 0.014752088, %v996_v28  ;;  %v1025_v52 = vmul.f32 %v1024_v38, %v5374_v17 }
 0x105   : > { %v910_v26 = vadd.f32 0.18741608, %v909_v30  ;;  %v921_v43 = vadd.f32 0.4994258, %v920_v31  ;;  %v950_v44 = vadd.f32 0.18741608, %v949_v32 }
 0x106   : > { %v961_v45 = vadd.f32 0.4994258, %v960_v35  ;;  %v987_v48 = vmul.f32 %v986_v36, %v5363_v5  ;;  %v998_v49 = vmul.f32 %v997_v37, %v5363_v5  ;;  %v1026_v61 = vadd.f32 0.0036580483, %v1025_v52 }
 0x107   : > { %v911_v53 = vmul.f32 %v910_v26, %v5338_v46  ;;  %v922_v54 = vmul.f32 %v921_v43, %v5338_v46  ;;  %v951_v55 = vmul.f32 %v950_v44, %v5340_v47  ;;  %v518_v1 = vperm.slane %v5318_v34, 5 }
 0x108   : > { %v962_v58 = vmul.f32 %v961_v45, %v5340_v47  ;;  %v988_v59 = vadd.f32 0.05243302, %v987_v48  ;;  %v999_v60 = vadd.f32 0.112945676, %v998_v49  ;;  %v1027_v4 = vmul.f32 %v1026_v61, %v5374_v17 }
 0x109   : > { %v5395_v62 = vadd.f32 1.0, %v922_v54  ;;  %v912_v6 = vadd.f32 1.1283791, %v911_v53  ;;  %v1036_v47 = vmul.f32 %v1035_v57, %v5374_v17  ;;  %v5408_v9 = vmul.f32 0.5, %v5322_v39 }
 0x10a   : > { %v5400_v2 = vadd.f32 1.0, %v962_v58  ;;  %v989_v3 = vmul.f32 %v988_v59, %v5363_v5  ;;  %v1000_v46 = vmul.f32 %v999_v60, %v5363_v5  ;;  %v5411_v10 = vmul.f32 0.5, %v5324_v40 }
 0x10b   : > { %4506 = vrcp.f32 %v5395_v62  ;;  %v952_v11 = vadd.f32 1.1283791, %v951_v55  ;;  %v935_v12 = vand.u32 2147483648, %v5395_v62  ;;  %v5416_v13 = vmul.f32 0.5, %v5342_v50 }
 0x10c   : > { %4508 = vrcp.f32 %v5400_v2  ;;  %v990_v14 = vadd.f32 0.18741608, %v989_v3  ;;  %v5418_v15 = vmin.f32 %v1061_v63, 16.0  ;;  %v933_v16 = vand.u32 2147483647, %v5395_v62 }
 0x10d   : > { %v1001_v18 = vadd.f32 0.4994258, %v1000_v46  ;;  %v1028_v19 = vadd.f32 0.05243302, %v1027_v4  ;;  %v5421_v39 = vadd.f32 %v666_v8, %v518_v1  ;;  %v913_v40 = vmul.f32 %v912_v6, %v5327_v41 }
 0x10e   : > { %v973_v20 = vand.u32 2147483647, %v5400_v2  ;;  %v991_v22 = vmul.f32 %v990_v14, %v5363_v5  ;;  %v1037_v23 = vadd.f32 0.014752088, %v1036_v47  ;;  %vm929_vm1 = vweird.f32 %v5395_v62 }
 0x10f   : > { %v953_v50 = vmul.f32 %v952_v11, %v5330_v42  ;;  %v975_v24 = vand.u32 2147483648, %v5400_v2  ;;  %v1002_v25 = vmul.f32 %v1001_v18, %v5363_v5  ;;  %v936_v28 = vor.u32 1.1754944e-38, %v935_v12 }
 0x110   : > { %vm969_vm2 = vweird.f32 %v5400_v2  ;;  %v1029_v29 = vmul.f32 %v1028_v19, %v5374_v17  ;;  %v1038_v41 = vmul.f32 %v1037_v23, %v5374_v17  ;;  %vm5434_vm3 = vcmp.eq.f32.partialorder %v933_v16, 8.507059e+37 }
 0x111   : > { %v4507_v27 = vpop.eup %4506  ;;  %v5438_v42 = vadd.f32 1.0, %v1002_v25  ;;  %v1063_v33 = vmul.f32 2.1237322e-06, %v5418_v15  ;;  %v1074_v5 = vmul.f32 3.8918573e-05, %v5418_v15  ;;  %vm5443_vm4 = vcmp.eq.f32.partialorder %v973_v20, 8.507059e+37 }
 0x112   : > { %v4509_v30 = vpop.eup %4508  ;;  %v925_v31 = vmul.f32 %v4507_v27, %v5395_v62  ;;  %v992_v37 = vadd.f32 1.1283791, %v991_v22  ;;  %v1039_v38 = vadd.f32 0.112945676, %v1038_v41  ;;  %v976_v43 = vor.u32 1.1754944e-38, %v975_v24 }
 0x113   : > { %v965_v35 = vmul.f32 %v4509_v30, %v5400_v2  ;;  %4510 = vrcp.f32 %v5438_v42  ;;  %v5449_v44 = vmul.f32 0.70710677, %v5421_v39  ;;  %vm930_vm5 = vweird.f32 %v4507_v27 }
 0x114   : > { %v926_v26 = vsub.f32 1.0, %v925_v31  ;;  %v1040_v48 = vmul.f32 %v1039_v38, %v5374_v17  ;;  %v519_v49 = vperm.slane %v5318_v34, 6  ;;  %v1030_v53 = vadd.f32 0.18741608, %v1029_v29  ;;  %vm931_vm7 = vmor %vm929_vm1, %vm930_vm5  ;;  %v686_v29 = vpop.f32.mrf.mxu2 }
 0x115   : > { %v966_v45 = vsub.f32 1.0, %v965_v35  ;;  %v1064_v54 = vadd.f32 0.00028619796, %v1063_v33  ;;  %v1075_v55 = vadd.f32 0.001143296, %v1074_v5  ;;  %vm970_vm6 = vweird.f32 %v4509_v30 }
 0x116   : > { %v927_v52 = vmul.f32 %v4507_v27, %v926_v26  ;;  %v993_v58 = vmul.f32 %v992_v37, %v5351_v56  ;;  %v1041_v59 = vadd.f32 0.4994258, %v1040_v48  ;;  %v1101_v1 = vmul.f32 %v5449_v44, %v5449_v44  ;;  %vm971_vm9 = vmor %vm969_vm2, %vm970_vm6 }
 0x117   : > { %v967_v57 = vmul.f32 %v4509_v30, %v966_v45  ;;  %v1065_v61 = vmul.f32 %v1064_v54, %v5418_v15  ;;  %v1076_v63 = vmul.f32 %v1075_v55, %v5418_v15  ;;  %vm1009_vm8 = vweird.f32 %v5438_v42 }
 0x118   : > { %v928_v60 = vadd.f32 %v4507_v27, %v927_v52  ;;  %v1013_v46 = vand.u32 2147483647, %v5438_v42  ;;  %v1042_v56 = vmul.f32 %v1041_v59, %v5374_v17  ;;  %v5466_v11 = vmin.f32 %v1101_v1, 16.0 }
 0x119   : > { %v968_v3 = vadd.f32 %v4509_v30, %v967_v57  ;;  %v4511_v4 = vpop.eup %4510  ;;  %v1066_v47 = vadd.f32 0.0036580483, %v1065_v61  ;;  %v1077_v8 = vadd.f32 0.014752088, %v1076_v63  ;;  %v1015_v16 = vand.u32 2147483648, %v5438_v42  ;;  %v706_v63 = vpop.f32.mrf.mxu3 }
 0x11a   : > { %v932_v6 = vsel %vm931_vm7, %v4507_v27, %v928_v60  ;;  %v1005_v14 = vmul.f32 %v4511_v4, %v5438_v42  ;;  %v5474_v20 = vadd.f32 1.0, %v1042_v56  ;;  %v1103_v25 = vmul.f32 2.1237322e-06, %v5466_v11 }
 0x11b   : > { %v937_v62 = vsel %vm5434_vm3, %v936_v28, %v932_v6  ;;  %v972_v12 = vsel %vm971_vm9, %v4509_v30, %v968_v3  ;;  %v1067_v2 = vmul.f32 %v1066_v47, %v5418_v15  ;;  %v1078_v24 = vmul.f32 %v1077_v8, %v5418_v15 }
 0x11c   : > { %v938_v18 = vmul.f32 %v937_v62, %v913_v40  ;;  %v977_v19 = vsel %vm5443_vm4, %v976_v43, %v972_v12  ;;  %v1006_v23 = vsub.f32 1.0, %v1005_v14  ;;  %vm5479_vm10 = vcmp.eq.f32.partialorder %v1013_v46, 8.507059e+37 }
 0x11d   : > { %v978_v22 = vmul.f32 %v977_v19, %v953_v50  ;;  %v1031_v40 = vmul.f32 %v1030_v53, %v5374_v17  ;;  %4512 = vrcp.f32 %v5474_v20  ;;  %vm1010_vm11 = vweird.f32 %v4511_v4 }
 0x11e   : > { %v4387_v27 = vclamps-f32 %v938_v18, 1.0  ;;  %v1007_v30 = vmul.f32 %v4511_v4, %v1006_v23  ;;  %v1068_v31 = vadd.f32 0.05243302, %v1067_v2  ;;  %v1016_v32 = vor.u32 1.1754944e-38, %v1015_v16  ;;  %vm1011_vm12 = vmor %vm1009_vm8, %vm1010_vm11 }
 0x11f   : > { %v4388_v41 = vclamps-f32 %v978_v22, 1.0  ;;  %v1079_v33 = vadd.f32 0.112945676, %v1078_v24  ;;  %v1104_v5 = vadd.f32 0.00028619796, %v1103_v25  ;;  %v5486_v38 = vadd.f32 %v686_v29, %v519_v49 }
 0x120   : > { %v1541_v50 = vadd.f32 1.0, %v4387_v27  ;;  %v1008_v36 = vadd.f32 %v4511_v4, %v1007_v30  ;;  %v1069_v37 = vmul.f32 %v1068_v31, %v5418_v15  ;;  %v1114_v45 = vmul.f32 3.8918573e-05, %v5466_v11 }
 0x121   : > { %v1542_v35 = vadd.f32 1.0, %v4388_v41  ;;  %v1080_v17 = vmul.f32 %v1079_v33, %v5418_v15  ;;  %v1105_v43 = vmul.f32 %v1104_v5, %v5466_v11  ;;  %v1032_v53 = vadd.f32 1.1283791, %v1031_v40 }
 0x122   : > { %v1557_v26 = vmul.f32 %v1541_v50, %v5408_v9  ;;  %v1012_v52 = vsel %vm1011_vm12, %v4511_v4, %v1008_v36  ;;  %v1070_v54 = vadd.f32 0.18741608, %v1069_v37  ;;  %v520_v42 = vperm.slane %v5318_v34, 7 }
 0x123   : > { %v1558_v48 = vmul.f32 %v1542_v35, %v5411_v10  ;;  %v4513_v55 = vpop.eup %4512  ;;  %v1017_v49 = vsel %vm5479_vm10, %v1016_v32, %v1012_v52  ;;  %v1081_v9 = vadd.f32 0.4994258, %v1080_v17  ;;  %v1106_v57 = vadd.f32 0.0036580483, %v1105_v43  ;;  %v726_v17 = vpop.f32.mrf.mxu0 }
 0x124   : > { %1573 = vst [vmem:[#allocation2 + $0x30] sm:$0xff] %v1557_v26  ;;  %v1018_v59 = vmul.f32 %v1017_v49, %v993_v58  ;;  %v1045_v60 = vmul.f32 %v4513_v55, %v5474_v20  ;;  %v1053_v61 = vand.u32 2147483647, %v5474_v20  ;;  %v1071_v10 = vmul.f32 %v1070_v54, %v5418_v15 }
 0x125   : > { %1574 = vst [vmem:[#allocation2] sm:$0xff] %v1558_v48  ;;  %v1055_v1 = vand.u32 2147483648, %v5474_v20  ;;  %v1082_v3 = vmul.f32 %v1081_v9, %v5418_v15  ;;  %v1115_v46 = vadd.f32 0.001143296, %v1114_v45  ;;  %v5504_v56 = vmul.f32 0.70710677, %v5486_v38 }
 0x126   : > { %v4389_v4 = vclamps-f32 %v1018_v59, 1.0  ;;  %v1046_v6 = vsub.f32 1.0, %v1045_v60  ;;  %v1072_v34 = vadd.f32 1.1283791, %v1071_v10  ;;  %v1107_v58 = vmul.f32 %v1106_v57, %v5466_v11 }
 0x127   : > { %v5507_v47 = vadd.f32 1.0, %v1082_v3  ;;  %v1116_v8 = vmul.f32 %v1115_v46, %v5466_v11  ;;  %v1141_v62 = vmul.f32 %v5504_v56, %v5504_v56  ;;  %v5512_v12 = vadd.f32 %v706_v63, %v520_v42 }
 0x128   : > { %v1543_v14 = vadd.f32 1.0, %v4389_v4  ;;  %v872_v15 = vmul.f32 0.5, %v5344_v51  ;;  %v1047_v16 = vmul.f32 %v4513_v55, %v1046_v6  ;;  %vm1050_vm13 = vweird.f32 %v4513_v55 }
 0x129   : > { %v1033_v18 = vmul.f32 %v1032_v53, %v5357_v0  ;;  %vm1049_vm14 = vweird.f32 %v5474_v20  ;;  %vm5517_vm15 = vcmp.eq.f32.partialorder %v1053_v61, 8.507059e+37  ;;  %4514 = vrcp.f32 %v5507_v47  ;;  %v5531_v20 = vld [vmem:[#allocation6 + $0x8] sm:$0xff] }
 0x12a   : > { %v1559_v2 = vmul.f32 %v1543_v14, %v5416_v13  ;;  %v1048_v22 = vadd.f32 %v4513_v55, %v1047_v16  ;;  %v1056_v23 = vor.u32 1.1754944e-38, %v1055_v1  ;;  %v1117_v24 = vadd.f32 0.014752088, %v1116_v8  ;;  %vm1051_vm0 = vmor %vm1049_vm14, %vm1050_vm13 }
 0x12b   : > { %v5524_v51 = vmul.f32 %v1072_v34, %v5378_v21  ;;  %v1108_v25 = vadd.f32 0.05243302, %v1107_v58  ;;  %v5526_v27 = vmin.f32 %v1141_v62, 16.0  ;;  %v5529_v0 = vmul.f32 0.70710677, %v5512_v12 }
 0x12c   : > { %1575 = vst [vmem:[#allocation2 + $0x58] sm:$0xff] %v1559_v2  ;;  %v1052_v28 = vsel %vm1051_vm0, %v4513_v55, %v1048_v22  ;;  %v1093_v40 = vand.u32 2147483647, %v5507_v47  ;;  %v1095_v13 = vand.u32 2147483648, %v5507_v47  ;;  %v1118_v29 = vmul.f32 %v1117_v24, %v5466_v11 }
 0x12d   : > { %v1057_v21 = vsel %vm5517_vm15, %v1056_v23, %v1052_v28  ;;  %v1143_v41 = vmul.f32 2.1237322e-06, %v5526_v27  ;;  %v1154_v30 = vmul.f32 3.8918573e-05, %v5526_v27  ;;  %v1181_v31 = vmul.f32 %v5529_v0, %v5529_v0  ;;  %v746_v28 = vpop.f32.mrf.mxu1 }
 0x12e   : > { %v1058_v50 = vmul.f32 %v1057_v21, %v1033_v18  ;;  %vm1089_vm1 = vweird.f32 %v5507_v47  ;;  %v1119_v32 = vadd.f32 0.112945676, %v1118_v29  ;;  %v521_v33 = vperm.slane %v5531_v20, 0 }
 0x12f   : > { %v4515_v5 = vpop.eup %4514  ;;  %v1109_v35 = vmul.f32 %v1108_v25, %v5466_v11  ;;  %v1144_v36 = vadd.f32 0.00028619796, %v1143_v41  ;;  %v1155_v37 = vadd.f32 0.001143296, %v1154_v30  ;;  %v5545_v26 = vmin.f32 %v1181_v31, 16.0 }
 0x130   : > { %v4390_v43 = vclamps-f32 %v1058_v50, 1.0  ;;  %v1085_v45 = vmul.f32 %v4515_v5, %v5507_v47  ;;  %vm5548_vm2 = vcmp.eq.f32.partialorder %v1093_v40, 8.507059e+37  ;;  %v1096_v52 = vor.u32 1.1754944e-38, %v1095_v13 }
 0x131   : > { %v1120_v53 = vmul.f32 %v1119_v32, %v5466_v11  ;;  %v1145_v54 = vmul.f32 %v1144_v36, %v5526_v27  ;;  %v1156_v55 = vmul.f32 %v1155_v37, %v5526_v27  ;;  %v1183_v49 = vmul.f32 2.1237322e-06, %v5545_v26 }
 0x132   : > { %v1544_v9 = vadd.f32 1.0, %v4390_v43  ;;  %v1086_v57 = vsub.f32 1.0, %v1085_v45  ;;  %v1194_v42 = vmul.f32 3.8918573e-05, %v5545_v26  ;;  %v5557_v59 = vadd.f32 %v726_v17, %v521_v33 }
 0x133   : > { %vm1090_vm3 = vweird.f32 %v4515_v5  ;;  %v1121_v60 = vadd.f32 0.4994258, %v1120_v53  ;;  %v1146_v61 = vadd.f32 0.0036580483, %v1145_v54  ;;  %v1157_v10 = vadd.f32 0.014752088, %v1156_v55 }
 0x134   : > { %v1560_v63 = vmul.f32 %v1544_v9, %v872_v15  ;;  %v1087_v1 = vmul.f32 %v4515_v5, %v1086_v57  ;;  %v1184_v3 = vadd.f32 0.00028619796, %v1183_v49  ;;  %v1195_v46 = vadd.f32 0.001143296, %v1194_v42  ;;  %vm1091_vm4 = vmor %vm1089_vm1, %vm1090_vm3 }
 0x135   : > { %v1110_v4 = vadd.f32 0.18741608, %v1109_v35  ;;  %v1122_v6 = vmul.f32 %v1121_v60, %v5466_v11  ;;  %v1147_v34 = vmul.f32 %v1146_v61, %v5526_v27  ;;  %v1158_v58 = vmul.f32 %v1157_v10, %v5526_v27 }
 0x136   : > { %1576 = vst [vmem:[#allocation2 + $0x18] sm:$0xff] %v1560_v63  ;;  %v1088_v8 = vadd.f32 %v4515_v5, %v1087_v1  ;;  %v1185_v62 = vmul.f32 %v1184_v3, %v5545_v26  ;;  %v1196_v14 = vmul.f32 %v1195_v46, %v5545_v26  ;;  %v5565_v16 = vmul.f32 0.70710677, %v5557_v59 }
 0x137   : > { %v5570_v15 = vadd.f32 1.0, %v1122_v6  ;;  %v1148_v18 = vadd.f32 0.05243302, %v1147_v34  ;;  %v1159_v19 = vadd.f32 0.112945676, %v1158_v58  ;;  %v522_v2 = vperm.slane %v5531_v20, 1 }
 0x138   : > { %v1092_v22 = vsel %vm1091_vm4, %v4515_v5, %v1088_v8  ;;  %v1186_v23 = vadd.f32 0.0036580483, %v1185_v62  ;;  %v1197_v24 = vadd.f32 0.014752088, %v1196_v14  ;;  %v1221_v25 = vmul.f32 %v5565_v16, %v5565_v16 }
 0x139   : > { %v873_v40 = vmul.f32 0.5, %v5367_v7  ;;  %v1097_v13 = vsel %vm5548_vm2, %v1096_v52, %v1092_v22  ;;  %v5579_v47 = vmul.f32 0.5, %v5421_v39  ;;  %4516 = vrcp.f32 %v5570_v15 }
 0x13a   : > { %v1098_v29 = vmul.f32 %v1097_v13, %v5524_v51  ;;  %v1111_v21 = vmul.f32 %v1110_v4, %v5466_v11  ;;  %v1149_v41 = vmul.f32 %v1148_v18, %v5526_v27  ;;  %v1160_v30 = vmul.f32 %v1159_v19, %v5526_v27 }
 0x13b   : > { %v1187_v31 = vmul.f32 %v1186_v23, %v5545_v26  ;;  %v1198_v7 = vmul.f32 %v1197_v24, %v5545_v26  ;;  %v5588_v50 = vmin.f32 %v1221_v25, 16.0  ;;  %v5590_v32 = vadd.f32 %v746_v28, %v522_v2 }
 0x13c   : > { %v4391_v39 = vclamps-f32 %v1098_v29, 1.0  ;;  %v5593_v33 = vmul.f32 0.5, %v5486_v38  ;;  %v1150_v5 = vadd.f32 0.18741608, %v1149_v41  ;;  %v1161_v51 = vadd.f32 0.4994258, %v1160_v30 }
 0x13d   : > { %v1188_v35 = vadd.f32 0.05243302, %v1187_v31  ;;  %v1199_v11 = vadd.f32 0.112945676, %v1198_v7  ;;  %v1223_v36 = vmul.f32 2.1237322e-06, %v5588_v50  ;;  %vm1129_vm5 = vweird.f32 %v5570_v15 }
 0x13e   : > { %v1545_v37 = vadd.f32 1.0, %v4391_v39  ;;  %v1112_v17 = vadd.f32 1.1283791, %v1111_v21  ;;  %v1162_v43 = vmul.f32 %v1161_v51, %v5526_v27  ;;  %v1234_v45 = vmul.f32 3.8918573e-05, %v5588_v50 }
 0x13f   : > { %v4517_v48 = vpop.eup %4516  ;;  %v1189_v52 = vmul.f32 %v1188_v35, %v5545_v26  ;;  %v1200_v53 = vmul.f32 %v1199_v11, %v5545_v26  ;;  %v1224_v54 = vadd.f32 0.00028619796, %v1223_v36  ;;  %v5601_v38 = vmul.f32 0.70710677, %v5590_v32 }
 0x140   : > { %v1561_v55 = vmul.f32 %v1545_v37, %v873_v40  ;;  %v1125_v49 = vmul.f32 %v4517_v48, %v5570_v15  ;;  %v1135_v9 = vand.u32 2147483648, %v5570_v15  ;;  %v5606_v57 = vmul.f32 0.5, %v5512_v12 }
 0x141   : > { %v1151_v42 = vmul.f32 %v1150_v5, %v5526_v27  ;;  %v5609_v60 = vadd.f32 1.0, %v1162_v43  ;;  %v1201_v61 = vadd.f32 0.4994258, %v1200_v53  ;;  %v1225_v10 = vmul.f32 %v1224_v54, %v5588_v50 }
 0x142   : > { %1577 = vst [vmem:[#allocation2 + $0x50] sm:$0xff] %v1561_v55  ;;  %v1113_v63 = vmul.f32 %v1112_v17, %v5449_v44  ;;  %v1126_v1 = vsub.f32 1.0, %v1125_v49  ;;  %v1235_v3 = vadd.f32 0.001143296, %v1234_v45  ;;  %v1261_v46 = vmul.f32 %v5601_v38, %v5601_v38  ;;  %v766_v55 = vpop.f32.mrf.mxu2 }
 0x143   : > { %v1133_v12 = vand.u32 2147483647, %v5570_v15  ;;  %4518 = vrcp.f32 %v5609_v60  ;;  %v1190_v27 = vadd.f32 0.18741608, %v1189_v52  ;;  %vm1130_vm6 = vweird.f32 %v4517_v48 }
 0x144   : > { %v1127_v4 = vmul.f32 %v4517_v48, %v1126_v1  ;;  %v1202_v6 = vmul.f32 %v1201_v61, %v5545_v26  ;;  %v1226_v34 = vadd.f32 0.0036580483, %v1225_v10  ;;  %v1136_v58 = vor.u32 1.1754944e-38, %v1135_v9  ;;  %vm1131_vm7 = vmor %vm1129_vm5, %vm1130_vm6 }
 0x145   : > { %v1152_v8 = vadd.f32 1.1283791, %v1151_v42  ;;  %v1236_v44 = vmul.f32 %v1235_v3, %v5588_v50  ;;  %v5620_v62 = vmin.f32 %v1261_v46, 16.0  ;;  %v1173_v18 = vand.u32 2147483647, %v5609_v60 }
 0x146   : > { %v1128_v14 = vadd.f32 %v4517_v48, %v1127_v4  ;;  %v5623_v19 = vadd.f32 1.0, %v1202_v6  ;;  %v1227_v2 = vmul.f32 %v1226_v34, %v5588_v50  ;;  %v1175_v22 = vand.u32 2147483648, %v5609_v60 }
 0x147   : > { %v1191_v23 = vmul.f32 %v1190_v27, %v5545_v26  ;;  %v1237_v24 = vadd.f32 0.014752088, %v1236_v44  ;;  %v1263_v25 = vmul.f32 2.1237322e-06, %v5620_v62  ;;  %vm1134_vm8 = vcmp.eq.f32.partialorder %v1133_v12, 8.507059e+37 }
 0x148   : > { %v1132_v28 = vsel %vm1131_vm7, %v4517_v48, %v1128_v14  ;;  %4520 = vrcp.f32 %v5623_v19  ;;  %v1274_v40 = vmul.f32 3.8918573e-05, %v5620_v62  ;;  %v1153_v21 = vmul.f32 %v1152_v8, %v5504_v56  ;;  %v786_v14 = vpop.f32.mrf.mxu3 }
 0x149   : > { %v4519_v13 = vpop.eup %4518  ;;  %v1137_v29 = vsel %vm1134_vm8, %v1136_v58, %v1132_v28  ;;  %vm1169_vm9 = vweird.f32 %v5609_v60  ;;  %v1228_v15 = vadd.f32 0.05243302, %v1227_v2  ;;  %vm5636_vm10 = vcmp.eq.f32.partialorder %v1173_v18, 8.507059e+37 }
 0x14a   : > { %v1138_v41 = vmul.f32 %v1137_v29, %v1113_v63  ;;  %v1165_v30 = vmul.f32 %v4519_v13, %v5609_v60  ;;  %v1238_v31 = vmul.f32 %v1237_v24, %v5588_v50  ;;  %v1176_v7 = vor.u32 1.1754944e-38, %v1175_v22 }
 0x14b   : > { %v1192_v39 = vadd.f32 1.1283791, %v1191_v23  ;;  %v1229_v5 = vmul.f32 %v1228_v15, %v5588_v50  ;;  %v1264_v51 = vadd.f32 0.00028619796, %v1263_v25  ;;  %v1275_v36 = vadd.f32 0.001143296, %v1274_v40 }
 0x14c   : > { %v4392_v35 = vclamps-f32 %v1138_v41, 1.0  ;;  %v1166_v11 = vsub.f32 1.0, %v1165_v30  ;;  %v1239_v56 = vadd.f32 0.112945676, %v1238_v31  ;;  %vm1170_vm11 = vweird.f32 %v4519_v13 }
 0x14d   : > { %v1230_v37 = vadd.f32 0.18741608, %v1229_v5  ;;  %v1265_v17 = vmul.f32 %v1264_v51, %v5620_v62  ;;  %v523_v43 = vperm.slane %v5531_v20, 2  ;;  %v1276_v54 = vmul.f32 %v1275_v36, %v5620_v62  ;;  %vm1171_vm12 = vmor %vm1169_vm9, %vm1170_vm11 }
 0x14e   : > { %v4521_v45 = vpop.eup %4520  ;;  %v1546_v48 = vadd.f32 1.0, %v4392_v35  ;;  %v1167_v52 = vmul.f32 %v4519_v13, %v1166_v11  ;;  %v1240_v53 = vmul.f32 %v1239_v56, %v5588_v50  ;;  %v1213_v9 = vand.u32 2147483647, %v5623_v19  ;;  %v806_v35 = vpop.f32.mrf.mxu0 }
 0x14f   : > { %v1205_v49 = vmul.f32 %v4521_v45, %v5623_v19  ;;  %v1215_v42 = vand.u32 2147483648, %v5623_v19  ;;  %v1266_v61 = vadd.f32 0.0036580483, %v1265_v17  ;;  %v1277_v3 = vadd.f32 0.014752088, %v1276_v54 }
 0x150   : > { %v1562_v10 = vmul.f32 %v1546_v48, %v5579_v47  ;;  %v1168_v63 = vadd.f32 %v4519_v13, %v1167_v52  ;;  %v1241_v1 = vadd.f32 0.4994258, %v1240_v53  ;;  %v1231_v12 = vmul.f32 %v1230_v37, %v5588_v50 }
 0x151   : > { %v1206_v46 = vsub.f32 1.0, %v1205_v49  ;;  %v1267_v27 = vmul.f32 %v1266_v61, %v5620_v62  ;;  %v5655_v4 = vadd.f32 %v766_v55, %v523_v43  ;;  %v1278_v47 = vmul.f32 %v1277_v3, %v5620_v62 }
 0x152   : > { %1578 = vst [vmem:[#allocation2 + $0x68] sm:$0xff] %v1562_v10  ;;  %v1172_v6 = vsel %vm1171_vm12, %v4519_v13, %v1168_v63  ;;  %v1242_v34 = vmul.f32 %v1241_v1, %v5588_v50  ;;  %v524_v58 = vperm.slane %v5531_v20, 3  ;;  %vm1210_vm13 = vweird.f32 %v4521_v45 }
 0x153   : > { %v1177_v8 = vsel %vm5636_vm10, %v1176_v7, %v1172_v6  ;;  %v1207_v60 = vmul.f32 %v4521_v45, %v1206_v46  ;;  %v1268_v44 = vadd.f32 0.05243302, %v1267_v27  ;;  %vm1209_vm14 = vweird.f32 %v5623_v19 }
 0x154   : > { %v1178_v18 = vmul.f32 %v1177_v8, %v1153_v21  ;;  %v5663_v2 = vadd.f32 1.0, %v1242_v34  ;;  %v1279_v22 = vadd.f32 0.112945676, %v1278_v47  ;;  %v1232_v24 = vadd.f32 1.1283791, %v1231_v12  ;;  %vm1211_vm15 = vmor %vm1209_vm14, %vm1210_vm13 }
 0x155   : > { %v1208_v23 = vadd.f32 %v4521_v45, %v1207_v60  ;;  %v1269_v50 = vmul.f32 %v1268_v44, %v5620_v62  ;;  %v5667_v25 = vmul.f32 0.70710677, %v5655_v4  ;;  %v1216_v40 = vor.u32 1.1754944e-38, %v1215_v42 }
 0x156   : > { %v4393_v28 = vclamps-f32 %v1178_v18, 1.0  ;;  %4522 = vrcp.f32 %v5663_v2  ;;  %v5670_v13 = vadd.f32 %v786_v14, %v524_v58  ;;  %v1193_v29 = vmul.f32 %v1192_v39, %v5529_v0 }
 0x157   : > { %v1212_v19 = vsel %vm1211_vm15, %v4521_v45, %v1208_v23  ;;  %vm1214_vm0 = vcmp.eq.f32.partialorder %v1213_v9, 8.507059e+37  ;;  %v1280_v21 = vmul.f32 %v1279_v22, %v5620_v62  ;;  %v5675_v30 = vmul.f32 0.5, %v5557_v59 }
 0x158   : > { %v1547_v15 = vadd.f32 1.0, %v4393_v28  ;;  %v1217_v41 = vsel %vm1214_vm0, %v1216_v40, %v1212_v19  ;;  %v1301_v26 = vmul.f32 %v5667_v25, %v5667_v25  ;;  %v1233_v7 = vmul.f32 %v1232_v24, %v5565_v16 }
 0x159   : > { %v1218_v31 = vmul.f32 %v1217_v41, %v1193_v29  ;;  %v1270_v5 = vadd.f32 0.18741608, %v1269_v50  ;;  %v1281_v51 = vadd.f32 0.4994258, %v1280_v21  ;;  %v5684_v11 = vmul.f32 0.70710677, %v5670_v13 }
 0x15a   : > { %v1563_v0 = vmul.f32 %v1547_v15, %v5593_v33  ;;  %v5681_v39 = vmin.f32 %v1301_v26, 16.0  ;;  %v525_v56 = vperm.slane %v5531_v20, 4  ;;  %v1253_v36 = vand.u32 2147483647, %v5663_v2 }
 0x15b   : > { %v4394_v59 = vclamps-f32 %v1218_v31, 1.0  ;;  %v1255_v37 = vand.u32 2147483648, %v5663_v2  ;;  %v1282_v17 = vmul.f32 %v1281_v51, %v5620_v62  ;;  %v1341_v45 = vmul.f32 %v5684_v11, %v5684_v11 }
 0x15c   : > { %v4523_v16 = vpop.eup %4522  ;;  %1579 = vst [vmem:[#allocation2 + $0x8] sm:$0xff] %v1563_v0  ;;  %v1303_v43 = vmul.f32 2.1237322e-06, %v5681_v39  ;;  %v1314_v33 = vmul.f32 3.8918573e-05, %v5681_v39  ;;  %v5694_v48 = vadd.f32 %v806_v35, %v525_v56  ;;  %vm1249_vm1 = vweird.f32 %v5663_v2 }
 0x15d   : > { %v1548_v52 = vadd.f32 1.0, %v4394_v59  ;;  %v1245_v53 = vmul.f32 %v4523_v16, %v5663_v2  ;;  %v1271_v54 = vmul.f32 %v1270_v5, %v5620_v62  ;;  %v5699_v55 = vadd.f32 1.0, %v1282_v17 }
 0x15e   : > { %v1304_v49 = vadd.f32 0.00028619796, %v1303_v43  ;;  %v1315_v9 = vadd.f32 0.001143296, %v1314_v33  ;;  %v5701_v42 = vmin.f32 %v1341_v45, 16.0  ;;  %vm5704_vm2 = vcmp.eq.f32.partialorder %v1253_v36, 8.507059e+37 }
 0x15f   : > { %v1564_v61 = vmul.f32 %v1548_v52, %v5606_v57  ;;  %v1246_v10 = vsub.f32 1.0, %v1245_v53  ;;  %v5709_v1 = vmul.f32 0.70710677, %v5694_v48  ;;  %vm1250_vm3 = vweird.f32 %v4523_v16 }
 0x160   : > { %v1256_v3 = vor.u32 1.1754944e-38, %v1255_v37  ;;  %4524 = vrcp.f32 %v5699_v55  ;;  %v1295_v62 = vand.u32 2147483648, %v5699_v55  ;;  %v1305_v12 = vmul.f32 %v1304_v49, %v5681_v39  ;;  %vm1251_vm4 = vmor %vm1249_vm1, %vm1250_vm3 }
 0x161   : > { %1580 = vst [vmem:[#allocation2 + $0x48] sm:$0xff] %v1564_v61  ;;  %v1247_v46 = vmul.f32 %v4523_v16, %v1246_v10  ;;  %v1316_v57 = vmul.f32 %v1315_v9, %v5681_v39  ;;  %v1343_v27 = vmul.f32 2.1237322e-06, %v5701_v42  ;;  %v1272_v6 = vadd.f32 1.1283791, %v1271_v54  ;;  %v826_v10 = vpop.f32.mrf.mxu1 }
 0x162   : > { %v1354_v34 = vmul.f32 3.8918573e-05, %v5701_v42  ;;  %v1381_v47 = vmul.f32 %v5709_v1, %v5709_v1  ;;  %v526_v58 = vperm.slane %v5531_v20, 5  ;;  %v1306_v60 = vadd.f32 0.0036580483, %v1305_v12 }
 0x163   : > { %v1248_v8 = vadd.f32 %v4523_v16, %v1247_v46  ;;  %v1317_v44 = vadd.f32 0.014752088, %v1316_v57  ;;  %v1344_v14 = vadd.f32 0.00028619796, %v1343_v27  ;;  %v1293_v18 = vand.u32 2147483647, %v5699_v55 }
 0x164   : > { %v1296_v22 = vor.u32 1.1754944e-38, %v1295_v62  ;;  %v1355_v23 = vadd.f32 0.001143296, %v1354_v34  ;;  %v5724_v24 = vmin.f32 %v1381_v47, 16.0  ;;  %v1307_v28 = vmul.f32 %v1306_v60, %v5681_v39 }
 0x165   : > { %v1252_v50 = vsel %vm1251_vm4, %v4523_v16, %v1248_v8  ;;  %v1318_v40 = vmul.f32 %v1317_v44, %v5681_v39  ;;  %v1345_v29 = vmul.f32 %v1344_v14, %v5701_v42  ;;  %v527_v51 = vperm.slane %v5531_v20, 6 }
 0x166   : > { %v4525_v19 = vpop.eup %4524  ;;  %v1257_v21 = vsel %vm5704_vm2, %v1256_v3, %v1252_v50  ;;  %v1356_v2 = vmul.f32 %v1355_v23, %v5701_v42  ;;  %v1383_v15 = vmul.f32 2.1237322e-06, %v5724_v24  ;;  %v1394_v41 = vmul.f32 3.8918573e-05, %v5724_v24 }
 0x167   : > { %v1258_v26 = vmul.f32 %v1257_v21, %v1233_v7  ;;  %v1285_v31 = vmul.f32 %v4525_v19, %v5699_v55  ;;  %v1308_v5 = vadd.f32 0.05243302, %v1307_v28  ;;  %vm1289_vm5 = vweird.f32 %v5699_v55 }
 0x168   : > { %v1319_v35 = vadd.f32 0.112945676, %v1318_v40  ;;  %v1346_v0 = vadd.f32 0.0036580483, %v1345_v29  ;;  %v1357_v56 = vadd.f32 0.014752088, %v1356_v2  ;;  %vm1290_vm6 = vweird.f32 %v4525_v19 }
 0x169   : > { %v4395_v59 = vclamps-f32 %v1258_v26, 1.0  ;;  %v1286_v36 = vsub.f32 1.0, %v1285_v31  ;;  %v1309_v37 = vmul.f32 %v1308_v5, %v5681_v39  ;;  %v1384_v17 = vadd.f32 0.00028619796, %v1383_v15  ;;  %vm1291_vm7 = vmor %vm1289_vm5, %vm1290_vm6 }
 0x16a   : > { %v1320_v16 = vmul.f32 %v1319_v35, %v5681_v39  ;;  %v1347_v43 = vmul.f32 %v1346_v0, %v5701_v42  ;;  %v1358_v7 = vmul.f32 %v1357_v56, %v5701_v42  ;;  %v1395_v33 = vadd.f32 0.001143296, %v1394_v41 }
 0x16b   : > { %v1549_v45 = vadd.f32 1.0, %v4395_v59  ;;  %v1287_v52 = vmul.f32 %v4525_v19, %v1286_v36  ;;  %v1385_v53 = vmul.f32 %v1384_v17, %v5724_v24  ;;  %v1310_v62 = vadd.f32 0.18741608, %v1309_v37 }
 0x16c   : > { %v1321_v54 = vadd.f32 0.4994258, %v1320_v16  ;;  %v1348_v49 = vadd.f32 0.05243302, %v1347_v43  ;;  %v1359_v9 = vadd.f32 0.112945676, %v1358_v7  ;;  %v1396_v61 = vmul.f32 %v1395_v33, %v5724_v24 }
 0x16d   : > { %v1565_v63 = vmul.f32 %v1549_v45, %v5675_v30  ;;  %v1288_v3 = vadd.f32 %v4525_v19, %v1287_v52  ;;  %v1386_v46 = vadd.f32 0.0036580483, %v1385_v53  ;;  %v1273_v47 = vmul.f32 %v1272_v6, %v5601_v38  ;;  %v846_v30 = vpop.f32.mrf.mxu2 }
 0x16e   : > { %v1322_v12 = vmul.f32 %v1321_v54, %v5681_v39  ;;  %v1349_v57 = vmul.f32 %v1348_v49, %v5701_v42  ;;  %v1360_v27 = vmul.f32 %v1359_v9, %v5701_v42  ;;  %v1397_v34 = vadd.f32 0.014752088, %v1396_v61 }
 0x16f   : > { %1581 = vst [vmem:[#allocation2 + $0x40] sm:$0xff] %v1565_v63  ;;  %v1292_v8 = vsel %vm1291_vm7, %v4525_v19, %v1288_v3  ;;  %vm1294_vm8 = vcmp.eq.f32.partialorder %v1293_v18, 8.507059e+37  ;;  %v5750_v60 = vadd.f32 %v826_v10, %v526_v58  ;;  %v1387_v55 = vmul.f32 %v1386_v46, %v5724_v24 }
 0x170   : > { %v1297_v44 = vsel %vm1294_vm8, %v1296_v22, %v1292_v8  ;;  %v1323_v14 = vadd.f32 1.0, %v1322_v12  ;;  %v1361_v23 = vadd.f32 0.4994258, %v1360_v27  ;;  %v1311_v28 = vmul.f32 %v1310_v62, %v5681_v39 }
 0x171   : > { %v1298_v50 = vmul.f32 %v1297_v44, %v1273_v47  ;;  %v1398_v40 = vmul.f32 %v1397_v34, %v5724_v24  ;;  %v1350_v29 = vadd.f32 0.18741608, %v1349_v57  ;;  %v5755_v21 = vadd.f32 %v846_v30, %v527_v51 }
 0x172   : > { %4526 = vrcp.f32 %v1323_v14  ;;  %v1362_v6 = vmul.f32 %v1361_v23, %v5701_v42  ;;  %v1388_v58 = vadd.f32 0.05243302, %v1387_v55  ;;  %v5759_v22 = vmul.f32 0.70710677, %v5750_v60 }
 0x173   : > { %v4396_v38 = vclamps-f32 %v1298_v50, 1.0  ;;  %v1399_v18 = vadd.f32 0.112945676, %v1398_v40  ;;  %v878_v19 = vmul.f32 0.5, %v5590_v32  ;;  %v1312_v15 = vadd.f32 1.1283791, %v1311_v28 }
 0x174   : > { %v5762_v41 = vadd.f32 1.0, %v1362_v6  ;;  %v1351_v39 = vmul.f32 %v1350_v29, %v5701_v42  ;;  %v1421_v31 = vmul.f32 %v5759_v22, %v5759_v22  ;;  %v5769_v5 = vmul.f32 0.70710677, %v5755_v21 }
 0x175   : > { %v1550_v2 = vadd.f32 1.0, %v4396_v38  ;;  %v1400_v26 = vmul.f32 %v1399_v18, %v5724_v24  ;;  %v5772_v35 = vmul.f32 0.5, %v5655_v4  ;;  %v1333_v0 = vand.u32 2147483647, %v1323_v14 }
 0x176   : > { %4528 = vrcp.f32 %v5762_v41  ;;  %v5776_v56 = vmul.f32 0.5, %v5670_v13  ;;  %v1389_v42 = vmul.f32 %v1388_v58, %v5724_v24  ;;  %v1313_v36 = vmul.f32 %v1312_v15, %v5667_v25  ;;  %v866_v15 = vpop.f32.mrf.mxu3 }
 0x177   : > { %v1566_v51 = vmul.f32 %v1550_v2, %v878_v19  ;;  %v1401_v59 = vadd.f32 0.4994258, %v1400_v26  ;;  %v5780_v17 = vmin.f32 %v1421_v31, 16.0  ;;  %v1461_v4 = vmul.f32 %v5769_v5, %v5769_v5 }
 0x178   : > { %v4527_v32 = vpop.eup %4526  ;;  %vm1329_vm9 = vweird.f32 %v1323_v14  ;;  %v1335_v16 = vand.u32 2147483648, %v1323_v14  ;;  %v1352_v43 = vadd.f32 1.1283791, %v1351_v39  ;;  %vm5789_vm11 = vcmp.eq.f32.partialorder %v1333_v0, 8.507059e+37 }
 0x179   : > { %1582 = vst [vmem:[#allocation2 + $0x20] sm:$0xff] %v1566_v51  ;;  %v1325_v37 = vmul.f32 %v4527_v32, %v1323_v14  ;;  %v1402_v7 = vmul.f32 %v1401_v59, %v5724_v24  ;;  %v1423_v13 = vmul.f32 2.1237322e-06, %v5780_v17  ;;  %v1434_v45 = vmul.f32 3.8918573e-05, %v5780_v17 }
 0x17a   : > { %v5787_v52 = vmin.f32 %v1461_v4, 16.0  ;;  %vm1330_vm10 = vweird.f32 %v4527_v32  ;;  %v1390_v53 = vadd.f32 0.18741608, %v1389_v42  ;;  %v1336_v3 = vor.u32 1.1754944e-38, %v1335_v16 }
 0x17b   : > { %v1326_v33 = vsub.f32 1.0, %v1325_v37  ;;  %v5793_v54 = vadd.f32 1.0, %v1402_v7  ;;  %v1424_v61 = vadd.f32 0.00028619796, %v1423_v13  ;;  %v1435_v10 = vadd.f32 0.001143296, %v1434_v45  ;;  %vm1331_vm12 = vmor %vm1329_vm9, %vm1330_vm10 }
 0x17c   : > { %v4529_v49 = vpop.eup %4528  ;;  %v1463_v63 = vmul.f32 2.1237322e-06, %v5787_v52  ;;  %v1353_v62 = vmul.f32 %v1352_v43, %v5684_v11  ;;  %v1373_v57 = vand.u32 2147483647, %v5762_v41  ;;  %v1375_v27 = vand.u32 2147483648, %v5762_v41 }
 0x17d   : > { %v1327_v9 = vmul.f32 %v4527_v32, %v1326_v33  ;;  %v1365_v46 = vmul.f32 %v4529_v49, %v5762_v41  ;;  %4530 = vrcp.f32 %v5793_v54  ;;  %v1425_v34 = vmul.f32 %v1424_v61, %v5780_v17 }
 0x17e   : > { %v1391_v8 = vmul.f32 %v1390_v53, %v5724_v24  ;;  %v1436_v30 = vmul.f32 %v1435_v10, %v5780_v17  ;;  %v1474_v11 = vmul.f32 3.8918573e-05, %v5787_v52  ;;  %vm1369_vm13 = vweird.f32 %v5762_v41 }
 0x17f   : > { %v1328_v12 = vadd.f32 %v4527_v32, %v1327_v9  ;;  %v1366_v47 = vsub.f32 1.0, %v1365_v46  ;;  %vm1370_vm14 = vweird.f32 %v4529_v49  ;;  %v1464_v23 = vadd.f32 0.00028619796, %v1463_v63 }
 0x180   : > { %v1426_v28 = vadd.f32 0.0036580483, %v1425_v34  ;;  %v1437_v40 = vadd.f32 0.014752088, %v1436_v30  ;;  %vm5810_vm15 = vcmp.eq.f32.partialorder %v1373_v57, 8.507059e+37  ;;  %v528_v38 = vperm.slane %v5531_v20, 7  ;;  %vm1371_vm0 = vmor %vm1369_vm13, %vm1370_vm14 }
 0x181   : > { %v1332_v44 = vsel %vm1331_vm12, %v4527_v32, %v1328_v12  ;;  %v1367_v50 = vmul.f32 %v4529_v49, %v1366_v47  ;;  %v1475_v24 = vadd.f32 0.001143296, %v1474_v11  ;;  %v1376_v18 = vor.u32 1.1754944e-38, %v1375_v27 }
 0x182   : > { %v1337_v55 = vsel %vm5789_vm11, %v1336_v3, %v1332_v44  ;;  %v1392_v19 = vadd.f32 1.1283791, %v1391_v8  ;;  %v1438_v2 = vmul.f32 %v1437_v40, %v5780_v17  ;;  %v1413_v31 = vand.u32 2147483647, %v5793_v54 }
 0x183   : > { %v1338_v14 = vmul.f32 %v1337_v55, %v1313_v36  ;;  %v4531_v6 = vpop.eup %4530  ;;  %v1368_v58 = vadd.f32 %v4529_v49, %v1367_v50  ;;  %v1465_v51 = vmul.f32 %v1464_v23, %v5787_v52  ;;  %v1427_v20 = vmul.f32 %v1426_v28, %v5780_v17 }
 0x184   : > { %v1405_v26 = vmul.f32 %v4531_v6, %v5793_v54  ;;  %v1439_v0 = vadd.f32 0.112945676, %v1438_v2  ;;  %v1476_v42 = vmul.f32 %v1475_v24, %v5787_v52  ;;  %v5826_v4 = vadd.f32 %v866_v15, %v528_v38 }
 0x185   : > { %v4397_v39 = vclamps-f32 %v1338_v14, 1.0  ;;  %v1372_v32 = vsel %vm1371_vm0, %v4529_v49, %v1368_v58  ;;  %v1415_v16 = vand.u32 2147483648, %v5793_v54  ;;  %vm1410_vm1 = vweird.f32 %v4531_v6 }
 0x186   : > { %v1377_v36 = vsel %vm5810_vm15, %v1376_v18, %v1372_v32  ;;  %v1406_v37 = vsub.f32 1.0, %v1405_v26  ;;  %v1440_v43 = vmul.f32 %v1439_v0, %v5780_v17  ;;  %v1477_v7 = vadd.f32 0.014752088, %v1476_v42 }
 0x187   : > { %v1551_v59 = vadd.f32 1.0, %v4397_v39  ;;  %v1378_v41 = vmul.f32 %v1377_v36, %v1353_v62  ;;  %v1466_v45 = vadd.f32 0.0036580483, %v1465_v51  ;;  %v1428_v53 = vadd.f32 0.05243302, %v1427_v20 }
 0x188   : > { %v1407_v13 = vmul.f32 %v4531_v6, %v1406_v37  ;;  %v1441_v49 = vadd.f32 0.4994258, %v1440_v43  ;;  %v1478_v9 = vmul.f32 %v1477_v7, %v5787_v52  ;;  %v1393_v61 = vmul.f32 %v1392_v19, %v5709_v1 }
 0x189   : > { %v1567_v33 = vmul.f32 %v1551_v59, %v5772_v35  ;;  %v4398_v25 = vclamps-f32 %v1378_v41, 1.0  ;;  %vm1409_vm2 = vweird.f32 %v5793_v54  ;;  %v5835_v63 = vmul.f32 0.70710677, %v5826_v4 }
 0x18a   : > { %v1408_v10 = vadd.f32 %v4531_v6, %v1407_v13  ;;  %vm1411_vm3 = vmor %vm1409_vm2, %vm1410_vm1  ;;  %v1416_v35 = vor.u32 1.1754944e-38, %v1415_v16  ;;  %v1442_v62 = vmul.f32 %v1441_v49, %v5780_v17  ;;  %v1479_v46 = vadd.f32 0.112945676, %v1478_v9 }
 0x18b   : > { %1583 = vst [vmem:[#allocation2 + $0x10] sm:$0xff] %v1567_v33  ;;  %v1552_v3 = vadd.f32 1.0, %v4398_v25  ;;  %vm1414_vm4 = vcmp.eq.f32.partialorder %v1413_v31, 8.507059e+37  ;;  %v1467_v57 = vmul.f32 %v1466_v45, %v5787_v52  ;;  %v1501_v27 = vmul.f32 %v5835_v63, %v5835_v63 }
 0x18c   : > { %v1412_v12 = vsel %vm1411_vm3, %v4531_v6, %v1408_v10  ;;  %v1429_v54 = vmul.f32 %v1428_v53, %v5780_v17  ;;  %v1443_v47 = vadd.f32 1.0, %v1442_v62  ;;  %v1480_v30 = vmul.f32 %v1479_v46, %v5787_v52 }
 0x18d   : > { %v1568_v1 = vmul.f32 %v1552_v3, %v5776_v56  ;;  %v1417_v34 = vsel %vm1414_vm4, %v1416_v35, %v1412_v12  ;;  %v5844_v11 = vmin.f32 %v1501_v27, 16.0  ;;  %v1468_v23 = vadd.f32 0.05243302, %v1467_v57 }
 0x18e   : > { %v1418_v8 = vmul.f32 %v1417_v34, %v1393_v61  ;;  %4532 = vrcp.f32 %v1443_v47  ;;  %v1481_v55 = vadd.f32 0.4994258, %v1480_v30  ;;  %v1430_v50 = vadd.f32 0.18741608, %v1429_v54 }
 0x18f   : > { %1584 = vst [vmem:[#allocation2 + $0x38] sm:$0xff] %v1568_v1  ;;  %v1503_v28 = vmul.f32 2.1237322e-06, %v5844_v11  ;;  %v1514_v40 = vmul.f32 3.8918573e-05, %v5844_v11  ;;  %v881_v56 = vmul.f32 0.5, %v5694_v48  ;;  %v1469_v58 = vmul.f32 %v1468_v23, %v5787_v52 }
 0x190   : > { %v4399_v44 = vclamps-f32 %v1418_v8, 1.0  ;;  %v1482_v29 = vmul.f32 %v1481_v55, %v5787_v52  ;;  %v1431_v2 = vmul.f32 %v1430_v50, %v5780_v17  ;;  %v1455_v20 = vand.u32 2147483648, %v1443_v47 }
 0x191   : > { %v1504_v24 = vadd.f32 0.00028619796, %v1503_v28  ;;  %v1515_v38 = vadd.f32 0.001143296, %v1514_v40  ;;  %v1470_v31 = vadd.f32 0.18741608, %v1469_v58  ;;  %vm1449_vm6 = vweird.f32 %v1443_v47 }
 0x192   : > { %v1553_v14 = vadd.f32 1.0, %v4399_v44  ;;  %v1483_v18 = vadd.f32 1.0, %v1482_v29  ;;  %v1432_v32 = vadd.f32 1.1283791, %v1431_v2  ;;  %v1453_v59 = vand.u32 2147483647, %v1443_v47 }
 0x193   : > { %v1505_v15 = vmul.f32 %v1504_v24, %v5844_v11  ;;  %v1516_v39 = vmul.f32 %v1515_v38, %v5844_v11  ;;  %v1471_v41 = vmul.f32 %v1470_v31, %v5787_v52  ;;  %v1456_v43 = vor.u32 1.1754944e-38, %v1455_v20 }
 0x194   : > { %v1569_v6 = vmul.f32 %v1553_v14, %v881_v56  ;;  %v4533_v19 = vpop.eup %4532  ;;  %4534 = vrcp.f32 %v1483_v18  ;;  %v1433_v13 = vmul.f32 %v1432_v32, %v5759_v22  ;;  %vm1454_vm8 = vcmp.eq.f32.partialorder %v1453_v59, 8.507059e+37 }
 0x195   : > { %v1445_v26 = vmul.f32 %v4533_v19, %v1443_v47  ;;  %v1517_v51 = vadd.f32 0.014752088, %v1516_v39  ;;  %v1506_v0 = vadd.f32 0.0036580483, %v1505_v15  ;;  %vm1450_vm5 = vweird.f32 %v4533_v19 }
 0x196   : > { %1585 = vst [vmem:[#allocation2 + $0x60] sm:$0xff] %v1569_v6  ;;  %vm1451_vm7 = vmor %vm1449_vm6, %vm1450_vm5  ;;  %v1472_v61 = vadd.f32 1.1283791, %v1471_v41  ;;  %v1495_v10 = vand.u32 2147483648, %v1483_v18  ;;  %v5068_v35 = vmov 0.0   ;;  %vm1489_vm10 = vweird.f32 %v1483_v18 }
 0x197   : > { %v1446_v48 = vsub.f32 1.0, %v1445_v26  ;;  %v1518_v36 = vmul.f32 %v1517_v51, %v5844_v11  ;;  %v1507_v33 = vmul.f32 %v1506_v0, %v5844_v11  ;;  %1589 = vst [vmem:[#allocation3 + $0x28] sm:$0xff] %v5068_v35  ;;  %v1493_v62 = vand.u32 2147483647, %v1483_v18 }
 0x198   : > { %1590 = vst [vmem:[#allocation3] sm:$0xff] %v5068_v35  ;;  %v882_v27 = vmul.f32 0.5, %v5750_v60  ;;  %v1496_v34 = vor.u32 1.1754944e-38, %v1495_v10  ;;  %v1473_v47 = vmul.f32 %v1472_v61, %v5769_v5  ;;  %v883_v28 = vmul.f32 0.5, %v5755_v21 }
 0x199   : > { %v1447_v42 = vmul.f32 %v4533_v19, %v1446_v48  ;;  %v1519_v16 = vadd.f32 0.112945676, %v1518_v36  ;;  %v1508_v46 = vadd.f32 0.05243302, %v1507_v33  ;;  %1591 = vst [vmem:[#allocation3 + $0x10] sm:$0xff] %v5068_v35  ;;  %vm1494_vm12 = vcmp.eq.f32.partialorder %v1493_v62, 8.507059e+37 }
 0x19a   : > { %v4535_v37 = vpop.eup %4534  ;;  %1592 = vst [vmem:[#allocation3 + $0x20] sm:$0xff] %v5068_v35 }
 0x19b   : > { %v1448_v17 = vadd.f32 %v4533_v19, %v1447_v42  ;;  %v1485_v7 = vmul.f32 %v4535_v37, %v1483_v18  ;;  %v1520_v25 = vmul.f32 %v1519_v16, %v5844_v11  ;;  %vm1490_vm9 = vweird.f32 %v4535_v37  ;;  %1593 = vst [vmem:[#allocation3 + $0x18] sm:$0xff] %v5068_v35 }
 0x19c   : > { %vm1491_vm11 = vmor %vm1489_vm10, %vm1490_vm9  ;;  %v1509_v30 = vmul.f32 %v1508_v46, %v5844_v11  ;;  %1594 = vst [vmem:[#allocation3 + $0x8] sm:$0xff] %v5068_v35 }
 0x19d   : > { %v1452_v45 = vsel %vm1451_vm7, %v4533_v19, %v1448_v17  ;;  %v1486_v49 = vsub.f32 1.0, %v1485_v7  ;;  %v1521_v3 = vadd.f32 0.4994258, %v1520_v25  ;;  %1595 = vst [vmem:[#allocation3 + $0x38] sm:$0xff] %v5068_v35 }
 0x19e   : > { %v1457_v53 = vsel %vm1454_vm8, %v1456_v43, %v1452_v45  ;;  %1596 = vst [vmem:[#allocation3 + $0x30] sm:$0xff] %v5068_v35  ;;  %v1510_v50 = vadd.f32 0.18741608, %v1509_v30 }
 0x19f   : > { %v1458_v9 = vmul.f32 %v1457_v53, %v1433_v13  ;;  %v1487_v52 = vmul.f32 %v4535_v37, %v1486_v49  ;;  %v1522_v22 = vmul.f32 %v1521_v3, %v5844_v11 }
 0x1a0   : > { %v1511_v5 = vmul.f32 %v1510_v50, %v5844_v11  ;;  %v884_v11 = vmul.f32 0.5, %v5826_v4 }
 0x1a1   : > { %v4400_v12 = vclamps-f32 %v1458_v9, 1.0  ;;  %v1488_v57 = vadd.f32 %v4535_v37, %v1487_v52  ;;  %v1523_v54 = vadd.f32 1.0, %v1522_v22 }
 0x1a2   : > { %v1512_v6 = vadd.f32 1.1283791, %v1511_v5 }
 0x1a3   : > { %v1554_v1 = vadd.f32 1.0, %v4400_v12  ;;  %v1492_v8 = vsel %vm1491_vm11, %v4535_v37, %v1488_v57  ;;  %4536 = vrcp.f32 %v1523_v54  ;;  %v1535_v38 = vand.u32 2147483648, %v1523_v54 }
 0x1a4   : > { %v1497_v23 = vsel %vm1494_vm12, %v1496_v34, %v1492_v8  ;;  %v1533_v18 = vand.u32 2147483647, %v1523_v54  ;;  %vm1529_vm14 = vweird.f32 %v1523_v54  ;;  %v1513_v15 = vmul.f32 %v1512_v6, %v5835_v63 }
 0x1a5   : > { %v1570_v44 = vmul.f32 %v1554_v1, %v882_v27  ;;  %v1498_v55 = vmul.f32 %v1497_v23, %v1473_v47  ;;  %v1536_v2 = vor.u32 1.1754944e-38, %v1535_v38 }
 0x1a6   : > { %vm1534_vm0 = vcmp.eq.f32.partialorder %v1533_v18, 8.507059e+37 }
 0x1a7   : > { %1586 = vst [vmem:[#allocation2 + $0x70] sm:$0xff] %v1570_v44  ;;  %v4401_v60 = vclamps-f32 %v1498_v55, 1.0 }
 0x1a9   : > { %v1555_v40 = vadd.f32 1.0, %v4401_v60  ;;  %v4537_v56 = vpop.eup %4536 }
 0x1aa   : > { %v1525_v29 = vmul.f32 %v4537_v56, %v1523_v54  ;;  %vm1530_vm13 = vweird.f32 %v4537_v56 }
 0x1ab   : > { %v1571_v14 = vmul.f32 %v1555_v40, %v883_v28  ;;  %vm1531_vm15 = vmor %vm1529_vm14, %vm1530_vm13 }
 0x1ac   : > { %v1526_v24 = vsub.f32 1.0, %v1525_v29 }
 0x1ad   : > { %1587 = vst [vmem:[#allocation2 + $0x78] sm:$0xff] %v1571_v14 }
 0x1ae   : > { %v1527_v58 = vmul.f32 %v4537_v56, %v1526_v24 }
 0x1b0   : > { %v1528_v19 = vadd.f32 %v4537_v56, %v1527_v58 }
 0x1b2   : > { %v1532_v21 = vsel %vm1531_vm15, %v4537_v56, %v1528_v19 }
 0x1b3   : > { %v1537_v39 = vsel %vm1534_vm0, %v1536_v2, %v1532_v21 }
 0x1b4   : > { %v1538_v26 = vmul.f32 %v1537_v39, %v1513_v15 }
 0x1b6   : > { %v4402_v48 = vclamps-f32 %v1538_v26, 1.0 }
 0x1b8   : > { %v1556_v31 = vadd.f32 1.0, %v4402_v48 }
 0x1ba   : > { %v1572_v51 = vmul.f32 %v1556_v31, %v884_v11 }
 0x1bc   : > { %1588 = vst [vmem:[#allocation2 + $0x28] sm:$0xff] %v1572_v51 }
 0x1bd PF: > { %v1628_v63 = vld [vmem:[%s5265_s15 + $0x78] sm:$0xff]  ;;  %v1627_v20 = vld [vmem:[%s5265_s15 + $0x70] sm:$0xff]  ;;  %v1626_v41 = vld [vmem:[%s5265_s15 + $0x68] sm:$0xff]  ;;  %p4405_p5 = scmp.ne.s32.totalorder %s5128_s28, 7 }
 0x1be   : > { %v1660_v32 = vld [vmem:[%s5265_s15 + $0x178] sm:$0xff]  ;;  %v1899_v0 = vunpack.c.l.bf16 %v1628_v63  ;;  %v1659_v59 = vld [vmem:[%s5265_s15 + $0x170] sm:$0xff]  ;;  %v1897_v37 = vunpack.c.l.bf16 %v1627_v20  ;;  %v1658_v43 = vld [vmem:[%s5265_s15 + $0x168] sm:$0xff]  ;;  %v1895_v53 = vunpack.c.l.bf16 %v1626_v41  ;;  %s6908_s13 = sld [smem:[#allocation21_spill]] (!%p4405_p5) }
 0x1bf   : > { %v1963_v4 = vunpack.c.l.bf16 %v1660_v32  ;;  %v1644_v42 = vld [vmem:[%s5265_s15 + $0xf8] sm:$0xff]  ;;  %v1643_v16 = vld [vmem:[%s5265_s15 + $0xf0] sm:$0xff]  ;;  %v1961_v7 = vunpack.c.l.bf16 %v1659_v59  ;;  %v1625_v45 = vld [vmem:[%s5265_s15 + $0x60] sm:$0xff]  ;;  %v1959_v10 = vunpack.c.l.bf16 %v1658_v43 }
 0x1c0   : > { %v1676_v36 = vld [vmem:[%s5265_s15 + $0x1f8] sm:$0xff]  ;;  %v1931_v17 = vunpack.c.l.bf16 %v1644_v42  ;;  %2387 = vmatpush.msra.mxu0 %v1899_v0  ;;  %v1675_v13 = vld [vmem:[%s5265_s15 + $0x1f0] sm:$0xff]  ;;  %v1642_v25 = vld [vmem:[%s5265_s15 + $0xe8] sm:$0xff]  ;;  %v1929_v49 = vunpack.c.l.bf16 %v1643_v16  ;;  %v1893_v62 = vunpack.c.l.bf16 %v1625_v45 }
 0x1c1   : > { %2427 = vmatpush.msra.mxu2 %v1963_v4  ;;  %v1995_v33 = vunpack.c.l.bf16 %v1676_v36  ;;  %v1657_v9 = vld [vmem:[%s5265_s15 + $0x160] sm:$0xff]  ;;  %v1674_v61 = vld [vmem:[%s5265_s15 + $0x1e8] sm:$0xff]  ;;  %v1993_v3 = vunpack.c.l.bf16 %v1675_v13  ;;  %v1624_v35 = vld [vmem:[%s5265_s15 + $0x58] sm:$0xff]  ;;  %v1927_v46 = vunpack.c.l.bf16 %v1642_v25 }
 0x1c2   : > { %2407 = vmatpush.msra.mxu1 %v1931_v17  ;;  %2388 = vmatpush.msra.mxu0 %v1897_v37  ;;  %v1641_v52 = vld [vmem:[%s5265_s15 + $0xe0] sm:$0xff]  ;;  %v1656_v12 = vld [vmem:[%s5265_s15 + $0x158] sm:$0xff]  ;;  %v1957_v57 = vunpack.c.l.bf16 %v1657_v9  ;;  %v1991_v27 = vunpack.c.l.bf16 %v1674_v61  ;;  %v1623_v1 = vld [vmem:[%s5265_s15 + $0x50] sm:$0xff]  ;;  %v1891_v54 = vunpack.c.l.bf16 %v1624_v35 }
 0x1c3   : > { %2428 = vmatpush.msra.mxu2 %v1961_v7  ;;  %2447 = vmatpush.msra.mxu3 %v1995_v33  ;;  %v1673_v22 = vld [vmem:[%s5265_s15 + $0x1e0] sm:$0xff]  ;;  %v1640_v34 = vld [vmem:[%s5265_s15 + $0xd8] sm:$0xff]  ;;  %v1925_v47 = vunpack.c.l.bf16 %v1641_v52  ;;  %v1655_v8 = vld [vmem:[%s5265_s15 + $0x150] sm:$0xff]  ;;  %v1955_v44 = vunpack.c.l.bf16 %v1656_v12  ;;  %v1889_v50 = vunpack.c.l.bf16 %v1623_v1 }
 0x1c4   : > { %2408 = vmatpush.msra.mxu1 %v1929_v49  ;;  %2389 = vmatpush.msra.mxu0 %v1895_v53  ;;  %v1672_v30 = vld [vmem:[%s5265_s15 + $0x1d8] sm:$0xff]  ;;  %v1989_v23 = vunpack.c.l.bf16 %v1673_v22  ;;  %v1622_v55 = vld [vmem:[%s5265_s15 + $0x48] sm:$0xff]  ;;  %v1639_v60 = vld [vmem:[%s5265_s15 + $0xd0] sm:$0xff]  ;;  %v1923_v28 = vunpack.c.l.bf16 %v1640_v34  ;;  %v1953_v14 = vunpack.c.l.bf16 %v1655_v8 }
 0x1c5   : > { %2429 = vmatpush.msra.mxu2 %v1959_v10  ;;  %2448 = vmatpush.msra.mxu3 %v1993_v3  ;;  %v1654_v40 = vld [vmem:[%s5265_s15 + $0x148] sm:$0xff]  ;;  %v1671_v56 = vld [vmem:[%s5265_s15 + $0x1d0] sm:$0xff]  ;;  %v1987_v5 = vunpack.c.l.bf16 %v1672_v30  ;;  %v1621_v29 = vld [vmem:[%s5265_s15 + $0x40] sm:$0xff]  ;;  %v1887_v38 = vunpack.c.l.bf16 %v1622_v55  ;;  %v1921_v6 = vunpack.c.l.bf16 %v1639_v60 }
 0x1c6   : > { %2409 = vmatpush.msra.mxu1 %v1927_v46  ;;  %2390 = vmatpush.msra.mxu0 %v1893_v62  ;;  %v1638_v24 = vld [vmem:[%s5265_s15 + $0xc8] sm:$0xff]  ;;  %v1653_v58 = vld [vmem:[%s5265_s15 + $0x140] sm:$0xff]  ;;  %v1951_v19 = vunpack.c.l.bf16 %v1654_v40  ;;  %v1985_v2 = vunpack.c.l.bf16 %v1671_v56  ;;  %v1620_v15 = vld [vmem:[%s5265_s15 + $0x38] sm:$0xff]  ;;  %v1885_v39 = vunpack.c.l.bf16 %v1621_v29 }
 0x1c7   : > { %2430 = vmatpush.msra.mxu2 %v1957_v57  ;;  %2449 = vmatpush.msra.mxu3 %v1991_v27  ;;  %v1670_v18 = vld [vmem:[%s5265_s15 + $0x1c8] sm:$0xff]  ;;  %v1637_v21 = vld [vmem:[%s5265_s15 + $0xc0] sm:$0xff]  ;;  %v1919_v26 = vunpack.c.l.bf16 %v1638_v24  ;;  %v1652_v48 = vld [vmem:[%s5265_s15 + $0x138] sm:$0xff]  ;;  %v1949_v31 = vunpack.c.l.bf16 %v1653_v58  ;;  %v1883_v20 = vunpack.c.l.bf16 %v1620_v15 }
 0x1c8   : > { %2410 = vmatpush.msra.mxu1 %v1925_v47  ;;  %2391 = vmatpush.msra.mxu0 %v1891_v54  ;;  %v1669_v11 = vld [vmem:[%s5265_s15 + $0x1c0] sm:$0xff]  ;;  %v1983_v51 = vunpack.c.l.bf16 %v1670_v18  ;;  %v1619_v63 = vld [vmem:[%s5265_s15 + $0x30] sm:$0xff]  ;;  %v1636_v32 = vld [vmem:[%s5265_s15 + $0xb8] sm:$0xff]  ;;  %v1917_v0 = vunpack.c.l.bf16 %v1637_v21  ;;  %v1947_v59 = vunpack.c.l.bf16 %v1652_v48 }
 0x1c9   : > { %2431 = vmatpush.msra.mxu2 %v1955_v44  ;;  %2450 = vmatpush.msra.mxu3 %v1989_v23  ;;  %v1651_v4 = vld [vmem:[%s5265_s15 + $0x130] sm:$0xff]  ;;  %v1668_v42 = vld [vmem:[%s5265_s15 + $0x1b8] sm:$0xff]  ;;  %v1981_v36 = vunpack.c.l.bf16 %v1669_v11  ;;  %v1618_v37 = vld [vmem:[%s5265_s15 + $0x28] sm:$0xff]  ;;  %v1881_v41 = vunpack.c.l.bf16 %v1619_v63  ;;  %v1915_v16 = vunpack.c.l.bf16 %v1636_v32 }
 0x1ca   : > { %2411 = vmatpush.msra.mxu1 %v1923_v28  ;;  %2392 = vmatpush.msra.mxu0 %v1889_v50  ;;  %v1635_v17 = vld [vmem:[%s5265_s15 + $0xb0] sm:$0xff]  ;;  %v1650_v43 = vld [vmem:[%s5265_s15 + $0x128] sm:$0xff]  ;;  %v1945_v33 = vunpack.c.l.bf16 %v1651_v4  ;;  %v1979_v13 = vunpack.c.l.bf16 %v1668_v42  ;;  %v1617_v45 = vld [vmem:[%s5265_s15 + $0x20] sm:$0xff]  ;;  %v1879_v53 = vunpack.c.l.bf16 %v1618_v37 }
 0x1cb   : > { %2432 = vmatpush.msra.mxu2 %v1953_v14  ;;  %2451 = vmatpush.msra.mxu3 %v1987_v5  ;;  %v1667_v7 = vld [vmem:[%s5265_s15 + $0x1b0] sm:$0xff]  ;;  %v1634_v25 = vld [vmem:[%s5265_s15 + $0xa8] sm:$0xff]  ;;  %v1913_v49 = vunpack.c.l.bf16 %v1635_v17  ;;  %v1649_v9 = vld [vmem:[%s5265_s15 + $0x120] sm:$0xff]  ;;  %v1943_v10 = vunpack.c.l.bf16 %v1650_v43  ;;  %v1877_v62 = vunpack.c.l.bf16 %v1617_v45 }
 0x1cc   : > { %2412 = vmatpush.msra.mxu1 %v1921_v6  ;;  %2393 = vmatpush.msra.mxu0 %v1887_v38  ;;  %v1666_v61 = vld [vmem:[%s5265_s15 + $0x1a8] sm:$0xff]  ;;  %v1977_v3 = vunpack.c.l.bf16 %v1667_v7  ;;  %v1616_v35 = vld [vmem:[%s5265_s15 + $0x18] sm:$0xff]  ;;  %v1633_v52 = vld [vmem:[%s5265_s15 + $0xa0] sm:$0xff]  ;;  %v1911_v46 = vunpack.c.l.bf16 %v1634_v25  ;;  %v1941_v57 = vunpack.c.l.bf16 %v1649_v9 }
 0x1cd   : > { %2433 = vmatpush.msra.mxu2 %v1951_v19  ;;  %2452 = vmatpush.msra.mxu3 %v1985_v2  ;;  %v1648_v12 = vld [vmem:[%s5265_s15 + $0x118] sm:$0xff]  ;;  %v1665_v22 = vld [vmem:[%s5265_s15 + $0x1a0] sm:$0xff]  ;;  %v1975_v27 = vunpack.c.l.bf16 %v1666_v61  ;;  %v1615_v1 = vld [vmem:[%s5265_s15 + $0x10] sm:$0xff]  ;;  %v1875_v54 = vunpack.c.l.bf16 %v1616_v35  ;;  %v1909_v47 = vunpack.c.l.bf16 %v1633_v52 }
 0x1ce   : > { %2413 = vmatpush.msra.mxu1 %v1919_v26  ;;  %2394 = vmatpush.msra.mxu0 %v1885_v39  ;;  %v1632_v34 = vld [vmem:[%s5265_s15 + $0x98] sm:$0xff]  ;;  %v1647_v8 = vld [vmem:[%s5265_s15 + $0x110] sm:$0xff]  ;;  %v1939_v44 = vunpack.c.l.bf16 %v1648_v12  ;;  %v1973_v23 = vunpack.c.l.bf16 %v1665_v22  ;;  %v1614_v55 = vld [vmem:[%s5265_s15 + $0x8] sm:$0xff]  ;;  %v1873_v50 = vunpack.c.l.bf16 %v1615_v1 }
 0x1cf   : > { %2434 = vmatpush.msra.mxu2 %v1949_v31  ;;  %2453 = vmatpush.msra.mxu3 %v1983_v51  ;;  %v1664_v30 = vld [vmem:[%s5265_s15 + $0x198] sm:$0xff]  ;;  %v1631_v60 = vld [vmem:[%s5265_s15 + $0x90] sm:$0xff]  ;;  %v1907_v28 = vunpack.c.l.bf16 %v1632_v34  ;;  %v1646_v40 = vld [vmem:[%s5265_s15 + $0x108] sm:$0xff]  ;;  %v1937_v14 = vunpack.c.l.bf16 %v1647_v8  ;;  %v1871_v38 = vunpack.c.l.bf16 %v1614_v55 }
 0x1d0   : > { %2414 = vmatpush.msra.mxu1 %v1917_v0  ;;  %2395 = vmatpush.msra.mxu0 %v1883_v20  ;;  %v1663_v56 = vld [vmem:[%s5265_s15 + $0x190] sm:$0xff]  ;;  %v1971_v5 = vunpack.c.l.bf16 %v1664_v30  ;;  %v1613_v29 = vld [vmem:[%s5265_s15] sm:$0xff]  ;;  %v1630_v24 = vld [vmem:[%s5265_s15 + $0x88] sm:$0xff]  ;;  %v1905_v6 = vunpack.c.l.bf16 %v1631_v60  ;;  %v1935_v19 = vunpack.c.l.bf16 %v1646_v40 }
 0x1d1   : > { %2435 = vmatpush.msra.mxu2 %v1947_v59  ;;  %2454 = vmatpush.msra.mxu3 %v1981_v36  ;;  %v1645_v58 = vld [vmem:[%s5265_s15 + $0x100] sm:$0xff]  ;;  %v1662_v18 = vld [vmem:[%s5265_s15 + $0x188] sm:$0xff]  ;;  %v1969_v2 = vunpack.c.l.bf16 %v1663_v56  ;;  %v1692_v15 = vld [vmem:[%s5265_s15 + $0x278] sm:$0xff]  ;;  %v1869_v39 = vunpack.c.l.bf16 %v1613_v29  ;;  %v1903_v26 = vunpack.c.l.bf16 %v1630_v24 }
 0x1d2   : > { %2415 = vmatpush.msra.mxu1 %v1915_v16  ;;  %2396 = vmatpush.msra.mxu0 %v1881_v41  ;;  %v1724_v21 = vld [vmem:[%s5265_s15 + $0x378] sm:$0xff]  ;;  %v1629_v48 = vld [vmem:[%s5265_s15 + $0x80] sm:$0xff]  ;;  %v1933_v31 = vunpack.c.l.bf16 %v1645_v58  ;;  %v1967_v51 = vunpack.c.l.bf16 %v1662_v18  ;;  %v1691_v63 = vld [vmem:[%s5265_s15 + $0x270] sm:$0xff]  ;;  %v2027_v20 = vunpack.c.l.bf16 %v1692_v15 }
 0x1d3   : > { %2436 = vmatpush.msra.mxu2 %v1945_v33  ;;  %2455 = vmatpush.msra.mxu3 %v1979_v13  ;;  %v1661_v11 = vld [vmem:[%s5265_s15 + $0x180] sm:$0xff]  ;;  %v1708_v32 = vld [vmem:[%s5265_s15 + $0x2f8] sm:$0xff]  ;;  %v2091_v0 = vunpack.c.l.bf16 %v1724_v21  ;;  %v1723_v4 = vld [vmem:[%s5265_s15 + $0x370] sm:$0xff]  ;;  %v1901_v59 = vunpack.c.l.bf16 %v1629_v48  ;;  %v2025_v41 = vunpack.c.l.bf16 %v1691_v63 }
 0x1d4   : > { %2416 = vmatpush.msra.mxu1 %v1913_v49  ;;  %2397 = vmatpush.msra.mxu0 %v1879_v53  ;;  %v1740_v42 = vld [vmem:[%s5265_s15 + $0x3f8] sm:$0xff]  ;;  %v1965_v36 = vunpack.c.l.bf16 %v1661_v11  ;;  %v1690_v37 = vld [vmem:[%s5265_s15 + $0x268] sm:$0xff]  ;;  %v1707_v17 = vld [vmem:[%s5265_s15 + $0x2f0] sm:$0xff]  ;;  %v2059_v16 = vunpack.c.l.bf16 %v1708_v32  ;;  %v2089_v33 = vunpack.c.l.bf16 %v1723_v4 }
 0x1d5   : > { %2437 = vmatpush.msra.mxu2 %v1943_v10  ;;  %2456 = vmatpush.msra.mxu3 %v1977_v3  ;;  %v1722_v43 = vld [vmem:[%s5265_s15 + $0x368] sm:$0xff]  ;;  %v1739_v7 = vld [vmem:[%s5265_s15 + $0x3f0] sm:$0xff]  ;;  %v2123_v13 = vunpack.c.l.bf16 %v1740_v42  ;;  %v1689_v45 = vld [vmem:[%s5265_s15 + $0x260] sm:$0xff]  ;;  %v2023_v53 = vunpack.c.l.bf16 %v1690_v37  ;;  %v2057_v49 = vunpack.c.l.bf16 %v1707_v17 }
 0x1d6   : > { %2417 = vmatpush.msra.mxu1 %v1911_v46  ;;  %2398 = vmatpush.msra.mxu0 %v1877_v62  ;;  %v1706_v25 = vld [vmem:[%s5265_s15 + $0x2e8] sm:$0xff]  ;;  %v1721_v9 = vld [vmem:[%s5265_s15 + $0x360] sm:$0xff]  ;;  %v2087_v10 = vunpack.c.l.bf16 %v1722_v43  ;;  %v2121_v3 = vunpack.c.l.bf16 %v1739_v7  ;;  %v1688_v35 = vld [vmem:[%s5265_s15 + $0x258] sm:$0xff]  ;;  %v2021_v62 = vunpack.c.l.bf16 %v1689_v45 }
 0x1d7   : > { %2438 = vmatpush.msra.mxu2 %v1941_v57  ;;  %2457 = vmatpush.msra.mxu3 %v1975_v27  ;;  %v1738_v61 = vld [vmem:[%s5265_s15 + $0x3e8] sm:$0xff]  ;;  %v1705_v52 = vld [vmem:[%s5265_s15 + $0x2e0] sm:$0xff]  ;;  %v2055_v46 = vunpack.c.l.bf16 %v1706_v25  ;;  %v1720_v12 = vld [vmem:[%s5265_s15 + $0x358] sm:$0xff]  ;;  %v2085_v57 = vunpack.c.l.bf16 %v1721_v9 }
 0x1d8   : > { %2418 = vmatpush.msra.mxu1 %v1909_v47  ;;  %2399 = vmatpush.msra.mxu0 %v1875_v54  ;;  %v1737_v22 = vld [vmem:[%s5265_s15 + $0x3e0] sm:$0xff]  ;;  %v2119_v27 = vunpack.c.l.bf16 %v1738_v61  ;;  %v1687_v1 = vld [vmem:[%s5265_s15 + $0x250] sm:$0xff]  ;;  %v1704_v34 = vld [vmem:[%s5265_s15 + $0x2d8] sm:$0xff]  ;;  %v2019_v54 = vunpack.c.l.bf16 %v1688_v35  ;;  %v2053_v47 = vunpack.c.l.bf16 %v1705_v52 }
 0x1d9   : > { %2439 = vmatpush.msra.mxu2 %v1939_v44  ;;  %2458 = vmatpush.msra.mxu3 %v1973_v23  ;;  %v1719_v8 = vld [vmem:[%s5265_s15 + $0x350] sm:$0xff]  ;;  %v1736_v30 = vld [vmem:[%s5265_s15 + $0x3d8] sm:$0xff]  ;;  %v2083_v44 = vunpack.c.l.bf16 %v1720_v12  ;;  %v2117_v23 = vunpack.c.l.bf16 %v1737_v22  ;;  %v1686_v55 = vld [vmem:[%s5265_s15 + $0x248] sm:$0xff] }
 0x1da   : > { %2419 = vmatpush.msra.mxu1 %v1907_v28  ;;  %2400 = vmatpush.msra.mxu0 %v1873_v50  ;;  %v1703_v60 = vld [vmem:[%s5265_s15 + $0x2d0] sm:$0xff]  ;;  %v2017_v50 = vunpack.c.l.bf16 %v1687_v1  ;;  %v2051_v28 = vunpack.c.l.bf16 %v1704_v34  ;;  %v1718_v40 = vld [vmem:[%s5265_s15 + $0x348] sm:$0xff]  ;;  %v1685_v29 = vld [vmem:[%s5265_s15 + $0x240] sm:$0xff] }
 0x1db   : > { %2440 = vmatpush.msra.mxu2 %v1937_v14  ;;  %2459 = vmatpush.msra.mxu3 %v1971_v5  ;;  %v1735_v56 = vld [vmem:[%s5265_s15 + $0x3d0] sm:$0xff]  ;;  %v2081_v14 = vunpack.c.l.bf16 %v1719_v8  ;;  %v2115_v5 = vunpack.c.l.bf16 %v1736_v30  ;;  %v1702_v24 = vld [vmem:[%s5265_s15 + $0x2c8] sm:$0xff]  ;;  %v1717_v58 = vld [vmem:[%s5265_s15 + $0x340] sm:$0xff] }
 0x1dc   : > { %2420 = vmatpush.msra.mxu1 %v1905_v6  ;;  %2401 = vmatpush.msra.mxu0 %v1871_v38  ;;  %v2015_v38 = vunpack.c.l.bf16 %v1686_v55  ;;  %v2049_v6 = vunpack.c.l.bf16 %v1703_v60  ;;  %v1734_v18 = vld [vmem:[%s5265_s15 + $0x3c8] sm:$0xff]  ;;  %v1684_v15 = vld [vmem:[%s5265_s15 + $0x238] sm:$0xff]  ;;  %v1701_v21 = vld [vmem:[%s5265_s15 + $0x2c0] sm:$0xff] }
 0x1dd   : > { %2441 = vmatpush.msra.mxu2 %v1935_v19  ;;  %2460 = vmatpush.msra.mxu3 %v1969_v2  ;;  %v2079_v19 = vunpack.c.l.bf16 %v1718_v40  ;;  %v2113_v2 = vunpack.c.l.bf16 %v1735_v56  ;;  %v1716_v48 = vld [vmem:[%s5265_s15 + $0x338] sm:$0xff]  ;;  %v1733_v11 = vld [vmem:[%s5265_s15 + $0x3c0] sm:$0xff]  ;;  %v1683_v63 = vld [vmem:[%s5265_s15 + $0x230] sm:$0xff] }
 0x1de   : > { %2421 = vmatpush.msra.mxu1 %v1903_v26  ;;  %2402 = vmatpush.msra.mxu0 %v1869_v39  ;;  %v2013_v39 = vunpack.c.l.bf16 %v1685_v29  ;;  %v2047_v26 = vunpack.c.l.bf16 %v1702_v24  ;;  %v1700_v32 = vld [vmem:[%s5265_s15 + $0x2b8] sm:$0xff]  ;;  %v1715_v4 = vld [vmem:[%s5265_s15 + $0x330] sm:$0xff]  ;;  %v1682_v37 = vld [vmem:[%s5265_s15 + $0x228] sm:$0xff] }
 0x1df   : > { %2442 = vmatpush.msra.mxu2 %v1933_v31  ;;  %2461 = vmatpush.msra.mxu3 %v1967_v51  ;;  %v2077_v31 = vunpack.c.l.bf16 %v1717_v58  ;;  %v2111_v51 = vunpack.c.l.bf16 %v1734_v18  ;;  %v1732_v42 = vld [vmem:[%s5265_s15 + $0x3b8] sm:$0xff]  ;;  %v1699_v17 = vld [vmem:[%s5265_s15 + $0x2b0] sm:$0xff]  ;;  %v1714_v43 = vld [vmem:[%s5265_s15 + $0x328] sm:$0xff] }
 0x1e0   : > { %2467 = vmatpush.msrb.mxu0 %v2027_v20  ;;  %2422 = vmatpush.msra.mxu1 %v1901_v59  ;;  %v2011_v20 = vunpack.c.l.bf16 %v1684_v15  ;;  %v2075_v59 = vunpack.c.l.bf16 %v1716_v48  ;;  %v1731_v7 = vld [vmem:[%s5265_s15 + $0x3b0] sm:$0xff]  ;;  %v1681_v45 = vld [vmem:[%s5265_s15 + $0x220] sm:$0xff]  ;;  %v1698_v25 = vld [vmem:[%s5265_s15 + $0x2a8] sm:$0xff] }
 0x1e1   : > { %2507 = vmatpush.msrb.mxu2 %v2091_v0  ;;  %2462 = vmatpush.msra.mxu3 %v1965_v36  ;;  %v2045_v0 = vunpack.c.l.bf16 %v1701_v21  ;;  %v2109_v36 = vunpack.c.l.bf16 %v1733_v11  ;;  %v1713_v9 = vld [vmem:[%s5265_s15 + $0x320] sm:$0xff]  ;;  %v1730_v61 = vld [vmem:[%s5265_s15 + $0x3a8] sm:$0xff]  ;;  %v1680_v35 = vld [vmem:[%s5265_s15 + $0x218] sm:$0xff] }
 0x1e2   : > { %2468 = vmatpush.msrb.mxu0 %v2025_v41  ;;  %2487 = vmatpush.msrb.mxu1 %v2059_v16  ;;  %v2009_v41 = vunpack.c.l.bf16 %v1683_v63  ;;  %v2043_v16 = vunpack.c.l.bf16 %v1700_v32  ;;  %v1697_v52 = vld [vmem:[%s5265_s15 + $0x2a0] sm:$0xff]  ;;  %v1712_v12 = vld [vmem:[%s5265_s15 + $0x318] sm:$0xff]  ;;  %v1679_v1 = vld [vmem:[%s5265_s15 + $0x210] sm:$0xff] }
 0x1e3   : > { %2508 = vmatpush.msrb.mxu2 %v2089_v33  ;;  %2527 = vmatpush.msrb.mxu3 %v2123_v13  ;;  %v2073_v33 = vunpack.c.l.bf16 %v1715_v4  ;;  %v2107_v13 = vunpack.c.l.bf16 %v1732_v42  ;;  %v1729_v22 = vld [vmem:[%s5265_s15 + $0x3a0] sm:$0xff]  ;;  %v1696_v34 = vld [vmem:[%s5265_s15 + $0x298] sm:$0xff]  ;;  %v1711_v8 = vld [vmem:[%s5265_s15 + $0x310] sm:$0xff] }
 0x1e4   : > { %2469 = vmatpush.msrb.mxu0 %v2023_v53  ;;  %2488 = vmatpush.msrb.mxu1 %v2057_v49  ;;  %v2007_v53 = vunpack.c.l.bf16 %v1682_v37  ;;  %v2041_v49 = vunpack.c.l.bf16 %v1699_v17  ;;  %v1728_v30 = vld [vmem:[%s5265_s15 + $0x398] sm:$0xff]  ;;  %v1678_v55 = vld [vmem:[%s5265_s15 + $0x208] sm:$0xff]  ;;  %v1695_v60 = vld [vmem:[%s5265_s15 + $0x290] sm:$0xff] }
 0x1e5   : > { %2509 = vmatpush.msrb.mxu2 %v2087_v10  ;;  %2528 = vmatpush.msrb.mxu3 %v2121_v3  ;;  %v2071_v10 = vunpack.c.l.bf16 %v1714_v43  ;;  %v2105_v3 = vunpack.c.l.bf16 %v1731_v7  ;;  %v1710_v40 = vld [vmem:[%s5265_s15 + $0x308] sm:$0xff]  ;;  %v1727_v56 = vld [vmem:[%s5265_s15 + $0x390] sm:$0xff]  ;;  %v1677_v29 = vld [vmem:[%s5265_s15 + $0x200] sm:$0xff] }
 0x1e6   : > { %2470 = vmatpush.msrb.mxu0 %v2021_v62  ;;  %2489 = vmatpush.msrb.mxu1 %v2055_v46  ;;  %v2005_v62 = vunpack.c.l.bf16 %v1681_v45  ;;  %v2039_v46 = vunpack.c.l.bf16 %v1698_v25  ;;  %v1694_v24 = vld [vmem:[%s5265_s15 + $0x288] sm:$0xff]  ;;  %v1709_v58 = vld [vmem:[%s5265_s15 + $0x300] sm:$0xff]  ;;  %v1756_v15 = vld [vmem:[%s5265_s15 + $0x478] sm:$0xff] }
 0x1e7   : > { %2510 = vmatpush.msrb.mxu2 %v2085_v57  ;;  %2529 = vmatpush.msrb.mxu3 %v2119_v27  ;;  %v2069_v57 = vunpack.c.l.bf16 %v1713_v9  ;;  %v2103_v27 = vunpack.c.l.bf16 %v1730_v61  ;;  %v1726_v18 = vld [vmem:[%s5265_s15 + $0x388] sm:$0xff]  ;;  %v1788_v21 = vld [vmem:[%s5265_s15 + $0x578] sm:$0xff]  ;;  %v2031_v48 = vunpack.c.l.bf16 %v1694_v24  ;;  %v1725_v11 = vld [vmem:[%s5265_s15 + $0x380] sm:$0xff] }
 0x1e8   : > { %2471 = vmatpush.msrb.mxu0 %v2019_v54  ;;  %2490 = vmatpush.msrb.mxu1 %v2053_v47  ;;  %v2003_v54 = vunpack.c.l.bf16 %v1680_v35  ;;  %v2037_v47 = vunpack.c.l.bf16 %v1697_v52  ;;  %v1597_v63 = vld [vmem:[#allocation2 + $0x30] sm:$0xff]  ;;  %v1755_v32 = vld [vmem:[%s5265_s15 + $0x470] sm:$0xff]  ;;  %v2219_v4 = vunpack.c.l.bf16 %v1788_v21  ;;  %v2093_v37 = vunpack.c.l.bf16 %v1725_v11  ;;  %v1804_v17 = vld [vmem:[%s5265_s15 + $0x5f8] sm:$0xff] }
 0x1e9   : > { %2511 = vmatpush.msrb.mxu2 %v2083_v44  ;;  %2530 = vmatpush.msrb.mxu3 %v2117_v23  ;;  %v2067_v44 = vunpack.c.l.bf16 %v1712_v12  ;;  %v2101_v23 = vunpack.c.l.bf16 %v1729_v22  ;;  %v2153_v43 = vunpack.c.l.bf16 %v1755_v32  ;;  %v1771_v7 = vld [vmem:[%s5265_s15 + $0x4f0] sm:$0xff]  ;;  %v2251_v9 = vunpack.c.l.bf16 %v1804_v17  ;;  %v1752_v22 = vld [vmem:[%s5265_s15 + $0x458] sm:$0xff]  ;;  %v1766_v21 = vld [vmem:[%s5265_s15 + $0x4c8] sm:$0xff] }
 0x1ea   : > { %2472 = vmatpush.msrb.mxu0 %v2017_v50  ;;  %2491 = vmatpush.msrb.mxu1 %v2051_v28  ;;  %v2001_v50 = vunpack.c.l.bf16 %v1679_v1  ;;  %v2035_v28 = vunpack.c.l.bf16 %v1696_v34  ;;  %v2185_v35 = vunpack.c.l.bf16 %v1771_v7  ;;  %v1784_v34 = vld [vmem:[%s5265_s15 + $0x558] sm:$0xff] }
 0x1eb   : > { %2512 = vmatpush.msrb.mxu2 %v2081_v14  ;;  %2531 = vmatpush.msrb.mxu3 %v2115_v5  ;;  %v2065_v14 = vunpack.c.l.bf16 %v1711_v8  ;;  %v2099_v5 = vunpack.c.l.bf16 %v1728_v30  ;;  %v1603_v8 = vld [vmem:[#allocation2 + $0x8] sm:$0xff]  ;;  %v2147_v30 = vunpack.c.l.bf16 %v1752_v22 }
 0x1ec   : > { %2473 = vmatpush.msrb.mxu0 %v2015_v38  ;;  %2492 = vmatpush.msrb.mxu1 %v2049_v6  ;;  %v1999_v38 = vunpack.c.l.bf16 %v1678_v55  ;;  %v2033_v6 = vunpack.c.l.bf16 %v1695_v60  ;;  %v1768_v55 = vld [vmem:[%s5265_s15 + $0x4d8] sm:$0xff]  ;;  %v2211_v60 = vunpack.c.l.bf16 %v1784_v34 }
 0x1ed   : > { %2513 = vmatpush.msrb.mxu2 %v2079_v19  ;;  %2532 = vmatpush.msrb.mxu3 %v2113_v2  ;;  %v2063_v19 = vunpack.c.l.bf16 %v1710_v40  ;;  %v2097_v2 = vunpack.c.l.bf16 %v1727_v56  ;;  %v1800_v40 = vld [vmem:[%s5265_s15 + $0x5d8] sm:$0xff]  ;;  %v1601_v56 = vld [vmem:[#allocation2 + $0x50] sm:$0xff]  ;;  %v2179_v24 = vunpack.c.l.bf16 %v1768_v55 }
 0x1ee   : > { %2474 = vmatpush.msrb.mxu0 %v2013_v39  ;;  %2493 = vmatpush.msrb.mxu1 %v2047_v26  ;;  %v1693_v39 = vld [vmem:[%s5265_s15 + $0x280] sm:$0xff]  ;;  %v1997_v26 = vunpack.c.l.bf16 %v1677_v29 }
 0x1ef   : > { %2514 = vmatpush.msrb.mxu2 %v2077_v31  ;;  %2533 = vmatpush.msrb.mxu3 %v2111_v51  ;;  %v2061_v31 = vunpack.c.l.bf16 %v1709_v58  ;;  %v2095_v51 = vunpack.c.l.bf16 %v1726_v18  ;;  %v2029_v42 = vunpack.c.l.bf16 %v1693_v39  ;;  %v2243_v18 = vunpack.c.l.bf16 %v1800_v40  ;;  %v1781_v39 = vld [vmem:[%s5265_s15 + $0x540] sm:$0xff] }
 0x1f0   : > { %2475 = vmatpush.msrb.mxu0 %v2011_v20  ;;  %2494 = vmatpush.msrb.mxu1 %v2045_v0  ;;  %v1599_v20 = vld [vmem:[#allocation2 + $0x58] sm:$0xff]  ;;  %v2155_v0 = vunpack.c.l.bf16 %v1756_v15 }
 0x1f1   : > { %2515 = vmatpush.msrb.mxu2 %v2075_v59  ;;  %2534 = vmatpush.msrb.mxu3 %v2109_v36  ;;  %v1772_v59 = vld [vmem:[%s5265_s15 + $0x4f8] sm:$0xff]  ;;  %v1787_v36 = vld [vmem:[%s5265_s15 + $0x570] sm:$0xff] }
 0x1f2   : > { %2476 = vmatpush.msrb.mxu0 %v2009_v41  ;;  %2495 = vmatpush.msrb.mxu1 %v2043_v16  ;;  %v1754_v41 = vld [vmem:[%s5265_s15 + $0x468] sm:$0xff]  ;;  %v1598_v16 = vld [vmem:[#allocation2] sm:$0xff]  ;;  %v2187_v45 = vunpack.c.l.bf16 %v1772_v59  ;;  %v2217_v25 = vunpack.c.l.bf16 %v1787_v36  ;;  %v1797_v59 = vld [vmem:[%s5265_s15 + $0x5c0] sm:$0xff] }
 0x1f3   : > { %2516 = vmatpush.msrb.mxu2 %v2073_v33  ;;  %2535 = vmatpush.msrb.mxu3 %v2107_v13  ;;  %v1786_v33 = vld [vmem:[%s5265_s15 + $0x568] sm:$0xff]  ;;  %v2151_v61 = vunpack.c.l.bf16 %v1754_v41  ;;  %v1747_v36 = vld [vmem:[%s5265_s15 + $0x430] sm:$0xff]  ;;  %v1764_v41 = vld [vmem:[%s5265_s15 + $0x4b8] sm:$0xff] }
 0x1f4   : > { %2477 = vmatpush.msrb.mxu0 %v2007_v53  ;;  %2496 = vmatpush.msrb.mxu1 %v2041_v49  ;;  %v1600_v13 = vld [vmem:[#allocation2 + $0x18] sm:$0xff]  ;;  %v1803_v53 = vld [vmem:[%s5265_s15 + $0x5f0] sm:$0xff]  ;;  %v1753_v49 = vld [vmem:[%s5265_s15 + $0x460] sm:$0xff]  ;;  %v2215_v52 = vunpack.c.l.bf16 %v1786_v33 }
 0x1f5   : > { %2517 = vmatpush.msrb.mxu2 %v2071_v10  ;;  %2536 = vmatpush.msrb.mxu3 %v2105_v3  ;;  %v1770_v10 = vld [vmem:[%s5265_s15 + $0x4e8] sm:$0xff]  ;;  %v1785_v3 = vld [vmem:[%s5265_s15 + $0x560] sm:$0xff]  ;;  %v2149_v12 = vunpack.c.l.bf16 %v1753_v49  ;;  %v1796_v33 = vld [vmem:[%s5265_s15 + $0x5b8] sm:$0xff] }
 0x1f6   : > { %2478 = vmatpush.msrb.mxu0 %v2005_v62  ;;  %2497 = vmatpush.msrb.mxu1 %v2039_v46  ;;  %v1802_v62 = vld [vmem:[%s5265_s15 + $0x5e8] sm:$0xff]  ;;  %v2249_v46 = vunpack.c.l.bf16 %v1803_v53  ;;  %v2213_v1 = vunpack.c.l.bf16 %v1785_v3  ;;  %v1763_v53 = vld [vmem:[%s5265_s15 + $0x4b0] sm:$0xff]  ;;  %v1745_v3 = vld [vmem:[%s5265_s15 + $0x420] sm:$0xff] }
 0x1f7   : > { %2518 = vmatpush.msrb.mxu2 %v2069_v57  ;;  %2537 = vmatpush.msrb.mxu3 %v2103_v27  ;;  %v1769_v57 = vld [vmem:[%s5265_s15 + $0x4e0] sm:$0xff]  ;;  %v2183_v27 = vunpack.c.l.bf16 %v1770_v10  ;;  %v1778_v49 = vld [vmem:[%s5265_s15 + $0x528] sm:$0xff]  ;;  %v1795_v10 = vld [vmem:[%s5265_s15 + $0x5b0] sm:$0xff]  ;;  %v2133_v34 = vunpack.c.l.bf16 %v1745_v3 }
 0x1f8   : > { %2479 = vmatpush.msrb.mxu0 %v2003_v54  ;;  %2498 = vmatpush.msrb.mxu1 %v2037_v47  ;;  %v1801_v54 = vld [vmem:[%s5265_s15 + $0x5e0] sm:$0xff]  ;;  %v2247_v47 = vunpack.c.l.bf16 %v1802_v62  ;;  %v1762_v62 = vld [vmem:[%s5265_s15 + $0x4a8] sm:$0xff]  ;;  %v2199_v22 = vunpack.c.l.bf16 %v1778_v49  ;;  %v1606_v49 = vld [vmem:[#allocation2 + $0x20] sm:$0xff] }
 0x1f9   : > { %2519 = vmatpush.msrb.mxu2 %v2067_v44  ;;  %2538 = vmatpush.msrb.mxu3 %v2101_v23  ;;  %v2181_v44 = vunpack.c.l.bf16 %v1769_v57  ;;  %v1751_v23 = vld [vmem:[%s5265_s15 + $0x450] sm:$0xff]  ;;  %v1794_v57 = vld [vmem:[%s5265_s15 + $0x5a8] sm:$0xff] }
 0x1fa   : > { %2480 = vmatpush.msrb.mxu0 %v2001_v50  ;;  %2499 = vmatpush.msrb.mxu1 %v2035_v28  ;;  %v2245_v50 = vunpack.c.l.bf16 %v1801_v54  ;;  %v1783_v28 = vld [vmem:[%s5265_s15 + $0x550] sm:$0xff]  ;;  %v2145_v29 = vunpack.c.l.bf16 %v1751_v23  ;;  %v1761_v54 = vld [vmem:[%s5265_s15 + $0x4a0] sm:$0xff]  ;;  %v2231_v55 = vunpack.c.l.bf16 %v1794_v57  ;;  %v1608_v3 = vld [vmem:[#allocation2 + $0x38] sm:$0xff] }
 0x1fb   : > { %2520 = vmatpush.msrb.mxu2 %v2065_v14  ;;  %2539 = vmatpush.msrb.mxu3 %v2099_v5  ;;  %v1750_v14 = vld [vmem:[%s5265_s15 + $0x448] sm:$0xff]  ;;  %v1604_v5 = vld [vmem:[#allocation2 + $0x48] sm:$0xff]  ;;  %v2209_v58 = vunpack.c.l.bf16 %v1783_v28  ;;  %v1743_v23 = vld [vmem:[%s5265_s15 + $0x410] sm:$0xff]  ;;  %v2165_v40 = vunpack.c.l.bf16 %v1761_v54 }
 0x1fc   : > { %2481 = vmatpush.msrb.mxu0 %v1999_v38  ;;  %2500 = vmatpush.msrb.mxu1 %v2033_v6  ;;  %v1767_v38 = vld [vmem:[%s5265_s15 + $0x4d0] sm:$0xff]  ;;  %v1782_v6 = vld [vmem:[%s5265_s15 + $0x548] sm:$0xff]  ;;  %v2143_v15 = vunpack.c.l.bf16 %v1750_v14  ;;  %v1792_v14 = vld [vmem:[%s5265_s15 + $0x598] sm:$0xff] }
 0x1fd   : > { %2521 = vmatpush.msrb.mxu2 %v2063_v19  ;;  %2540 = vmatpush.msrb.mxu3 %v2097_v2  ;;  %v1799_v19 = vld [vmem:[%s5265_s15 + $0x5d0] sm:$0xff]  ;;  %v1749_v2 = vld [vmem:[%s5265_s15 + $0x440] sm:$0xff]  ;;  %v2207_v11 = vunpack.c.l.bf16 %v1782_v6  ;;  %v1774_v6 = vld [vmem:[%s5265_s15 + $0x508] sm:$0xff] }
 0x1fe   : > { %2482 = vmatpush.msrb.mxu0 %v1997_v26  ;;  %2501 = vmatpush.msrb.mxu1 %v2031_v48  ;;  %v1602_v26 = vld [vmem:[#allocation2 + $0x68] sm:$0xff]  ;;  %v2177_v48 = vunpack.c.l.bf16 %v1767_v38  ;;  %v2141_v32 = vunpack.c.l.bf16 %v1749_v2  ;;  %v1775_v28 = vld [vmem:[%s5265_s15 + $0x510] sm:$0xff]  ;;  %v1741_v2 = vld [vmem:[%s5265_s15 + $0x400] sm:$0xff] }
 0x1ff   : > { %2522 = vmatpush.msrb.mxu2 %v2061_v31  ;;  %2541 = vmatpush.msrb.mxu3 %v2095_v51  ;;  %v1798_v31 = vld [vmem:[%s5265_s15 + $0x5c8] sm:$0xff]  ;;  %v1748_v51 = vld [vmem:[%s5265_s15 + $0x438] sm:$0xff]  ;;  %v1759_v38 = vld [vmem:[%s5265_s15 + $0x490] sm:$0xff] }
 0x200   : > { %2403 = vmatmul.f32.vlgmr.msra.gmra.mxu0 %v1597_v63  ;;  %2443 = vmatmul.f32.vlgmr.msra.gmra.mxu2 %v1599_v20  ;;  %v2241_v63 = vunpack.c.l.bf16 %v1799_v19  ;;  %v1765_v20 = vld [vmem:[%s5265_s15 + $0x4c0] sm:$0xff]  ;;  %v2139_v17 = vunpack.c.l.bf16 %v1748_v51  ;;  %v1791_v19 = vld [vmem:[%s5265_s15 + $0x590] sm:$0xff]  ;;  %v1834_v57 = vld [vmem:[%s5265_s15 + $0x6e8] sm:$0xff] }
 0x201   : > { %2547 = vmatpush.msra.mxu0 %v2155_v0  ;;  %2587 = vmatpush.msra.mxu2 %v2219_v4  ;;  %v1780_v0 = vld [vmem:[%s5265_s15 + $0x538] sm:$0xff]  ;;  %v2175_v4 = vunpack.c.l.bf16 %v1766_v21  ;;  %v2225_v51 = vunpack.c.l.bf16 %v1791_v19  ;;  %v1866_v54 = vld [vmem:[%s5265_s15 + $0x7e8] sm:$0xff]  ;;  %v1831_v19 = vld [vmem:[%s5265_s15 + $0x6d0] sm:$0xff] }
 0x202   : > { %2502 = vmatpush.msrb.mxu1 %v2029_v42  ;;  %2542 = vmatpush.msrb.mxu3 %v2093_v37  ;;  %v2205_v42 = vunpack.c.l.bf16 %v1781_v39  ;;  %v2239_v37 = vunpack.c.l.bf16 %v1798_v31  ;;  %v2203_v7 = vunpack.c.l.bf16 %v1780_v0  ;;  %v1758_v39 = vld [vmem:[%s5265_s15 + $0x488] sm:$0xff] }
 0x203   : > { %2423 = vmatmul.f32.vlgmr.msra.gmra.mxu1 %v1598_v16  ;;  %2463 = vmatmul.f32.vlgmr.msra.gmra.mxu3 %v1600_v13  ;;  %v1779_v16 = vld [vmem:[%s5265_s15 + $0x530] sm:$0xff]  ;;  %v1746_v13 = vld [vmem:[%s5265_s15 + $0x428] sm:$0xff] }
 0x204   : > { %2548 = vmatpush.msra.mxu0 %v2153_v43  ;;  %2567 = vmatpush.msra.mxu1 %v2187_v45  ;;  %v2173_v43 = vunpack.c.l.bf16 %v1765_v20  ;;  %v2237_v45 = vunpack.c.l.bf16 %v1797_v59  ;;  %v1790_v31 = vld [vmem:[%s5265_s15 + $0x588] sm:$0xff]  ;;  %v2159_v20 = vunpack.c.l.bf16 %v1758_v39  ;;  %v1863_v39 = vld [vmem:[%s5265_s15 + $0x7d0] sm:$0xff] }
 0x205   : > { %2588 = vmatpush.msra.mxu2 %v2217_v25  ;;  %2607 = vmatpush.msra.mxu3 %v2251_v9  ;;  %v2137_v25 = vunpack.c.l.bf16 %v1747_v36  ;;  %v2171_v9 = vunpack.c.l.bf16 %v1764_v41  ;;  %v2223_v59 = vunpack.c.l.bf16 %v1790_v31  ;;  %v1789_v36 = vld [vmem:[%s5265_s15 + $0x580] sm:$0xff]  ;;  %v1819_v41 = vld [vmem:[%s5265_s15 + $0x670] sm:$0xff]  ;;  %v1830_v31 = vld [vmem:[%s5265_s15 + $0x6c8] sm:$0xff] }
 0x206   : > { %2549 = vmatpush.msra.mxu0 %v2151_v61  ;;  %2568 = vmatpush.msra.mxu1 %v2185_v35  ;;  %v2201_v61 = vunpack.c.l.bf16 %v1779_v16  ;;  %v2235_v35 = vunpack.c.l.bf16 %v1796_v33  ;;  %v1607_v16 = vld [vmem:[#allocation2 + $0x10] sm:$0xff]  ;;  %v1836_v33 = vld [vmem:[%s5265_s15 + $0x6f8] sm:$0xff] }
 0x207   : > { %2589 = vmatpush.msra.mxu2 %v2215_v52  ;;  %2608 = vmatpush.msra.mxu3 %v2249_v46  ;;  %v2135_v52 = vunpack.c.l.bf16 %v1746_v13  ;;  %v1777_v46 = vld [vmem:[%s5265_s15 + $0x520] sm:$0xff]  ;;  %v1851_v13 = vld [vmem:[%s5265_s15 + $0x770] sm:$0xff] }
 0x208   : > { %2550 = vmatpush.msra.mxu0 %v2149_v12  ;;  %2569 = vmatpush.msra.mxu1 %v2183_v27  ;;  %v2169_v12 = vunpack.c.l.bf16 %v1763_v53  ;;  %v1744_v27 = vld [vmem:[%s5265_s15 + $0x418] sm:$0xff]  ;;  %v1818_v53 = vld [vmem:[%s5265_s15 + $0x668] sm:$0xff] }
 0x209   : > { %2590 = vmatpush.msra.mxu2 %v2213_v1  ;;  %2609 = vmatpush.msra.mxu3 %v2247_v47  ;;  %v2233_v1 = vunpack.c.l.bf16 %v1795_v10  ;;  %v1776_v47 = vld [vmem:[%s5265_s15 + $0x518] sm:$0xff]  ;;  %v1850_v10 = vld [vmem:[%s5265_s15 + $0x768] sm:$0xff] }
 0x20a   : > { %2523 = vmatmul.f32.vlgmr.msrb.gmra.mxu2 %v1603_v8  ;;  %2551 = vmatpush.msra.mxu0 %v2147_v30  ;;  %v2167_v8 = vunpack.c.l.bf16 %v1762_v62  ;;  %v2197_v30 = vunpack.c.l.bf16 %v1777_v46  ;;  %v1867_v62 = vld [vmem:[%s5265_s15 + $0x7f0] sm:$0xff]  ;;  %v1817_v46 = vld [vmem:[%s5265_s15 + $0x660] sm:$0xff] }
 0x20b   : > { %2570 = vmatpush.msra.mxu1 %v2181_v44  ;;  %2591 = vmatpush.msra.mxu2 %v2211_v60  ;;  %v1793_v44 = vld [vmem:[%s5265_s15 + $0x5a0] sm:$0xff]  ;;  %v2131_v60 = vunpack.c.l.bf16 %v1744_v27 }
 0x20c   : > { %2610 = vmatpush.msra.mxu3 %v2245_v50  ;;  %2483 = vmatmul.f32.vlgmr.msrb.gmra.mxu0 %v1601_v56  ;;  %v1760_v50 = vld [vmem:[%s5265_s15 + $0x498] sm:$0xff]  ;;  %v2195_v56 = vunpack.c.l.bf16 %v1776_v47  ;;  %v1849_v27 = vld [vmem:[%s5265_s15 + $0x760] sm:$0xff] }
 0x20d   : > { %2543 = vmatmul.f32.vlgmr.msrb.gmra.mxu3 %v1604_v5  ;;  %2552 = vmatpush.msra.mxu0 %v2145_v29  ;;  %v1742_v5 = vld [vmem:[%s5265_s15 + $0x408] sm:$0xff]  ;;  %v2229_v29 = vunpack.c.l.bf16 %v1793_v44  ;;  %v1816_v47 = vld [vmem:[%s5265_s15 + $0x658] sm:$0xff]  ;;  %v1833_v44 = vld [vmem:[%s5265_s15 + $0x6e0] sm:$0xff] }
 0x20e   : > { %2571 = vmatpush.msra.mxu1 %v2179_v24  ;;  %2592 = vmatpush.msra.mxu2 %v2209_v58  ;;  %v2129_v24 = vunpack.c.l.bf16 %v1743_v23  ;;  %v2163_v58 = vunpack.c.l.bf16 %v1760_v50  ;;  %v2127_v21 = vunpack.c.l.bf16 %v1742_v5  ;;  %v1848_v23 = vld [vmem:[%s5265_s15 + $0x758] sm:$0xff]  ;;  %v1865_v50 = vld [vmem:[%s5265_s15 + $0x7e0] sm:$0xff]  ;;  %v1847_v5 = vld [vmem:[%s5265_s15 + $0x750] sm:$0xff] }
 0x20f   : > { %2611 = vmatpush.msra.mxu3 %v2243_v18  ;;  %2503 = vmatmul.f32.vlgmr.msrb.gmra.mxu1 %v1602_v26  ;;  %v2193_v18 = vunpack.c.l.bf16 %v1775_v28  ;;  %v1773_v26 = vld [vmem:[%s5265_s15 + $0x500] sm:$0xff]  ;;  %v1815_v28 = vld [vmem:[%s5265_s15 + $0x650] sm:$0xff] }
 0x210   : > { %2553 = vmatpush.msra.mxu0 %v2143_v15  ;;  %2572 = vmatpush.msra.mxu1 %v2177_v48  ;;  %v2227_v15 = vunpack.c.l.bf16 %v1792_v14  ;;  %v2161_v48 = vunpack.c.l.bf16 %v1759_v38  ;;  %v2189_v0 = vunpack.c.l.bf16 %v1773_v26  ;;  %v1832_v14 = vld [vmem:[%s5265_s15 + $0x6d8] sm:$0xff]  ;;  %v1813_v26 = vld [vmem:[%s5265_s15 + $0x640] sm:$0xff] }
 0x211   : > { %2593 = vmatpush.msra.mxu2 %v2207_v11  ;;  %2612 = vmatpush.msra.mxu3 %v2241_v63  ;;  %v2191_v11 = vunpack.c.l.bf16 %v1774_v6  ;;  %v2125_v63 = vunpack.c.l.bf16 %v1741_v2  ;;  %v1864_v38 = vld [vmem:[%s5265_s15 + $0x7d8] sm:$0xff]  ;;  %v1814_v6 = vld [vmem:[%s5265_s15 + $0x648] sm:$0xff] }
 0x212   : > { %2554 = vmatpush.msra.mxu0 %v2141_v32  ;;  %2573 = vmatpush.msra.mxu1 %v2175_v4  ;;  %v1820_v32 = vld [vmem:[%s5265_s15 + $0x678] sm:$0xff]  ;;  %v1846_v2 = vld [vmem:[%s5265_s15 + $0x748] sm:$0xff] }
 0x213   : > { %2594 = vmatpush.msra.mxu2 %v2205_v42  ;;  %2613 = vmatpush.msra.mxu3 %v2239_v37  ;;  %v1852_v4 = vld [vmem:[%s5265_s15 + $0x778] sm:$0xff]  ;;  %v1757_v42 = vld [vmem:[%s5265_s15 + $0x480] sm:$0xff]  ;;  %v1605_v37 = vld [vmem:[#allocation2 + $0x40] sm:$0xff] }
 0x214   : > { %2555 = vmatpush.msra.mxu0 %v2139_v17  ;;  %2574 = vmatpush.msra.mxu1 %v2173_v43  ;;  %v2283_v17 = vunpack.c.l.bf16 %v1820_v32  ;;  %v2347_v43 = vunpack.c.l.bf16 %v1852_v4  ;;  %v2335_v32 = vunpack.c.l.bf16 %v1846_v2  ;;  %v2369_v4 = vunpack.c.l.bf16 %v1863_v39  ;;  %v1838_v2 = vld [vmem:[%s5265_s15 + $0x708] sm:$0xff]  ;;  %v1855_v39 = vld [vmem:[%s5265_s15 + $0x790] sm:$0xff] }
 0x215   : > { %2595 = vmatpush.msra.mxu2 %v2203_v7  ;;  %2614 = vmatpush.msra.mxu3 %v2237_v45  ;;  %v2157_v7 = vunpack.c.l.bf16 %v1757_v42  ;;  %v2221_v45 = vunpack.c.l.bf16 %v1789_v36  ;;  %v2269_v42 = vunpack.c.l.bf16 %v1813_v26  ;;  %v1844_v36 = vld [vmem:[%s5265_s15 + $0x738] sm:$0xff]  ;;  %v1805_v26 = vld [vmem:[%s5265_s15 + $0x600] sm:$0xff] }
 0x216   : > { %2556 = vmatpush.msra.mxu0 %v2137_v25  ;;  %2575 = vmatpush.msra.mxu1 %v2171_v9  ;;  %v1868_v25 = vld [vmem:[%s5265_s15 + $0x7f8] sm:$0xff]  ;;  %v2281_v9 = vunpack.c.l.bf16 %v1819_v41  ;;  %v1861_v41 = vld [vmem:[%s5265_s15 + $0x7c0] sm:$0xff] }
 0x217   : > { %2596 = vmatpush.msra.mxu2 %v2201_v61  ;;  %2615 = vmatpush.msra.mxu3 %v2235_v35  ;;  %v1835_v61 = vld [vmem:[%s5265_s15 + $0x6f0] sm:$0xff]  ;;  %v2315_v35 = vunpack.c.l.bf16 %v1836_v33  ;;  %v1828_v33 = vld [vmem:[%s5265_s15 + $0x6b8] sm:$0xff] }
 0x218   : > { %2557 = vmatpush.msra.mxu0 %v2135_v52  ;;  %2576 = vmatpush.msra.mxu1 %v2169_v12  ;;  %v2345_v52 = vunpack.c.l.bf16 %v1851_v13  ;;  %v2379_v12 = vunpack.c.l.bf16 %v1868_v25  ;;  %v1843_v13 = vld [vmem:[%s5265_s15 + $0x730] sm:$0xff]  ;;  %v2331_v25 = vunpack.c.l.bf16 %v1844_v36  ;;  %v1821_v36 = vld [vmem:[%s5265_s15 + $0x680] sm:$0xff] }
 0x219   : > { %2597 = vmatpush.msra.mxu2 %v2199_v22  ;;  %2616 = vmatpush.msra.mxu3 %v2233_v1  ;;  %v2279_v22 = vunpack.c.l.bf16 %v1818_v53  ;;  %v2313_v1 = vunpack.c.l.bf16 %v1835_v61  ;;  %v1860_v53 = vld [vmem:[%s5265_s15 + $0x7b8] sm:$0xff] }
 0x21a   : > { %2558 = vmatpush.msra.mxu0 %v2133_v34  ;;  %2577 = vmatpush.msra.mxu1 %v2167_v8  ;;  %v2343_v34 = vunpack.c.l.bf16 %v1850_v10  ;;  %v2377_v8 = vunpack.c.l.bf16 %v1867_v62  ;;  %v1827_v10 = vld [vmem:[%s5265_s15 + $0x6b0] sm:$0xff] }
 0x21b   : > { %2598 = vmatpush.msra.mxu2 %v2197_v30  ;;  %2617 = vmatpush.msra.mxu3 %v2231_v55  ;;  %v2277_v30 = vunpack.c.l.bf16 %v1817_v46  ;;  %v2311_v55 = vunpack.c.l.bf16 %v1834_v57  ;;  %v1859_v62 = vld [vmem:[%s5265_s15 + $0x7b0] sm:$0xff]  ;;  %v1809_v46 = vld [vmem:[%s5265_s15 + $0x620] sm:$0xff]  ;;  %v1826_v57 = vld [vmem:[%s5265_s15 + $0x6a8] sm:$0xff] }
 0x21c   : > { %2559 = vmatpush.msra.mxu0 %v2131_v60  ;;  %2578 = vmatpush.msra.mxu1 %v2165_v40  ;;  %v2341_v60 = vunpack.c.l.bf16 %v1849_v27  ;;  %v2375_v40 = vunpack.c.l.bf16 %v1866_v54  ;;  %v1841_v27 = vld [vmem:[%s5265_s15 + $0x720] sm:$0xff]  ;;  %v1858_v54 = vld [vmem:[%s5265_s15 + $0x7a8] sm:$0xff] }
 0x21d   : > { %2599 = vmatpush.msra.mxu2 %v2195_v56  ;;  %2618 = vmatpush.msra.mxu3 %v2229_v29  ;;  %v2275_v56 = vunpack.c.l.bf16 %v1816_v47  ;;  %v2309_v29 = vunpack.c.l.bf16 %v1833_v44  ;;  %v1808_v47 = vld [vmem:[%s5265_s15 + $0x618] sm:$0xff]  ;;  %v1825_v44 = vld [vmem:[%s5265_s15 + $0x6a0] sm:$0xff] }
 0x21e   : > { %2560 = vmatpush.msra.mxu0 %v2129_v24  ;;  %2579 = vmatpush.msra.mxu1 %v2163_v58  ;;  %v2339_v24 = vunpack.c.l.bf16 %v1848_v23  ;;  %v2373_v58 = vunpack.c.l.bf16 %v1865_v50  ;;  %v1840_v23 = vld [vmem:[%s5265_s15 + $0x718] sm:$0xff]  ;;  %v1857_v50 = vld [vmem:[%s5265_s15 + $0x7a0] sm:$0xff] }
 0x21f   : > { %2600 = vmatpush.msra.mxu2 %v2193_v18  ;;  %2619 = vmatpush.msra.mxu3 %v2227_v15  ;;  %v2273_v18 = vunpack.c.l.bf16 %v1815_v28  ;;  %v2307_v15 = vunpack.c.l.bf16 %v1832_v14  ;;  %v1807_v28 = vld [vmem:[%s5265_s15 + $0x610] sm:$0xff]  ;;  %v1824_v14 = vld [vmem:[%s5265_s15 + $0x698] sm:$0xff] }
 0x220   : > { %2561 = vmatpush.msra.mxu0 %v2127_v21  ;;  %2580 = vmatpush.msra.mxu1 %v2161_v48  ;;  %v2337_v21 = vunpack.c.l.bf16 %v1847_v5  ;;  %v2371_v48 = vunpack.c.l.bf16 %v1864_v38  ;;  %v1839_v5 = vld [vmem:[%s5265_s15 + $0x710] sm:$0xff]  ;;  %v1856_v38 = vld [vmem:[%s5265_s15 + $0x798] sm:$0xff] }
 0x221   : > { %2601 = vmatpush.msra.mxu2 %v2191_v11  ;;  %2620 = vmatpush.msra.mxu3 %v2225_v51  ;;  %v2271_v11 = vunpack.c.l.bf16 %v1814_v6  ;;  %v1845_v51 = vld [vmem:[%s5265_s15 + $0x740] sm:$0xff]  ;;  %v1806_v6 = vld [vmem:[%s5265_s15 + $0x608] sm:$0xff] }
 0x222   : > { %2562 = vmatpush.msra.mxu0 %v2125_v63  ;;  %2581 = vmatpush.msra.mxu1 %v2159_v20  ;;  %v2305_v63 = vunpack.c.l.bf16 %v1831_v19  ;;  %v1862_v20 = vld [vmem:[%s5265_s15 + $0x7c8] sm:$0xff]  ;;  %v1823_v19 = vld [vmem:[%s5265_s15 + $0x690] sm:$0xff] }
 0x223   : > { %2602 = vmatpush.msra.mxu2 %v2189_v0  ;;  %2621 = vmatpush.msra.mxu3 %v2223_v59  ;;  %v1812_v0 = vld [vmem:[%s5265_s15 + $0x638] sm:$0xff]  ;;  %v1829_v59 = vld [vmem:[%s5265_s15 + $0x6c0] sm:$0xff] }
 0x224   : > { %2563 = vmatmul.f32.vlgmr.msra.gmra.mxu0 %v1605_v37  ;;  %2603 = vmatmul.f32.vlgmr.msra.gmra.mxu2 %v1607_v16  ;;  %v2303_v37 = vunpack.c.l.bf16 %v1830_v31  ;;  %v1811_v16 = vld [vmem:[%s5265_s15 + $0x630] sm:$0xff]  ;;  %v1822_v31 = vld [vmem:[%s5265_s15 + $0x688] sm:$0xff] }
 0x225   : > { %2627 = vmatpush.msrb.mxu0 %v2283_v17  ;;  %2667 = vmatpush.msrb.mxu2 %v2347_v43  ;;  %v2333_v17 = vunpack.c.l.bf16 %v1845_v51  ;;  %v2367_v43 = vunpack.c.l.bf16 %v1862_v20  ;;  %v2265_v61 = vunpack.c.l.bf16 %v1811_v16  ;;  %v1837_v51 = vld [vmem:[%s5265_s15 + $0x700] sm:$0xff]  ;;  %v1854_v20 = vld [vmem:[%s5265_s15 + $0x788] sm:$0xff] }
 0x226   : > { %2582 = vmatpush.msra.mxu1 %v2157_v7  ;;  %2622 = vmatpush.msra.mxu3 %v2221_v45  ;;  %v2267_v7 = vunpack.c.l.bf16 %v1812_v0  ;;  %v2301_v45 = vunpack.c.l.bf16 %v1829_v59  ;;  %v2353_v0 = vunpack.c.l.bf16 %v1855_v39  ;;  %v2317_v59 = vunpack.c.l.bf16 %v1837_v51  ;;  %v4563_v39 = vld [vmem:[%s5265_s15 + $0x1d8] sm:$0xff] }
 0x227   : > { %2583 = vmatmul.f32.vlgmr.msra.gmra.mxu1 %v1606_v49  ;;  %2623 = vmatmul.f32.vlgmr.msra.gmra.mxu3 %v1608_v3  ;;  %v1810_v49 = vld [vmem:[%s5265_s15 + $0x628] sm:$0xff] }
 0x228   : > { %2628 = vmatpush.msrb.mxu0 %v2281_v9  ;;  %2647 = vmatpush.msrb.mxu1 %v2315_v35  ;;  %v2365_v9 = vunpack.c.l.bf16 %v1861_v41  ;;  %v1842_v3 = vld [vmem:[%s5265_s15 + $0x728] sm:$0xff]  ;;  %v2299_v35 = vunpack.c.l.bf16 %v1828_v33  ;;  %v4542_v41 = vld [vmem:[%s5265_s15 + $0x78] sm:$0xff] }
 0x229   : > { %2668 = vmatpush.msrb.mxu2 %v2345_v52  ;;  %2687 = vmatpush.msrb.mxu3 %v2379_v12  ;;  %v2329_v52 = vunpack.c.l.bf16 %v1843_v13  ;;  %v2363_v12 = vunpack.c.l.bf16 %v1860_v53  ;;  %v1900_v16 = vunpack.c.h.bf16 %v4542_v41  ;;  %v1611_v13 = vld [vmem:[#allocation2 + $0x78] sm:$0xff]  ;;  %v4544_v53 = vld [vmem:[%s5265_s15 + $0x70] sm:$0xff] }
 0x22a   : > { %2629 = vmatpush.msrb.mxu0 %v2279_v22  ;;  %2648 = vmatpush.msrb.mxu1 %v2313_v1  ;;  %v2263_v22 = vunpack.c.l.bf16 %v1810_v49  ;;  %v2297_v1 = vunpack.c.l.bf16 %v1827_v10  ;;  %v1898_v49 = vunpack.c.h.bf16 %v4544_v53  ;;  %v4571_v41 = vld [vmem:[%s5265_s15 + $0x1c8] sm:$0xff]  ;;  %v4575_v53 = vld [vmem:[%s5265_s15 + $0x1c0] sm:$0xff] }
 0x22b   : > { %2669 = vmatpush.msrb.mxu2 %v2343_v34  ;;  %2688 = vmatpush.msrb.mxu3 %v2377_v8  ;;  %v2327_v34 = vunpack.c.l.bf16 %v1842_v3  ;;  %v2361_v8 = vunpack.c.l.bf16 %v1859_v62  ;;  %v4546_v3 = vld [vmem:[%s5265_s15 + $0x170] sm:$0xff]  ;;  %v4547_v62 = vld [vmem:[%s5265_s15 + $0x1f8] sm:$0xff] }
 0x22c   : > { %2630 = vmatpush.msrb.mxu0 %v2277_v30  ;;  %2649 = vmatpush.msrb.mxu1 %v2311_v55  ;;  %v2261_v30 = vunpack.c.l.bf16 %v1809_v46  ;;  %v2295_v55 = vunpack.c.l.bf16 %v1826_v57  ;;  %v1996_v46 = vunpack.c.h.bf16 %v4547_v62  ;;  %v4549_v57 = vld [vmem:[%s5265_s15 + $0xf0] sm:$0xff]  ;;  %v4579_v62 = vld [vmem:[%s5265_s15 + $0x1b8] sm:$0xff] }
 0x22d   : > { %2670 = vmatpush.msrb.mxu2 %v2341_v60  ;;  %2689 = vmatpush.msrb.mxu3 %v2375_v40  ;;  %v2325_v60 = vunpack.c.l.bf16 %v1841_v27  ;;  %v2359_v40 = vunpack.c.l.bf16 %v1858_v54  ;;  %v1930_v27 = vunpack.c.h.bf16 %v4549_v57  ;;  %v4551_v54 = vld [vmem:[%s5265_s15 + $0x1f0] sm:$0xff] }
 0x22e   : > { %2631 = vmatpush.msrb.mxu0 %v2275_v56  ;;  %2650 = vmatpush.msrb.mxu1 %v2309_v29  ;;  %v2259_v56 = vunpack.c.l.bf16 %v1808_v47  ;;  %v2293_v29 = vunpack.c.l.bf16 %v1825_v44  ;;  %v1994_v47 = vunpack.c.h.bf16 %v4551_v54  ;;  %v4553_v44 = vld [vmem:[%s5265_s15 + $0xe8] sm:$0xff]  ;;  %v4581_v57 = vld [vmem:[%s5265_s15 + $0xb0] sm:$0xff] }
 0x22f   : > { %2671 = vmatpush.msrb.mxu2 %v2339_v24  ;;  %2690 = vmatpush.msrb.mxu3 %v2373_v58  ;;  %v2323_v24 = vunpack.c.l.bf16 %v1840_v23  ;;  %v2357_v58 = vunpack.c.l.bf16 %v1857_v50  ;;  %v1928_v23 = vunpack.c.h.bf16 %v4553_v44  ;;  %v4555_v50 = vld [vmem:[%s5265_s15 + $0x1e8] sm:$0xff]  ;;  %v4583_v54 = vld [vmem:[%s5265_s15 + $0x1b0] sm:$0xff] }
 0x230   : > { %2632 = vmatpush.msrb.mxu0 %v2273_v18  ;;  %2651 = vmatpush.msrb.mxu1 %v2307_v15  ;;  %v2257_v18 = vunpack.c.l.bf16 %v1807_v28  ;;  %v2291_v15 = vunpack.c.l.bf16 %v1824_v14  ;;  %v1992_v28 = vunpack.c.h.bf16 %v4555_v50  ;;  %v4557_v14 = vld [vmem:[%s5265_s15 + $0xe0] sm:$0xff]  ;;  %v4585_v44 = vld [vmem:[%s5265_s15 + $0xa8] sm:$0xff] }
 0x231   : > { %2672 = vmatpush.msrb.mxu2 %v2337_v21  ;;  %2691 = vmatpush.msrb.mxu3 %v2371_v48  ;;  %v2321_v21 = vunpack.c.l.bf16 %v1839_v5  ;;  %v2355_v48 = vunpack.c.l.bf16 %v1856_v38  ;;  %v1926_v5 = vunpack.c.h.bf16 %v4557_v14  ;;  %v4559_v38 = vld [vmem:[%s5265_s15 + $0x1e0] sm:$0xff]  ;;  %v4587_v50 = vld [vmem:[%s5265_s15 + $0x1a8] sm:$0xff] }
 0x232   : > { %2633 = vmatpush.msrb.mxu0 %v2271_v11  ;;  %2652 = vmatpush.msrb.mxu1 %v2305_v63  ;;  %v2255_v11 = vunpack.c.l.bf16 %v1806_v6  ;;  %v2289_v63 = vunpack.c.l.bf16 %v1823_v19  ;;  %v1990_v6 = vunpack.c.h.bf16 %v4559_v38  ;;  %v4561_v19 = vld [vmem:[%s5265_s15 + $0xd8] sm:$0xff]  ;;  %v4589_v14 = vld [vmem:[%s5265_s15 + $0xa0] sm:$0xff] }
 0x233   : > { %2673 = vmatpush.msrb.mxu2 %v2335_v32  ;;  %2692 = vmatpush.msrb.mxu3 %v2369_v4  ;;  %v2319_v32 = vunpack.c.l.bf16 %v1838_v2  ;;  %v2253_v4 = vunpack.c.l.bf16 %v1805_v26  ;;  %v1924_v2 = vunpack.c.h.bf16 %v4561_v19  ;;  %v1988_v26 = vunpack.c.h.bf16 %v4563_v39  ;;  %v4591_v38 = vld [vmem:[%s5265_s15 + $0x1a0] sm:$0xff]  ;;  %v4593_v19 = vld [vmem:[%s5265_s15 + $0x98] sm:$0xff] }
 0x234   : > { %2634 = vmatpush.msrb.mxu0 %v2269_v42  ;;  %2653 = vmatpush.msrb.mxu1 %v2303_v37  ;;  %v2287_v42 = vunpack.c.l.bf16 %v1822_v31  ;;  %v2351_v37 = vunpack.c.l.bf16 %v1854_v20  ;;  %v4565_v31 = vld [vmem:[%s5265_s15 + $0xd0] sm:$0xff]  ;;  %v4595_v39 = vld [vmem:[%s5265_s15 + $0x198] sm:$0xff] }
 0x235   : > { %2674 = vmatpush.msrb.mxu2 %v2333_v17  ;;  %2693 = vmatpush.msrb.mxu3 %v2367_v43  ;;  %v1853_v17 = vld [vmem:[%s5265_s15 + $0x780] sm:$0xff]  ;;  %v1609_v43 = vld [vmem:[#allocation2 + $0x60] sm:$0xff]  ;;  %v1922_v51 = vunpack.c.h.bf16 %v4565_v31 }
 0x236   : > { %2635 = vmatpush.msrb.mxu0 %v2267_v7  ;;  %2654 = vmatpush.msrb.mxu1 %v2301_v45  ;;  %v4543_v7 = vld [vmem:[%s5265_s15 + $0x178] sm:$0xff]  ;;  %v2285_v45 = vunpack.c.l.bf16 %v1821_v36  ;;  %v4567_v20 = vld [vmem:[%s5265_s15 + $0x1d0] sm:$0xff] }
 0x237   : > { %2675 = vmatpush.msrb.mxu2 %v2331_v25  ;;  %2694 = vmatpush.msrb.mxu3 %v2365_v9  ;;  %v1964_v33 = vunpack.c.h.bf16 %v4543_v7  ;;  %v2349_v25 = vunpack.c.l.bf16 %v1853_v17  ;;  %v1610_v9 = vld [vmem:[#allocation2 + $0x70] sm:$0xff]  ;;  %v4597_v31 = vld [vmem:[%s5265_s15 + $0x90] sm:$0xff] }
 0x238   : > { %2636 = vmatpush.msrb.mxu0 %v2265_v61  ;;  %2655 = vmatpush.msrb.mxu1 %v2299_v35  ;;  %v4545_v61 = vld [vmem:[%s5265_s15 + $0xf8] sm:$0xff]  ;;  %v1962_v35 = vunpack.c.h.bf16 %v4546_v3 }
 0x239   : > { %2676 = vmatpush.msrb.mxu2 %v2329_v52  ;;  %2695 = vmatpush.msrb.mxu3 %v2363_v12  ;;  %v1932_v10 = vunpack.c.h.bf16 %v4545_v61  ;;  %v1612_v52 = vld [vmem:[#allocation2 + $0x28] sm:$0xff]  ;;  %v4548_v12 = vld [vmem:[%s5265_s15 + $0x68] sm:$0xff] }
 0x23a   : > { %2637 = vmatpush.msrb.mxu0 %v2263_v22  ;;  %2656 = vmatpush.msrb.mxu1 %v2297_v1  ;;  %v1896_v22 = vunpack.c.h.bf16 %v4548_v12  ;;  %v4550_v1 = vld [vmem:[%s5265_s15 + $0x168] sm:$0xff] }
 0x23b   : > { %2677 = vmatpush.msrb.mxu2 %v2327_v34  ;;  %2696 = vmatpush.msrb.mxu3 %v2361_v8  ;;  %v1960_v34 = vunpack.c.h.bf16 %v4550_v1  ;;  %v4552_v8 = vld [vmem:[%s5265_s15 + $0x60] sm:$0xff]  ;;  %v4580_v12 = vld [vmem:[%s5265_s15 + $0x28] sm:$0xff] }
 0x23c   : > { %2638 = vmatpush.msrb.mxu0 %v2261_v30  ;;  %2657 = vmatpush.msrb.mxu1 %v2295_v55  ;;  %v1894_v30 = vunpack.c.h.bf16 %v4552_v8  ;;  %v4554_v55 = vld [vmem:[%s5265_s15 + $0x160] sm:$0xff]  ;;  %v4582_v1 = vld [vmem:[%s5265_s15 + $0x128] sm:$0xff] }
 0x23d   : > { %2678 = vmatpush.msrb.mxu2 %v2325_v60  ;;  %2697 = vmatpush.msrb.mxu3 %v2359_v40  ;;  %v1958_v60 = vunpack.c.h.bf16 %v4554_v55  ;;  %v4556_v40 = vld [vmem:[%s5265_s15 + $0x58] sm:$0xff]  ;;  %v4584_v8 = vld [vmem:[%s5265_s15 + $0x20] sm:$0xff] }
 0x23e   : > { %2639 = vmatpush.msrb.mxu0 %v2259_v56  ;;  %2658 = vmatpush.msrb.mxu1 %v2293_v29  ;;  %v1892_v56 = vunpack.c.h.bf16 %v4556_v40  ;;  %v4558_v29 = vld [vmem:[%s5265_s15 + $0x158] sm:$0xff]  ;;  %v4586_v55 = vld [vmem:[%s5265_s15 + $0x120] sm:$0xff] }
 0x23f   : > { %2679 = vmatpush.msrb.mxu2 %v2323_v24  ;;  %2698 = vmatpush.msrb.mxu3 %v2357_v58  ;;  %v1956_v24 = vunpack.c.h.bf16 %v4558_v29  ;;  %v4560_v58 = vld [vmem:[%s5265_s15 + $0x50] sm:$0xff]  ;;  %v4588_v40 = vld [vmem:[%s5265_s15 + $0x18] sm:$0xff] }
 0x240   : > { %2640 = vmatpush.msrb.mxu0 %v2257_v18  ;;  %2659 = vmatpush.msrb.mxu1 %v2291_v15  ;;  %v1890_v18 = vunpack.c.h.bf16 %v4560_v58  ;;  %v4562_v15 = vld [vmem:[%s5265_s15 + $0x150] sm:$0xff]  ;;  %v4590_v29 = vld [vmem:[%s5265_s15 + $0x118] sm:$0xff] }
 0x241   : > { %2680 = vmatpush.msrb.mxu2 %v2321_v21  ;;  %2699 = vmatpush.msrb.mxu3 %v2355_v48  ;;  %v1954_v21 = vunpack.c.h.bf16 %v4562_v15  ;;  %v4564_v48 = vld [vmem:[%s5265_s15 + $0x48] sm:$0xff]  ;;  %v4592_v58 = vld [vmem:[%s5265_s15 + $0x10] sm:$0xff] }
 0x242   : > { %2641 = vmatpush.msrb.mxu0 %v2255_v11  ;;  %2660 = vmatpush.msrb.mxu1 %v2289_v63  ;;  %v1888_v11 = vunpack.c.h.bf16 %v4564_v48  ;;  %v4566_v63 = vld [vmem:[%s5265_s15 + $0x148] sm:$0xff]  ;;  %v4594_v15 = vld [vmem:[%s5265_s15 + $0x110] sm:$0xff] }
 0x243   : > { %2681 = vmatpush.msrb.mxu2 %v2319_v32  ;;  %2700 = vmatpush.msrb.mxu3 %v2353_v0  ;;  %v1952_v32 = vunpack.c.h.bf16 %v4566_v63  ;;  %v1986_v0 = vunpack.c.h.bf16 %v4567_v20  ;;  %v4596_v48 = vld [vmem:[%s5265_s15 + $0x8] sm:$0xff]  ;;  %v4599_v20 = vld [vmem:[%s5265_s15 + $0x190] sm:$0xff] }
 0x244   : > { %2642 = vmatpush.msrb.mxu0 %v2253_v4  ;;  %2661 = vmatpush.msrb.mxu1 %v2287_v42  ;;  %v4568_v4 = vld [vmem:[%s5265_s15 + $0x40] sm:$0xff]  ;;  %v4598_v63 = vld [vmem:[%s5265_s15 + $0x108] sm:$0xff] }
 0x245   : > { %2682 = vmatpush.msrb.mxu2 %v2317_v59  ;;  %2701 = vmatpush.msrb.mxu3 %v2351_v37  ;;  %v1886_v42 = vunpack.c.h.bf16 %v4568_v4  ;;  %v4569_v59 = vld [vmem:[%s5265_s15 + $0xc8] sm:$0xff]  ;;  %v4570_v37 = vld [vmem:[%s5265_s15 + $0x140] sm:$0xff] }
 0x246   : > { %2643 = vmatmul.f32.vlgmr.msrb.gmra.mxu0 %v1609_v43  ;;  %2683 = vmatmul.f32.vlgmr.msrb.gmra.mxu2 %v1611_v13  ;;  %v1920_v36 = vunpack.c.h.bf16 %v4569_v59  ;;  %v1950_v17 = vunpack.c.h.bf16 %v4570_v37  ;;  %v4572_v43 = vld [vmem:[%s5265_s15 + $0x38] sm:$0xff]  ;;  %v4600_v4 = vld [vmem:[%s5265_s15] sm:$0xff]  ;;  %v4601_v59 = vld [vmem:[%s5265_s15 + $0x88] sm:$0xff] }
 0x247   : > { %2707 = vmatpush.msra.mxu0 %v1900_v16  ;;  %2747 = vmatpush.msra.mxu2 %v1964_v33  ;;  %v1984_v16 = vunpack.c.h.bf16 %v4571_v41  ;;  %v1884_v7 = vunpack.c.h.bf16 %v4572_v43  ;;  %v4573_v33 = vld [vmem:[%s5265_s15 + $0xc0] sm:$0xff]  ;;  %v4603_v41 = vld [vmem:[%s5265_s15 + $0x188] sm:$0xff]  ;;  %v4604_v43 = vld [vmem:[%s5265_s15 + $0x278] sm:$0xff] }
 0x248   : > { %2662 = vmatpush.msrb.mxu1 %v2285_v45  ;;  %2702 = vmatpush.msrb.mxu3 %v2349_v25  ;;  %v1918_v13 = vunpack.c.h.bf16 %v4573_v33  ;;  %v4574_v45 = vld [vmem:[%s5265_s15 + $0x138] sm:$0xff]  ;;  %v4602_v37 = vld [vmem:[%s5265_s15 + $0x100] sm:$0xff] }
 0x249   : > { %2663 = vmatmul.f32.vlgmr.msrb.gmra.mxu1 %v1610_v9  ;;  %2703 = vmatmul.f32.vlgmr.msrb.gmra.mxu3 %v1612_v52  ;;  %v1948_v25 = vunpack.c.h.bf16 %v4574_v45  ;;  %v4576_v9 = vld [vmem:[%s5265_s15 + $0x30] sm:$0xff]  ;;  %v4605_v33 = vld [vmem:[%s5265_s15 + $0x378] sm:$0xff]  ;;  %v4606_v45 = vld [vmem:[%s5265_s15 + $0x80] sm:$0xff] }
 0x24a   : > { %2708 = vmatpush.msra.mxu0 %v1898_v49  ;;  %2727 = vmatpush.msra.mxu1 %v1932_v10  ;;  %v1982_v49 = vunpack.c.h.bf16 %v4575_v53  ;;  %v1882_v61 = vunpack.c.h.bf16 %v4576_v9  ;;  %v4577_v10 = vld [vmem:[%s5265_s15 + $0xb8] sm:$0xff]  ;;  %v4607_v53 = vld [vmem:[%s5265_s15 + $0x180] sm:$0xff]  ;;  %v4608_v9 = vld [vmem:[%s5265_s15 + $0x270] sm:$0xff] }
 0x24b   : > { %2748 = vmatpush.msra.mxu2 %v1962_v35  ;;  %2767 = vmatpush.msra.mxu3 %v1996_v46  ;;  %v1916_v3 = vunpack.c.h.bf16 %v4577_v10  ;;  %v4578_v35 = vld [vmem:[%s5265_s15 + $0x130] sm:$0xff]  ;;  %v1980_v46 = vunpack.c.h.bf16 %v4579_v62  ;;  %v4609_v10 = vld [vmem:[%s5265_s15 + $0x2f8] sm:$0xff] }
 0x24c   : > { %2709 = vmatpush.msra.mxu0 %v1896_v22  ;;  %2728 = vmatpush.msra.mxu1 %v1930_v27  ;;  %v1946_v52 = vunpack.c.h.bf16 %v4578_v35  ;;  %v1880_v22 = vunpack.c.h.bf16 %v4580_v12  ;;  %v1914_v27 = vunpack.c.h.bf16 %v4581_v57  ;;  %v4610_v35 = vld [vmem:[%s5265_s15 + $0x370] sm:$0xff]  ;;  %v4611_v62 = vld [vmem:[%s5265_s15 + $0x3f8] sm:$0xff]  ;;  %v4612_v12 = vld [vmem:[%s5265_s15 + $0x268] sm:$0xff] }
 0x24d   : > { %2749 = vmatpush.msra.mxu2 %v1960_v34  ;;  %2768 = vmatpush.msra.mxu3 %v1994_v47  ;;  %v1944_v34 = vunpack.c.h.bf16 %v4582_v1  ;;  %v1978_v47 = vunpack.c.h.bf16 %v4583_v54  ;;  %v4613_v57 = vld [vmem:[%s5265_s15 + $0x2f0] sm:$0xff]  ;;  %v4614_v1 = vld [vmem:[%s5265_s15 + $0x368] sm:$0xff] }
 0x24e   : > { %2710 = vmatpush.msra.mxu0 %v1894_v30  ;;  %2729 = vmatpush.msra.mxu1 %v1928_v23  ;;  %v1878_v30 = vunpack.c.h.bf16 %v4584_v8  ;;  %v1912_v23 = vunpack.c.h.bf16 %v4585_v44  ;;  %v4615_v54 = vld [vmem:[%s5265_s15 + $0x3f0] sm:$0xff]  ;;  %v4616_v8 = vld [vmem:[%s5265_s15 + $0x260] sm:$0xff]  ;;  %v4617_v44 = vld [vmem:[%s5265_s15 + $0x2e8] sm:$0xff] }
 0x24f   : > { %2750 = vmatpush.msra.mxu2 %v1958_v60  ;;  %2769 = vmatpush.msra.mxu3 %v1992_v28  ;;  %v1942_v60 = vunpack.c.h.bf16 %v4586_v55  ;;  %v1976_v28 = vunpack.c.h.bf16 %v4587_v50  ;;  %v4618_v55 = vld [vmem:[%s5265_s15 + $0x360] sm:$0xff]  ;;  %v4619_v50 = vld [vmem:[%s5265_s15 + $0x3e8] sm:$0xff] }
 0x250   : > { %2711 = vmatpush.msra.mxu0 %v1892_v56  ;;  %2730 = vmatpush.msra.mxu1 %v1926_v5  ;;  %v1876_v56 = vunpack.c.h.bf16 %v4588_v40  ;;  %v1910_v5 = vunpack.c.h.bf16 %v4589_v14  ;;  %v4620_v40 = vld [vmem:[%s5265_s15 + $0x258] sm:$0xff]  ;;  %v4621_v14 = vld [vmem:[%s5265_s15 + $0x2e0] sm:$0xff] }
 0x251   : > { %2751 = vmatpush.msra.mxu2 %v1956_v24  ;;  %2770 = vmatpush.msra.mxu3 %v1990_v6  ;;  %v1940_v24 = vunpack.c.h.bf16 %v4590_v29  ;;  %v1974_v6 = vunpack.c.h.bf16 %v4591_v38  ;;  %v4622_v29 = vld [vmem:[%s5265_s15 + $0x358] sm:$0xff]  ;;  %v4623_v38 = vld [vmem:[%s5265_s15 + $0x3e0] sm:$0xff] }
 0x252   : > { %2712 = vmatpush.msra.mxu0 %v1890_v18  ;;  %2731 = vmatpush.msra.mxu1 %v1924_v2  ;;  %v1874_v18 = vunpack.c.h.bf16 %v4592_v58  ;;  %v1908_v2 = vunpack.c.h.bf16 %v4593_v19  ;;  %v4624_v58 = vld [vmem:[%s5265_s15 + $0x250] sm:$0xff]  ;;  %v4625_v19 = vld [vmem:[%s5265_s15 + $0x2d8] sm:$0xff] }
 0x253   : > { %2752 = vmatpush.msra.mxu2 %v1954_v21  ;;  %2771 = vmatpush.msra.mxu3 %v1988_v26  ;;  %v1938_v21 = vunpack.c.h.bf16 %v4594_v15  ;;  %v1972_v26 = vunpack.c.h.bf16 %v4595_v39  ;;  %v4626_v15 = vld [vmem:[%s5265_s15 + $0x350] sm:$0xff]  ;;  %v4627_v39 = vld [vmem:[%s5265_s15 + $0x3d8] sm:$0xff] }
 0x254   : > { %2713 = vmatpush.msra.mxu0 %v1888_v11  ;;  %2732 = vmatpush.msra.mxu1 %v1922_v51  ;;  %v1872_v11 = vunpack.c.h.bf16 %v4596_v48  ;;  %v1906_v51 = vunpack.c.h.bf16 %v4597_v31  ;;  %v4628_v48 = vld [vmem:[%s5265_s15 + $0x248] sm:$0xff]  ;;  %v4629_v31 = vld [vmem:[%s5265_s15 + $0x2d0] sm:$0xff] }
 0x255   : > { %2753 = vmatpush.msra.mxu2 %v1952_v32  ;;  %2772 = vmatpush.msra.mxu3 %v1986_v0  ;;  %v1936_v32 = vunpack.c.h.bf16 %v4598_v63  ;;  %v1970_v0 = vunpack.c.h.bf16 %v4599_v20  ;;  %v4630_v63 = vld [vmem:[%s5265_s15 + $0x348] sm:$0xff]  ;;  %v4631_v20 = vld [vmem:[%s5265_s15 + $0x3d0] sm:$0xff] }
 0x256   : > { %2714 = vmatpush.msra.mxu0 %v1886_v42  ;;  %2733 = vmatpush.msra.mxu1 %v1920_v36  ;;  %v1870_v42 = vunpack.c.h.bf16 %v4600_v4  ;;  %v1904_v36 = vunpack.c.h.bf16 %v4601_v59  ;;  %v4632_v4 = vld [vmem:[%s5265_s15 + $0x240] sm:$0xff]  ;;  %v4633_v59 = vld [vmem:[%s5265_s15 + $0x2c8] sm:$0xff] }
 0x257   : > { %2754 = vmatpush.msra.mxu2 %v1950_v17  ;;  %2773 = vmatpush.msra.mxu3 %v1984_v16  ;;  %v1934_v17 = vunpack.c.h.bf16 %v4602_v37  ;;  %v1968_v16 = vunpack.c.h.bf16 %v4603_v41  ;;  %v4634_v37 = vld [vmem:[%s5265_s15 + $0x340] sm:$0xff]  ;;  %v4635_v41 = vld [vmem:[%s5265_s15 + $0x3c8] sm:$0xff] }
 0x258   : > { %2715 = vmatpush.msra.mxu0 %v1884_v7  ;;  %2734 = vmatpush.msra.mxu1 %v1918_v13  ;;  %v2028_v7 = vunpack.c.h.bf16 %v4604_v43  ;;  %v2092_v13 = vunpack.c.h.bf16 %v4605_v33  ;;  %v4636_v43 = vld [vmem:[%s5265_s15 + $0x238] sm:$0xff]  ;;  %v4637_v33 = vld [vmem:[%s5265_s15 + $0x2c0] sm:$0xff] }
 0x259   : > { %2755 = vmatpush.msra.mxu2 %v1948_v25  ;;  %2774 = vmatpush.msra.mxu3 %v1982_v49  ;;  %v1902_v25 = vunpack.c.h.bf16 %v4606_v45  ;;  %v1966_v49 = vunpack.c.h.bf16 %v4607_v53  ;;  %v4638_v45 = vld [vmem:[%s5265_s15 + $0x338] sm:$0xff]  ;;  %v4639_v53 = vld [vmem:[%s5265_s15 + $0x3c0] sm:$0xff] }
 0x25a   : > { %2716 = vmatpush.msra.mxu0 %v1882_v61  ;;  %2735 = vmatpush.msra.mxu1 %v1916_v3  ;;  %v2026_v61 = vunpack.c.h.bf16 %v4608_v9  ;;  %v2060_v3 = vunpack.c.h.bf16 %v4609_v10  ;;  %v4640_v9 = vld [vmem:[%s5265_s15 + $0x230] sm:$0xff]  ;;  %v4641_v10 = vld [vmem:[%s5265_s15 + $0x2b8] sm:$0xff] }
 0x25b   : > { %2756 = vmatpush.msra.mxu2 %v1946_v52  ;;  %2775 = vmatpush.msra.mxu3 %v1980_v46  ;;  %v2090_v52 = vunpack.c.h.bf16 %v4610_v35  ;;  %v2124_v46 = vunpack.c.h.bf16 %v4611_v62  ;;  %v4642_v35 = vld [vmem:[%s5265_s15 + $0x330] sm:$0xff]  ;;  %v4643_v62 = vld [vmem:[%s5265_s15 + $0x3b8] sm:$0xff] }
 0x25c   : > { %2717 = vmatpush.msra.mxu0 %v1880_v22  ;;  %2736 = vmatpush.msra.mxu1 %v1914_v27  ;;  %v2024_v22 = vunpack.c.h.bf16 %v4612_v12  ;;  %v2058_v27 = vunpack.c.h.bf16 %v4613_v57  ;;  %v4644_v12 = vld [vmem:[%s5265_s15 + $0x228] sm:$0xff]  ;;  %v4645_v57 = vld [vmem:[%s5265_s15 + $0x2b0] sm:$0xff] }
 0x25d   : > { %2757 = vmatpush.msra.mxu2 %v1944_v34  ;;  %2776 = vmatpush.msra.mxu3 %v1978_v47  ;;  %v2088_v34 = vunpack.c.h.bf16 %v4614_v1  ;;  %v2122_v47 = vunpack.c.h.bf16 %v4615_v54  ;;  %v4646_v1 = vld [vmem:[%s5265_s15 + $0x328] sm:$0xff]  ;;  %v4647_v54 = vld [vmem:[%s5265_s15 + $0x3b0] sm:$0xff] }
 0x25e   : > { %2718 = vmatpush.msra.mxu0 %v1878_v30  ;;  %2737 = vmatpush.msra.mxu1 %v1912_v23  ;;  %v2022_v30 = vunpack.c.h.bf16 %v4616_v8  ;;  %v2056_v23 = vunpack.c.h.bf16 %v4617_v44  ;;  %v4648_v8 = vld [vmem:[%s5265_s15 + $0x220] sm:$0xff]  ;;  %v4649_v44 = vld [vmem:[%s5265_s15 + $0x2a8] sm:$0xff] }
 0x25f   : > { %2758 = vmatpush.msra.mxu2 %v1942_v60  ;;  %2777 = vmatpush.msra.mxu3 %v1976_v28  ;;  %v2086_v60 = vunpack.c.h.bf16 %v4618_v55  ;;  %v2120_v28 = vunpack.c.h.bf16 %v4619_v50  ;;  %v4650_v55 = vld [vmem:[%s5265_s15 + $0x320] sm:$0xff]  ;;  %v4651_v50 = vld [vmem:[%s5265_s15 + $0x3a8] sm:$0xff] }
 0x260   : > { %2719 = vmatpush.msra.mxu0 %v1876_v56  ;;  %2738 = vmatpush.msra.mxu1 %v1910_v5  ;;  %v2020_v56 = vunpack.c.h.bf16 %v4620_v40  ;;  %v2054_v5 = vunpack.c.h.bf16 %v4621_v14  ;;  %v4652_v40 = vld [vmem:[%s5265_s15 + $0x218] sm:$0xff]  ;;  %v4653_v14 = vld [vmem:[%s5265_s15 + $0x2a0] sm:$0xff] }
 0x261   : > { %2759 = vmatpush.msra.mxu2 %v1940_v24  ;;  %2778 = vmatpush.msra.mxu3 %v1974_v6  ;;  %v2084_v24 = vunpack.c.h.bf16 %v4622_v29  ;;  %v2118_v6 = vunpack.c.h.bf16 %v4623_v38  ;;  %v4654_v29 = vld [vmem:[%s5265_s15 + $0x318] sm:$0xff]  ;;  %v4655_v38 = vld [vmem:[%s5265_s15 + $0x3a0] sm:$0xff] }
 0x262   : > { %2720 = vmatpush.msra.mxu0 %v1874_v18  ;;  %2739 = vmatpush.msra.mxu1 %v1908_v2  ;;  %v2018_v18 = vunpack.c.h.bf16 %v4624_v58  ;;  %v2052_v2 = vunpack.c.h.bf16 %v4625_v19  ;;  %v4656_v58 = vld [vmem:[%s5265_s15 + $0x210] sm:$0xff]  ;;  %v4657_v19 = vld [vmem:[%s5265_s15 + $0x298] sm:$0xff] }
 0x263   : > { %2760 = vmatpush.msra.mxu2 %v1938_v21  ;;  %2779 = vmatpush.msra.mxu3 %v1972_v26  ;;  %v2082_v21 = vunpack.c.h.bf16 %v4626_v15  ;;  %v2116_v26 = vunpack.c.h.bf16 %v4627_v39  ;;  %v4658_v15 = vld [vmem:[%s5265_s15 + $0x310] sm:$0xff]  ;;  %v4659_v39 = vld [vmem:[%s5265_s15 + $0x398] sm:$0xff] }
 0x264   : > { %2721 = vmatpush.msra.mxu0 %v1872_v11  ;;  %2740 = vmatpush.msra.mxu1 %v1906_v51  ;;  %v2016_v11 = vunpack.c.h.bf16 %v4628_v48  ;;  %v2050_v51 = vunpack.c.h.bf16 %v4629_v31  ;;  %v4660_v48 = vld [vmem:[%s5265_s15 + $0x208] sm:$0xff]  ;;  %v4661_v31 = vld [vmem:[%s5265_s15 + $0x290] sm:$0xff] }
 0x265   : > { %2761 = vmatpush.msra.mxu2 %v1936_v32  ;;  %2780 = vmatpush.msra.mxu3 %v1970_v0  ;;  %v2080_v32 = vunpack.c.h.bf16 %v4630_v63  ;;  %v2114_v0 = vunpack.c.h.bf16 %v4631_v20  ;;  %v4662_v63 = vld [vmem:[%s5265_s15 + $0x308] sm:$0xff]  ;;  %v4663_v20 = vld [vmem:[%s5265_s15 + $0x390] sm:$0xff] }
 0x266   : > { %2722 = vmatpush.msra.mxu0 %v1870_v42  ;;  %2741 = vmatpush.msra.mxu1 %v1904_v36  ;;  %v2014_v42 = vunpack.c.h.bf16 %v4632_v4  ;;  %v2048_v36 = vunpack.c.h.bf16 %v4633_v59  ;;  %v4664_v4 = vld [vmem:[%s5265_s15 + $0x200] sm:$0xff]  ;;  %v4665_v59 = vld [vmem:[%s5265_s15 + $0x288] sm:$0xff] }
 0x267   : > { %2762 = vmatpush.msra.mxu2 %v1934_v17  ;;  %2781 = vmatpush.msra.mxu3 %v1968_v16  ;;  %v2078_v17 = vunpack.c.h.bf16 %v4634_v37  ;;  %v2112_v16 = vunpack.c.h.bf16 %v4635_v41  ;;  %v4666_v37 = vld [vmem:[%s5265_s15 + $0x300] sm:$0xff]  ;;  %v4667_v41 = vld [vmem:[%s5265_s15 + $0x388] sm:$0xff] }
 0x268   : > { %2787 = vmatpush.msrb.mxu0 %v2028_v7  ;;  %2742 = vmatpush.msra.mxu1 %v1902_v25  ;;  %v2012_v7 = vunpack.c.h.bf16 %v4636_v43  ;;  %v2076_v25 = vunpack.c.h.bf16 %v4638_v45  ;;  %v4668_v43 = vld [vmem:[%s5265_s15 + $0x478] sm:$0xff] }
 0x269   : > { %2827 = vmatpush.msrb.mxu2 %v2092_v13  ;;  %2782 = vmatpush.msra.mxu3 %v1966_v49  ;;  %v2046_v13 = vunpack.c.h.bf16 %v4637_v33  ;;  %v2110_v49 = vunpack.c.h.bf16 %v4639_v53  ;;  %v4669_v33 = vld [vmem:[%s5265_s15 + $0x280] sm:$0xff]  ;;  %v4670_v45 = vld [vmem:[%s5265_s15 + $0x578] sm:$0xff] }
 0x26a   : > { %2788 = vmatpush.msrb.mxu0 %v2026_v61  ;;  %2807 = vmatpush.msrb.mxu1 %v2060_v3  ;;  %v2010_v61 = vunpack.c.h.bf16 %v4640_v9  ;;  %v2044_v3 = vunpack.c.h.bf16 %v4641_v10  ;;  %v4671_v53 = vld [vmem:[%s5265_s15 + $0x380] sm:$0xff] }
 0x26b   : > { %2828 = vmatpush.msrb.mxu2 %v2090_v52  ;;  %2847 = vmatpush.msrb.mxu3 %v2124_v46  ;;  %v2074_v52 = vunpack.c.h.bf16 %v4642_v35  ;;  %v2108_v46 = vunpack.c.h.bf16 %v4643_v62  ;;  %v4672_v9 = vld [vmem:[#allocation2 + $0x30] sm:$0xff]  ;;  %v4675_v35 = vld [vmem:[%s5265_s15 + $0x4f8] sm:$0xff]  ;;  %v4676_v62 = vld [vmem:[%s5265_s15 + $0x570] sm:$0xff] }
 0x26c   : > { %2789 = vmatpush.msrb.mxu0 %v2024_v22  ;;  %2808 = vmatpush.msrb.mxu1 %v2058_v27  ;;  %v2008_v22 = vunpack.c.h.bf16 %v4644_v12  ;;  %v2042_v27 = vunpack.c.h.bf16 %v4645_v57  ;;  %v4677_v12 = vld [vmem:[%s5265_s15 + $0x5f8] sm:$0xff]  ;;  %v4678_v57 = vld [vmem:[%s5265_s15 + $0x468] sm:$0xff] }
 0x26d   : > { %2829 = vmatpush.msrb.mxu2 %v2088_v34  ;;  %2848 = vmatpush.msrb.mxu3 %v2122_v47  ;;  %v2072_v34 = vunpack.c.h.bf16 %v4646_v1  ;;  %v2106_v47 = vunpack.c.h.bf16 %v4647_v54  ;;  %v4679_v1 = vld [vmem:[#allocation2] sm:$0xff] }
 0x26e   : > { %2790 = vmatpush.msrb.mxu0 %v2022_v30  ;;  %2809 = vmatpush.msrb.mxu1 %v2056_v23  ;;  %v2006_v30 = vunpack.c.h.bf16 %v4648_v8  ;;  %v2040_v23 = vunpack.c.h.bf16 %v4649_v44  ;;  %v4683_v44 = vld [vmem:[%s5265_s15 + $0x5f0] sm:$0xff] }
 0x26f   : > { %2830 = vmatpush.msrb.mxu2 %v2086_v60  ;;  %2849 = vmatpush.msrb.mxu3 %v2120_v28  ;;  %v2070_v60 = vunpack.c.h.bf16 %v4650_v55  ;;  %v2104_v28 = vunpack.c.h.bf16 %v4651_v50  ;;  %v4684_v55 = vld [vmem:[%s5265_s15 + $0x460] sm:$0xff]  ;;  %v4685_v50 = vld [vmem:[%s5265_s15 + $0x4e8] sm:$0xff] }
 0x270   : > { %2791 = vmatpush.msrb.mxu0 %v2020_v56  ;;  %2810 = vmatpush.msrb.mxu1 %v2054_v5  ;;  %v2004_v56 = vunpack.c.h.bf16 %v4652_v40  ;;  %v2038_v5 = vunpack.c.h.bf16 %v4653_v14  ;;  %v4686_v40 = vld [vmem:[%s5265_s15 + $0x560] sm:$0xff]  ;;  %v4687_v14 = vld [vmem:[%s5265_s15 + $0x5e8] sm:$0xff] }
 0x271   : > { %2831 = vmatpush.msrb.mxu2 %v2084_v24  ;;  %2850 = vmatpush.msrb.mxu3 %v2118_v6  ;;  %v2068_v24 = vunpack.c.h.bf16 %v4654_v29  ;;  %v2102_v6 = vunpack.c.h.bf16 %v4655_v38  ;;  %v4688_v29 = vld [vmem:[%s5265_s15 + $0x458] sm:$0xff]  ;;  %v4689_v38 = vld [vmem:[%s5265_s15 + $0x4e0] sm:$0xff] }
 0x272   : > { %2792 = vmatpush.msrb.mxu0 %v2018_v18  ;;  %2811 = vmatpush.msrb.mxu1 %v2052_v2  ;;  %v2002_v18 = vunpack.c.h.bf16 %v4656_v58  ;;  %v2036_v2 = vunpack.c.h.bf16 %v4657_v19  ;;  %v4690_v58 = vld [vmem:[%s5265_s15 + $0x558] sm:$0xff]  ;;  %v4691_v19 = vld [vmem:[%s5265_s15 + $0x5e0] sm:$0xff] }
 0x273   : > { %2832 = vmatpush.msrb.mxu2 %v2082_v21  ;;  %2851 = vmatpush.msrb.mxu3 %v2116_v26  ;;  %v2066_v21 = vunpack.c.h.bf16 %v4658_v15  ;;  %v2100_v26 = vunpack.c.h.bf16 %v4659_v39  ;;  %v4692_v15 = vld [vmem:[#allocation2 + $0x8] sm:$0xff] }
 0x274   : > { %2793 = vmatpush.msrb.mxu0 %v2016_v11  ;;  %2812 = vmatpush.msrb.mxu1 %v2050_v51  ;;  %v2000_v11 = vunpack.c.h.bf16 %v4660_v48  ;;  %v2034_v51 = vunpack.c.h.bf16 %v4661_v31 }
 0x275   : > { %2833 = vmatpush.msrb.mxu2 %v2080_v32  ;;  %2852 = vmatpush.msrb.mxu3 %v2114_v0  ;;  %v2064_v32 = vunpack.c.h.bf16 %v4662_v63  ;;  %v2098_v0 = vunpack.c.h.bf16 %v4663_v20  ;;  %v4697_v20 = vld [vmem:[%s5265_s15 + $0x448] sm:$0xff] }
 0x276   : > { %2794 = vmatpush.msrb.mxu0 %v2014_v42  ;;  %2813 = vmatpush.msrb.mxu1 %v2048_v36  ;;  %v1998_v42 = vunpack.c.h.bf16 %v4664_v4  ;;  %v2032_v36 = vunpack.c.h.bf16 %v4665_v59  ;;  %v4698_v4 = vld [vmem:[#allocation2 + $0x50] sm:$0xff]  ;;  %v4700_v59 = vld [vmem:[%s5265_s15 + $0x4d0] sm:$0xff] }
 0x277   : > { %2834 = vmatpush.msrb.mxu2 %v2078_v17  ;;  %2853 = vmatpush.msrb.mxu3 %v2112_v16  ;;  %v2062_v17 = vunpack.c.h.bf16 %v4666_v37  ;;  %v2096_v16 = vunpack.c.h.bf16 %v4667_v41  ;;  %v4701_v37 = vld [vmem:[%s5265_s15 + $0x548] sm:$0xff]  ;;  %v4702_v41 = vld [vmem:[%s5265_s15 + $0x5d0] sm:$0xff] }
 0x278   : > { %2795 = vmatpush.msrb.mxu0 %v2012_v7  ;;  %2814 = vmatpush.msrb.mxu1 %v2046_v13  ;;  %v2156_v7 = vunpack.c.h.bf16 %v4668_v43  ;;  %v2030_v13 = vunpack.c.h.bf16 %v4669_v33  ;;  %v4703_v43 = vld [vmem:[%s5265_s15 + $0x440] sm:$0xff] }
 0x279   : > { %2835 = vmatpush.msrb.mxu2 %v2076_v25  ;;  %2854 = vmatpush.msrb.mxu3 %v2110_v49  ;;  %v2220_v25 = vunpack.c.h.bf16 %v4670_v45  ;;  %v2094_v49 = vunpack.c.h.bf16 %v4671_v53 }
 0x27a   : > { %2796 = vmatpush.msrb.mxu0 %v2010_v61  ;;  %2815 = vmatpush.msrb.mxu1 %v2044_v3  ;;  %v4673_v61 = vld [vmem:[%s5265_s15 + $0x470] sm:$0xff]  ;;  %v4674_v3 = vld [vmem:[#allocation2 + $0x58] sm:$0xff] }
 0x27b   : > { %2836 = vmatpush.msrb.mxu2 %v2074_v52  ;;  %2855 = vmatpush.msrb.mxu3 %v2108_v46  ;;  %v2154_v10 = vunpack.c.h.bf16 %v4673_v61  ;;  %v2188_v52 = vunpack.c.h.bf16 %v4675_v35  ;;  %v2218_v46 = vunpack.c.h.bf16 %v4676_v62  ;;  %v4707_v61 = vld [vmem:[%s5265_s15 + $0x5c8] sm:$0xff] }
 0x27c   : > { %2797 = vmatpush.msrb.mxu0 %v2008_v22  ;;  %2816 = vmatpush.msrb.mxu1 %v2042_v27  ;;  %v2252_v22 = vunpack.c.h.bf16 %v4677_v12  ;;  %v2152_v27 = vunpack.c.h.bf16 %v4678_v57 }
 0x27d   : > { %2837 = vmatpush.msrb.mxu2 %v2072_v34  ;;  %2856 = vmatpush.msrb.mxu3 %v2106_v47  ;;  %v4680_v34 = vld [vmem:[%s5265_s15 + $0x4f0] sm:$0xff]  ;;  %v4681_v47 = vld [vmem:[%s5265_s15 + $0x568] sm:$0xff] }
 0x27e   : > { %2798 = vmatpush.msrb.mxu0 %v2006_v30  ;;  %2817 = vmatpush.msrb.mxu1 %v2040_v23  ;;  %v2186_v54 = vunpack.c.h.bf16 %v4680_v34  ;;  %v2216_v8 = vunpack.c.h.bf16 %v4681_v47  ;;  %v4682_v30 = vld [vmem:[#allocation2 + $0x18] sm:$0xff]  ;;  %v2250_v23 = vunpack.c.h.bf16 %v4683_v44 }
 0x27f   : > { %2838 = vmatpush.msrb.mxu2 %v2070_v60  ;;  %2857 = vmatpush.msrb.mxu3 %v2104_v28  ;;  %v2150_v60 = vunpack.c.h.bf16 %v4684_v55  ;;  %v2184_v28 = vunpack.c.h.bf16 %v4685_v50 }
 0x280   : > { %2799 = vmatpush.msrb.mxu0 %v2004_v56  ;;  %2818 = vmatpush.msrb.mxu1 %v2038_v5  ;;  %v2214_v56 = vunpack.c.h.bf16 %v4686_v40  ;;  %v2248_v5 = vunpack.c.h.bf16 %v4687_v14  ;;  %v2424_v44 = vpop.f32.mrf.mxu1 }
 0x281   : > { %2839 = vmatpush.msrb.mxu2 %v2068_v24  ;;  %2858 = vmatpush.msrb.mxu3 %v2102_v6  ;;  %v2148_v24 = vunpack.c.h.bf16 %v4688_v29  ;;  %v2182_v6 = vunpack.c.h.bf16 %v4689_v38 }
 0x282   : > { %2800 = vmatpush.msrb.mxu0 %v2002_v18  ;;  %2819 = vmatpush.msrb.mxu1 %v2036_v2  ;;  %v2212_v18 = vunpack.c.h.bf16 %v4690_v58  ;;  %v2246_v2 = vunpack.c.h.bf16 %v4691_v19  ;;  %v4721_v58 = vld [vmem:[%s5265_s15 + $0x4a8] sm:$0xff]  ;;  %v4722_v19 = vld [vmem:[%s5265_s15 + $0x520] sm:$0xff] }
 0x283   : > { %2840 = vmatpush.msrb.mxu2 %v2066_v21  ;;  %2859 = vmatpush.msrb.mxu3 %v2100_v26  ;;  %v4693_v21 = vld [vmem:[%s5265_s15 + $0x450] sm:$0xff]  ;;  %v4694_v26 = vld [vmem:[%s5265_s15 + $0x4d8] sm:$0xff] }
 0x284   : > { %2801 = vmatpush.msrb.mxu0 %v2000_v11  ;;  %2820 = vmatpush.msrb.mxu1 %v2034_v51  ;;  %v2146_v39 = vunpack.c.h.bf16 %v4693_v21  ;;  %v2180_v48 = vunpack.c.h.bf16 %v4694_v26  ;;  %v4695_v11 = vld [vmem:[%s5265_s15 + $0x550] sm:$0xff]  ;;  %v4696_v51 = vld [vmem:[%s5265_s15 + $0x5d8] sm:$0xff]  ;;  %v4723_v21 = vld [vmem:[%s5265_s15 + $0x5a8] sm:$0xff] }
 0x285   : > { %2841 = vmatpush.msrb.mxu2 %v2064_v32  ;;  %2860 = vmatpush.msrb.mxu3 %v2098_v0  ;;  %v2210_v31 = vunpack.c.h.bf16 %v4695_v11  ;;  %v2244_v63 = vunpack.c.h.bf16 %v4696_v51  ;;  %v2381_v32 = vld [vmem:[%s5271_s30] sm:$0x3]  ;;  %v2144_v0 = vunpack.c.h.bf16 %v4697_v20  ;;  %v4724_v26 = vld [vmem:[%s5265_s15 + $0x418] sm:$0xff] }
 0x286   : > { %2802 = vmatpush.msrb.mxu0 %v1998_v42  ;;  %2821 = vmatpush.msrb.mxu1 %v2032_v36  ;;  %v4699_v42 = vld [vmem:[#allocation2 + $0x48] sm:$0xff]  ;;  %v2178_v36 = vunpack.c.h.bf16 %v4700_v59  ;;  %v2383_v33 = vperm.slane %v2381_v32, 0  ;;  %v4725_v11 = vld [vmem:[%s5265_s15 + $0x4a0] sm:$0xff] }
 0x287   : > { %2842 = vmatpush.msrb.mxu2 %v2062_v17  ;;  %2861 = vmatpush.msrb.mxu3 %v2096_v16  ;;  %v2208_v17 = vunpack.c.h.bf16 %v4701_v37  ;;  %v2242_v16 = vunpack.c.h.bf16 %v4702_v41  ;;  %v4726_v51 = vld [vmem:[%s5265_s15 + $0x518] sm:$0xff]  ;;  %v4727_v32 = vld [vmem:[%s5265_s15 + $0x5a0] sm:$0xff]  ;;  %v4730_v37 = vld [vmem:[%s5265_s15 + $0x510] sm:$0xff]  ;;  %v2464_v41 = vpop.f32.mrf.mxu3 }
 0x288   : > { %2723 = vmatmul.f32.vlgmr.msra.gmra.mxu0 %v4672_v9  ;;  %2763 = vmatmul.f32.vlgmr.msra.gmra.mxu2 %v4674_v3  ;;  %v4706_v9 = vld [vmem:[#allocation2 + $0x68] sm:$0xff]  ;;  %v2230_v20 = vunpack.c.h.bf16 %v4727_v32  ;;  %v4757_v32 = vld [vmem:[%s5265_s15 + $0x6e8] sm:$0xff] }
 0x289   : > { %2867 = vmatpush.msra.mxu0 %v2156_v7  ;;  %2907 = vmatpush.msra.mxu2 %v2220_v25  ;;  %v2142_v7 = vunpack.c.h.bf16 %v4703_v43  ;;  %v4705_v25 = vld [vmem:[%s5265_s15 + $0x540] sm:$0xff]  ;;  %v4708_v3 = vld [vmem:[%s5265_s15 + $0x438] sm:$0xff] }
 0x28a   : > { %2822 = vmatpush.msrb.mxu1 %v2030_v13  ;;  %2862 = vmatpush.msrb.mxu3 %v2094_v49  ;;  %v4704_v13 = vld [vmem:[%s5265_s15 + $0x4c8] sm:$0xff]  ;;  %v2206_v53 = vunpack.c.h.bf16 %v4705_v25  ;;  %v2404_v49 = vpop.f32.mrf.mxu0  ;;  %v2140_v35 = vunpack.c.h.bf16 %v4708_v3  ;;  %v4729_v59 = vld [vmem:[%s5265_s15 + $0x498] sm:$0xff] }
 0x28b   : > { %2743 = vmatmul.f32.vlgmr.msra.gmra.mxu1 %v4679_v1  ;;  %2783 = vmatmul.f32.vlgmr.msra.gmra.mxu3 %v4682_v30  ;;  %v2176_v45 = vunpack.c.h.bf16 %v4704_v13  ;;  %v2405_v34 = vadd.f32 %v2404_v49, %v2383_v33  ;;  %v4733_v13 = vld [vmem:[%s5265_s15 + $0x490] sm:$0xff]  ;;  %v4734_v25 = vld [vmem:[%s5265_s15 + $0x508] sm:$0xff] }
 0x28c   : > { %2868 = vmatpush.msra.mxu0 %v2154_v10  ;;  %2887 = vmatpush.msra.mxu1 %v2188_v52  ;;  %v2240_v10 = vunpack.c.h.bf16 %v4707_v61  ;;  %v4709_v52 = vld [vmem:[%s5265_s15 + $0x4c0] sm:$0xff]  ;;  %v4735_v49 = vld [vmem:[%s5265_s15 + $0x590] sm:$0xff] }
 0x28d   : > { %2908 = vmatpush.msra.mxu2 %v2218_v46  ;;  %2927 = vmatpush.msra.mxu3 %v2252_v22  ;;  %v2174_v62 = vunpack.c.h.bf16 %v4709_v52  ;;  %v4710_v46 = vld [vmem:[%s5265_s15 + $0x538] sm:$0xff]  ;;  %v4711_v22 = vld [vmem:[%s5265_s15 + $0x5c0] sm:$0xff] }
 0x28e   : > { %2869 = vmatpush.msra.mxu0 %v2152_v27  ;;  %2888 = vmatpush.msra.mxu1 %v2186_v54  ;;  %v2204_v12 = vunpack.c.h.bf16 %v4710_v46  ;;  %v2238_v57 = vunpack.c.h.bf16 %v4711_v22  ;;  %v4712_v27 = vld [vmem:[%s5265_s15 + $0x430] sm:$0xff]  ;;  %v4713_v54 = vld [vmem:[%s5265_s15 + $0x4b8] sm:$0xff]  ;;  %v4736_v61 = vld [vmem:[%s5265_s15 + $0x400] sm:$0xff] }
 0x28f   : > { %2909 = vmatpush.msra.mxu2 %v2216_v8  ;;  %2928 = vmatpush.msra.mxu3 %v2250_v23  ;;  %v2138_v1 = vunpack.c.h.bf16 %v4712_v27  ;;  %v2172_v47 = vunpack.c.h.bf16 %v4713_v54  ;;  %v4714_v8 = vld [vmem:[%s5265_s15 + $0x530] sm:$0xff]  ;;  %v4715_v23 = vld [vmem:[%s5265_s15 + $0x5b8] sm:$0xff]  ;;  %v4739_v22 = vld [vmem:[%s5265_s15 + $0x588] sm:$0xff] }
 0x290   : > { %2870 = vmatpush.msra.mxu0 %v2150_v60  ;;  %2889 = vmatpush.msra.mxu1 %v2184_v28  ;;  %v2202_v30 = vunpack.c.h.bf16 %v4714_v8  ;;  %v2236_v55 = vunpack.c.h.bf16 %v4715_v23  ;;  %v4716_v60 = vld [vmem:[%s5265_s15 + $0x428] sm:$0xff]  ;;  %v4717_v28 = vld [vmem:[%s5265_s15 + $0x4b0] sm:$0xff]  ;;  %v4740_v27 = vld [vmem:[%s5265_s15 + $0x678] sm:$0xff] }
 0x291   : > { %2910 = vmatpush.msra.mxu2 %v2214_v56  ;;  %2929 = vmatpush.msra.mxu3 %v2248_v5  ;;  %v2136_v50 = vunpack.c.h.bf16 %v4716_v60  ;;  %v2170_v40 = vunpack.c.h.bf16 %v4717_v28  ;;  %v4718_v56 = vld [vmem:[%s5265_s15 + $0x528] sm:$0xff]  ;;  %v4719_v5 = vld [vmem:[%s5265_s15 + $0x5b0] sm:$0xff] }
 0x292   : > { %2843 = vmatmul.f32.vlgmr.msrb.gmra.mxu2 %v4692_v15  ;;  %2871 = vmatpush.msra.mxu0 %v2148_v24  ;;  %v2200_v14 = vunpack.c.h.bf16 %v4718_v56  ;;  %v2234_v29 = vunpack.c.h.bf16 %v4719_v5  ;;  %v4720_v24 = vld [vmem:[%s5265_s15 + $0x420] sm:$0xff]  ;;  %v2444_v15 = vpop.f32.mrf.mxu2  ;;  %v4744_v60 = vld [vmem:[#allocation2 + $0x40] sm:$0xff]  ;;  %v4747_v56 = vld [vmem:[%s5265_s15 + $0x6f8] sm:$0xff] }
 0x293   : > { %2890 = vmatpush.msra.mxu1 %v2182_v6  ;;  %2911 = vmatpush.msra.mxu2 %v2212_v18  ;;  %v2134_v38 = vunpack.c.h.bf16 %v4720_v24  ;;  %v2425_v6 = vadd.f32 %v2424_v44, %v2405_v34  ;;  %v2168_v18 = vunpack.c.h.bf16 %v4721_v58  ;;  %v4741_v34 = vld [vmem:[%s5265_s15 + $0x778] sm:$0xff]  ;;  %v4743_v44 = vld [vmem:[%s5265_s15 + $0x580] sm:$0xff]  ;;  %v4748_v5 = vld [vmem:[%s5265_s15 + $0x770] sm:$0xff] }
 0x294   : > { %2930 = vmatpush.msra.mxu3 %v2246_v2  ;;  %2803 = vmatmul.f32.vlgmr.msrb.gmra.mxu0 %v4698_v4  ;;  %v2198_v2 = vunpack.c.h.bf16 %v4722_v19  ;;  %v2348_v54 = vunpack.c.h.bf16 %v4741_v34  ;;  %v2222_v23 = vunpack.c.h.bf16 %v4743_v44  ;;  %v4749_v24 = vld [vmem:[%s5265_s15 + $0x7f8] sm:$0xff]  ;;  %v4751_v19 = vld [vmem:[#allocation2 + $0x20] sm:$0xff]  ;;  %v4773_v44 = vld [vmem:[%s5265_s15 + $0x6c8] sm:$0xff] }
 0x295   : > { %2863 = vmatmul.f32.vlgmr.msrb.gmra.mxu3 %v4699_v42  ;;  %2872 = vmatpush.msra.mxu0 %v2146_v39  ;;  %v2232_v39 = vunpack.c.h.bf16 %v4723_v21  ;;  %v2445_v42 = vadd.f32 %v2444_v15, %v2425_v6  ;;  %v4750_v6 = vld [vmem:[%s5265_s15 + $0x668] sm:$0xff]  ;;  %v4771_v34 = vld [vmem:[%s5265_s15 + $0x7d0] sm:$0xff] }
 0x296   : > { %2891 = vmatpush.msra.mxu1 %v2180_v48  ;;  %2912 = vmatpush.msra.mxu2 %v2210_v31  ;;  %v2132_v48 = vunpack.c.h.bf16 %v4724_v26  ;;  %v2166_v31 = vunpack.c.h.bf16 %v4725_v11  ;;  %v2280_v58 = vunpack.c.h.bf16 %v4750_v6  ;;  %v4753_v21 = vld [vmem:[%s5265_s15 + $0x768] sm:$0xff]  ;;  %v4755_v11 = vld [vmem:[%s5265_s15 + $0x7f0] sm:$0xff] }
 0x297   : > { %2931 = vmatpush.msra.mxu3 %v2244_v63  ;;  %2823 = vmatmul.f32.vlgmr.msrb.gmra.mxu1 %v4706_v9  ;;  %v2196_v63 = vunpack.c.h.bf16 %v4726_v51  ;;  %v2226_v9 = vunpack.c.h.bf16 %v4735_v49  ;;  %v2465_v3 = vadd.f32 %v2464_v41, %v2445_v42  ;;  %v4756_v51 = vld [vmem:[%s5265_s15 + $0x660] sm:$0xff]  ;;  %v4759_v42 = vld [vmem:[%s5265_s15 + $0x7e8] sm:$0xff]  ;;  %v4765_v49 = vld [vmem:[%s5265_s15 + $0x6d8] sm:$0xff] }
 0x298   : > { %2873 = vmatpush.msra.mxu0 %v2144_v0  ;;  %2892 = vmatpush.msra.mxu1 %v2178_v36  ;;  %v4728_v0 = vld [vmem:[%s5265_s15 + $0x410] sm:$0xff]  ;;  %v2164_v36 = vunpack.c.h.bf16 %v4729_v59  ;;  %v2376_v59 = vunpack.c.h.bf16 %v4759_v42  ;;  %v4761_v41 = vld [vmem:[%s5265_s15 + $0x6e0] sm:$0xff] }
 0x299   : > { %2913 = vmatpush.msra.mxu2 %v2208_v17  ;;  %2932 = vmatpush.msra.mxu3 %v2242_v16  ;;  %v2130_v4 = vunpack.c.h.bf16 %v4728_v0  ;;  %v2194_v17 = vunpack.c.h.bf16 %v4730_v37  ;;  %v4731_v16 = vld [vmem:[%s5265_s15 + $0x598] sm:$0xff]  ;;  %v4758_v0 = vld [vmem:[%s5265_s15 + $0x760] sm:$0xff] }
 0x29a   : > { %2874 = vmatpush.msra.mxu0 %v2142_v7  ;;  %2893 = vmatpush.msra.mxu1 %v2176_v45  ;;  %v2228_v43 = vunpack.c.h.bf16 %v4731_v16  ;;  %v4732_v7 = vld [vmem:[%s5265_s15 + $0x408] sm:$0xff]  ;;  %v2162_v45 = vunpack.c.h.bf16 %v4733_v13  ;;  %v2524_v26 = vpop.f32.mrf.mxu2  ;;  %v2310_v16 = vunpack.c.h.bf16 %v4761_v41  ;;  %v4763_v13 = vld [vmem:[%s5265_s15 + $0x7e0] sm:$0xff] }
 0x29b   : > { %2914 = vmatpush.msra.mxu2 %v2206_v53  ;;  %2933 = vmatpush.msra.mxu3 %v2240_v10  ;;  %v2128_v33 = vunpack.c.h.bf16 %v4732_v7  ;;  %v2192_v53 = vunpack.c.h.bf16 %v4734_v25  ;;  %v2126_v10 = vunpack.c.h.bf16 %v4736_v61  ;;  %v4764_v25 = vld [vmem:[%s5265_s15 + $0x650] sm:$0xff] }
 0x29c   : > { %2875 = vmatpush.msra.mxu0 %v2140_v35  ;;  %2894 = vmatpush.msra.mxu1 %v2174_v62  ;;  %v4737_v35 = vld [vmem:[%s5265_s15 + $0x488] sm:$0xff]  ;;  %v4738_v62 = vld [vmem:[%s5265_s15 + $0x500] sm:$0xff]  ;;  %v4766_v61 = vld [vmem:[%s5265_s15 + $0x750] sm:$0xff] }
 0x29d   : > { %2915 = vmatpush.msra.mxu2 %v2204_v12  ;;  %2934 = vmatpush.msra.mxu3 %v2238_v57  ;;  %v2160_v52 = vunpack.c.h.bf16 %v4737_v35  ;;  %v2190_v46 = vunpack.c.h.bf16 %v4738_v62  ;;  %v2484_v12 = vpop.f32.mrf.mxu0  ;;  %v2224_v57 = vunpack.c.h.bf16 %v4739_v22  ;;  %v4767_v35 = vld [vmem:[%s5265_s15 + $0x7d8] sm:$0xff]  ;;  %v4768_v62 = vld [vmem:[%s5265_s15 + $0x648] sm:$0xff]  ;;  %v4769_v22 = vld [vmem:[%s5265_s15 + $0x6d0] sm:$0xff] }
 0x29e   : > { %2876 = vmatpush.msra.mxu0 %v2138_v1  ;;  %2895 = vmatpush.msra.mxu1 %v2172_v47  ;;  %v2284_v1 = vunpack.c.h.bf16 %v4740_v27  ;;  %v4742_v47 = vld [vmem:[%s5265_s15 + $0x480] sm:$0xff]  ;;  %v4770_v27 = vld [vmem:[%s5265_s15 + $0x748] sm:$0xff] }
 0x29f   : > { %2916 = vmatpush.msra.mxu2 %v2202_v30  ;;  %2935 = vmatpush.msra.mxu3 %v2236_v55  ;;  %v2158_v8 = vunpack.c.h.bf16 %v4742_v47  ;;  %v2485_v30 = vadd.f32 %v2484_v12, %v2465_v3  ;;  %v2504_v55 = vpop.f32.mrf.mxu1  ;;  %v4772_v47 = vld [vmem:[%s5265_s15 + $0x640] sm:$0xff] }
 0x2a0   : > { %2877 = vmatpush.msra.mxu0 %v2136_v50  ;;  %2896 = vmatpush.msra.mxu1 %v2170_v40  ;;  %v4745_v50 = vld [vmem:[%s5265_s15 + $0x670] sm:$0xff]  ;;  %v4746_v40 = vld [vmem:[#allocation2 + $0x10] sm:$0xff] }
 0x2a1   : > { %2917 = vmatpush.msra.mxu2 %v2200_v14  ;;  %2936 = vmatpush.msra.mxu3 %v2234_v29  ;;  %v2282_v28 = vunpack.c.h.bf16 %v4745_v50  ;;  %v2316_v14 = vunpack.c.h.bf16 %v4747_v56  ;;  %v2346_v29 = vunpack.c.h.bf16 %v4748_v5  ;;  %v4776_v56 = vld [vmem:[%s5265_s15 + $0x638] sm:$0xff]  ;;  %v4777_v5 = vld [vmem:[%s5265_s15 + $0x6c0] sm:$0xff] }
 0x2a2   : > { %2878 = vmatpush.msra.mxu0 %v2134_v38  ;;  %2897 = vmatpush.msra.mxu1 %v2168_v18  ;;  %v2380_v38 = vunpack.c.h.bf16 %v4749_v24  ;;  %v2505_v18 = vadd.f32 %v2504_v55, %v2485_v30  ;;  %v4774_v55 = vld [vmem:[%s5265_s15 + $0x740] sm:$0xff]  ;;  %v4778_v24 = vld [vmem:[%s5265_s15 + $0x738] sm:$0xff] }
 0x2a3   : > { %2918 = vmatpush.msra.mxu2 %v2198_v2  ;;  %2937 = vmatpush.msra.mxu3 %v2232_v39  ;;  %v4752_v2 = vld [vmem:[%s5265_s15 + $0x6f0] sm:$0xff]  ;;  %v2344_v39 = vunpack.c.h.bf16 %v4753_v21  ;;  %v4781_v21 = vld [vmem:[%s5265_s15 + $0x6b8] sm:$0xff] }
 0x2a4   : > { %2879 = vmatpush.msra.mxu0 %v2132_v48  ;;  %2898 = vmatpush.msra.mxu1 %v2166_v31  ;;  %v2314_v15 = vunpack.c.h.bf16 %v4752_v2  ;;  %v4754_v48 = vld [vmem:[#allocation2 + $0x38] sm:$0xff]  ;;  %v2378_v31 = vunpack.c.h.bf16 %v4755_v11  ;;  %v4783_v11 = vld [vmem:[%s5265_s15 + $0x7b8] sm:$0xff] }
 0x2a5   : > { %2919 = vmatpush.msra.mxu2 %v2196_v63  ;;  %2938 = vmatpush.msra.mxu3 %v2230_v20  ;;  %v2278_v63 = vunpack.c.h.bf16 %v4756_v51  ;;  %v2312_v20 = vunpack.c.h.bf16 %v4757_v32  ;;  %v2564_v3 = vpop.f32.mrf.mxu0  ;;  %v4784_v51 = vld [vmem:[%s5265_s15 + $0x628] sm:$0xff] }
 0x2a6   : > { %2880 = vmatpush.msra.mxu0 %v2130_v4  ;;  %2899 = vmatpush.msra.mxu1 %v2164_v36  ;;  %v2342_v4 = vunpack.c.h.bf16 %v4758_v0  ;;  %v4760_v36 = vld [vmem:[%s5265_s15 + $0x658] sm:$0xff] }
 0x2a7   : > { %2920 = vmatpush.msra.mxu2 %v2194_v17  ;;  %2939 = vmatpush.msra.mxu3 %v2228_v43  ;;  %v2276_v37 = vunpack.c.h.bf16 %v4760_v36  ;;  %v2525_v17 = vadd.f32 %v2524_v26, %v2505_v18  ;;  %v4762_v43 = vld [vmem:[%s5265_s15 + $0x758] sm:$0xff]  ;;  %v2584_v50 = vpop.f32.mrf.mxu1  ;;  %v2604_v6 = vpop.f32.mrf.mxu2  ;;  %v4782_v26 = vld [vmem:[%s5265_s15 + $0x730] sm:$0xff] }
 0x2a8   : > { %2881 = vmatpush.msra.mxu0 %v2128_v33  ;;  %2900 = vmatpush.msra.mxu1 %v2162_v45  ;;  %v2340_v7 = vunpack.c.h.bf16 %v4762_v43  ;;  %v2544_v33 = vpop.f32.mrf.mxu3  ;;  %v2374_v45 = vunpack.c.h.bf16 %v4763_v13  ;;  %v4787_v36 = vld [vmem:[%s5265_s15 + $0x7b0] sm:$0xff]  ;;  %v4791_v13 = vld [vmem:[%s5265_s15 + $0x7a8] sm:$0xff] }
 0x2a9   : > { %2921 = vmatpush.msra.mxu2 %v2192_v53  ;;  %2940 = vmatpush.msra.mxu3 %v2226_v9  ;;  %v2274_v53 = vunpack.c.h.bf16 %v4764_v25  ;;  %v2308_v9 = vunpack.c.h.bf16 %v4765_v49  ;;  %v2545_v12 = vadd.f32 %v2544_v33, %v2525_v17  ;;  %v4788_v17 = vld [vmem:[%s5265_s15 + $0x620] sm:$0xff]  ;;  %v4792_v25 = vld [vmem:[%s5265_s15 + $0x618] sm:$0xff] }
 0x2aa   : > { %2882 = vmatpush.msra.mxu0 %v2126_v10  ;;  %2901 = vmatpush.msra.mxu1 %v2160_v52  ;;  %v2338_v10 = vunpack.c.h.bf16 %v4766_v61  ;;  %v2372_v52 = vunpack.c.h.bf16 %v4767_v35  ;;  %v2262_v41 = vunpack.c.h.bf16 %v4788_v17 }
 0x2ab   : > { %2922 = vmatpush.msra.mxu2 %v2190_v46  ;;  %2941 = vmatpush.msra.mxu3 %v2224_v57  ;;  %v2272_v46 = vunpack.c.h.bf16 %v4768_v62  ;;  %v2306_v57 = vunpack.c.h.bf16 %v4769_v22  ;;  %v2565_v30 = vadd.f32 %v2564_v3, %v2545_v12  ;;  %v4797_v22 = vld [vmem:[%s5265_s15 + $0x698] sm:$0xff] }
 0x2ac   : > { %2883 = vmatmul.f32.vlgmr.msra.gmra.mxu0 %v4744_v60  ;;  %2923 = vmatmul.f32.vlgmr.msra.gmra.mxu2 %v4746_v40  ;;  %v2334_v60 = vunpack.c.h.bf16 %v4774_v55 }
 0x2ad   : > { %2947 = vmatpush.msrb.mxu0 %v2284_v1  ;;  %2987 = vmatpush.msrb.mxu2 %v2348_v54  ;;  %v2336_v1 = vunpack.c.h.bf16 %v4770_v27  ;;  %v2370_v54 = vunpack.c.h.bf16 %v4771_v34  ;;  %v4798_v27 = vld [vmem:[%s5265_s15 + $0x710] sm:$0xff] }
 0x2ae   : > { %2902 = vmatpush.msra.mxu1 %v2158_v8  ;;  %2942 = vmatpush.msra.mxu3 %v2222_v23  ;;  %v2270_v8 = vunpack.c.h.bf16 %v4772_v47  ;;  %v2304_v23 = vunpack.c.h.bf16 %v4773_v44 }
 0x2af   : > { %2903 = vmatmul.f32.vlgmr.msra.gmra.mxu1 %v4751_v19  ;;  %2943 = vmatmul.f32.vlgmr.msra.gmra.mxu3 %v4754_v48  ;;  %v4780_v19 = vld [vmem:[%s5265_s15 + $0x630] sm:$0xff]  ;;  %v2330_v48 = vunpack.c.h.bf16 %v4782_v26 }
 0x2b0   : > { %2948 = vmatpush.msrb.mxu0 %v2282_v28  ;;  %2967 = vmatpush.msrb.mxu1 %v2316_v14  ;;  %v4775_v28 = vld [vmem:[%s5265_s15 + $0x7c8] sm:$0xff]  ;;  %v2268_v14 = vunpack.c.h.bf16 %v4776_v56  ;;  %v2266_v2 = vunpack.c.h.bf16 %v4780_v19  ;;  %v4804_v56 = vld [vmem:[%s5265_s15 + $0x600] sm:$0xff] }
 0x2b1   : > { %2988 = vmatpush.msrb.mxu2 %v2346_v29  ;;  %3007 = vmatpush.msrb.mxu3 %v2380_v38  ;;  %v2368_v40 = vunpack.c.h.bf16 %v4775_v28  ;;  %v2302_v29 = vunpack.c.h.bf16 %v4777_v5  ;;  %v2332_v38 = vunpack.c.h.bf16 %v4778_v24  ;;  %v4803_v28 = vld [vmem:[%s5265_s15 + $0x790] sm:$0xff]  ;;  %v4805_v5 = vld [vmem:[%s5265_s15 + $0x688] sm:$0xff]  ;;  %v4806_v24 = vld [vmem:[%s5265_s15 + $0x700] sm:$0xff] }
 0x2b2   : > { %2949 = vmatpush.msrb.mxu0 %v2280_v58  ;;  %2968 = vmatpush.msrb.mxu1 %v2314_v15  ;;  %v4779_v58 = vld [vmem:[%s5265_s15 + $0x7c0] sm:$0xff]  ;;  %v2585_v15 = vadd.f32 %v2584_v50, %v2565_v30 }
 0x2b3   : > { %2989 = vmatpush.msrb.mxu2 %v2344_v39  ;;  %3008 = vmatpush.msrb.mxu3 %v2378_v31  ;;  %v2366_v18 = vunpack.c.h.bf16 %v4779_v58  ;;  %v2300_v39 = vunpack.c.h.bf16 %v4781_v21  ;;  %v2364_v31 = vunpack.c.h.bf16 %v4783_v11 }
 0x2b4   : > { %2950 = vmatpush.msrb.mxu0 %v2278_v63  ;;  %2969 = vmatpush.msrb.mxu1 %v2312_v20  ;;  %v2264_v63 = vunpack.c.h.bf16 %v4784_v51  ;;  %v2605_v32 = vadd.f32 %v2604_v6, %v2585_v15  ;;  %v4785_v20 = vld [vmem:[%s5265_s15 + $0x6b0] sm:$0xff]  ;;  %v3183_v6 = vld [vmem:[%s5273_s1 + $0x1e0] sm:$0xff] }
 0x2b5   : > { %2990 = vmatpush.msrb.mxu2 %v2342_v4  ;;  %3009 = vmatpush.msrb.mxu3 %v2376_v59  ;;  %v2298_v0 = vunpack.c.h.bf16 %v4785_v20  ;;  %v4786_v4 = vld [vmem:[%s5265_s15 + $0x728] sm:$0xff]  ;;  %v2624_v59 = vpop.f32.mrf.mxu3  ;;  %v4808_v15 = vld [vmem:[%s5265_s15 + $0x680] sm:$0xff]  ;;  %v3372_v51 = vunpack.c.h.bf16 %v3183_v6  ;;  %v4810_v20 = vld [vmem:[#allocation2 + $0x60] sm:$0xff] }
 0x2b6   : > { %2951 = vmatpush.msrb.mxu0 %v2276_v37  ;;  %2970 = vmatpush.msrb.mxu1 %v2310_v16  ;;  %v2328_v42 = vunpack.c.h.bf16 %v4786_v4  ;;  %v2362_v37 = vunpack.c.h.bf16 %v4787_v36  ;;  %v4789_v16 = vld [vmem:[%s5265_s15 + $0x6a8] sm:$0xff]  ;;  %v2625_v49 = vadd.f32 %v2624_v59, %v2605_v32  ;;  %v2286_v21 = vunpack.c.h.bf16 %v4808_v15 }
 0x2b7   : > { %2991 = vmatpush.msrb.mxu2 %v2340_v7  ;;  %3010 = vmatpush.msrb.mxu3 %v2374_v45  ;;  %v2296_v43 = vunpack.c.h.bf16 %v4789_v16  ;;  %v4790_v7 = vld [vmem:[%s5265_s15 + $0x720] sm:$0xff]  ;;  %v2360_v45 = vunpack.c.h.bf16 %v4791_v13 }
 0x2b8   : > { %2952 = vmatpush.msrb.mxu0 %v2274_v53  ;;  %2971 = vmatpush.msrb.mxu1 %v2308_v9  ;;  %v2326_v33 = vunpack.c.h.bf16 %v4790_v7  ;;  %v2260_v53 = vunpack.c.h.bf16 %v4792_v25  ;;  %v4793_v9 = vld [vmem:[%s5265_s15 + $0x6a0] sm:$0xff]  ;;  %v4813_v7 = vld [vmem:[#allocation2 + $0x28] sm:$0xff] }
 0x2b9   : > { %2992 = vmatpush.msrb.mxu2 %v2338_v10  ;;  %3011 = vmatpush.msrb.mxu3 %v2372_v52  ;;  %v2294_v61 = vunpack.c.h.bf16 %v4793_v9  ;;  %v4794_v10 = vld [vmem:[%s5265_s15 + $0x718] sm:$0xff]  ;;  %v4795_v52 = vld [vmem:[%s5265_s15 + $0x7a0] sm:$0xff] }
 0x2ba   : > { %2953 = vmatpush.msrb.mxu0 %v2272_v46  ;;  %2972 = vmatpush.msrb.mxu1 %v2306_v57  ;;  %v2324_v3 = vunpack.c.h.bf16 %v4794_v10  ;;  %v2358_v62 = vunpack.c.h.bf16 %v4795_v52  ;;  %v4796_v46 = vld [vmem:[%s5265_s15 + $0x610] sm:$0xff]  ;;  %v2292_v57 = vunpack.c.h.bf16 %v4797_v22  ;;  %v3171_v36 = vld [vmem:[%s5273_s1 + $0x180] sm:$0xff] }
 0x2bb   : > { %2993 = vmatpush.msrb.mxu2 %v2336_v1  ;;  %3012 = vmatpush.msrb.mxu3 %v2370_v54  ;;  %v2258_v12 = vunpack.c.h.bf16 %v4796_v46  ;;  %v2322_v1 = vunpack.c.h.bf16 %v4798_v27  ;;  %v4799_v54 = vld [vmem:[%s5265_s15 + $0x798] sm:$0xff]  ;;  %v3163_v25 = vld [vmem:[%s5273_s1 + $0x140] sm:$0xff] }
 0x2bc   : > { %2954 = vmatpush.msrb.mxu0 %v2270_v8  ;;  %2973 = vmatpush.msrb.mxu1 %v2304_v23  ;;  %v2356_v47 = vunpack.c.h.bf16 %v4799_v54  ;;  %v4800_v8 = vld [vmem:[%s5265_s15 + $0x608] sm:$0xff]  ;;  %v4801_v23 = vld [vmem:[%s5265_s15 + $0x690] sm:$0xff]  ;;  %v3332_v52 = vunpack.c.h.bf16 %v3163_v25 }
 0x2bd   : > { %2994 = vmatpush.msrb.mxu2 %v2334_v60  ;;  %3013 = vmatpush.msrb.mxu3 %v2368_v40  ;;  %v2256_v30 = vunpack.c.h.bf16 %v4800_v8  ;;  %v2290_v55 = vunpack.c.h.bf16 %v4801_v23  ;;  %v4802_v60 = vld [vmem:[%s5265_s15 + $0x708] sm:$0xff]  ;;  %v2354_v40 = vunpack.c.h.bf16 %v4803_v28 }
 0x2be   : > { %2955 = vmatpush.msrb.mxu0 %v2268_v14  ;;  %2974 = vmatpush.msrb.mxu1 %v2302_v29  ;;  %v2320_v50 = vunpack.c.h.bf16 %v4802_v60  ;;  %v2254_v14 = vunpack.c.h.bf16 %v4804_v56  ;;  %v2288_v29 = vunpack.c.h.bf16 %v4805_v5  ;;  %v3151_v27 = vld [vmem:[%s5273_s1 + $0xe0] sm:$0xff] }
 0x2bf   : > { %2995 = vmatpush.msrb.mxu2 %v2332_v38  ;;  %3014 = vmatpush.msrb.mxu3 %v2366_v18  ;;  %v2318_v38 = vunpack.c.h.bf16 %v4806_v24  ;;  %v4807_v18 = vld [vmem:[%s5265_s15 + $0x788] sm:$0xff] }
 0x2c0   : > { %2956 = vmatpush.msrb.mxu0 %v2266_v2  ;;  %2975 = vmatpush.msrb.mxu1 %v2300_v39  ;;  %v2352_v19 = vunpack.c.h.bf16 %v4807_v18  ;;  %v3179_v39 = vld [vmem:[%s5273_s1 + $0x1c0] sm:$0xff] }
 0x2c1   : > { %2996 = vmatpush.msrb.mxu2 %v2330_v48  ;;  %3015 = vmatpush.msrb.mxu3 %v2364_v31  ;;  %v4809_v48 = vld [vmem:[%s5265_s15 + $0x780] sm:$0xff]  ;;  %v3371_v31 = vunpack.c.l.bf16 %v3183_v6  ;;  %v3364_v59 = vunpack.c.h.bf16 %v3179_v39 }
 0x2c2   : > { %2957 = vmatpush.msrb.mxu0 %v2264_v63  ;;  %2976 = vmatpush.msrb.mxu1 %v2298_v0  ;;  %v2350_v11 = vunpack.c.h.bf16 %v4809_v48  ;;  %v3175_v63 = vld [vmem:[%s5273_s1 + $0x1a0] sm:$0xff]  ;;  %v3363_v0 = vunpack.c.l.bf16 %v3179_v39 }
 0x2c3   : > { %2997 = vmatpush.msrb.mxu2 %v2328_v42  ;;  %v2644_v35 = vpop.f32.mrf.mxu0  ;;  %3016 = vmatpush.msrb.mxu3 %v2362_v37  ;;  %v4811_v42 = vld [vmem:[#allocation2 + $0x78] sm:$0xff]  ;;  %v3355_v37 = vunpack.c.l.bf16 %v3175_v63  ;;  %v3356_v16 = vunpack.c.h.bf16 %v3175_v63 }
 0x2c4   : > { %2958 = vmatpush.msrb.mxu0 %v2262_v41  ;;  %2977 = vmatpush.msrb.mxu1 %v2296_v43  ;;  %v2645_v34 = vadd.f32 %v2644_v35, %v2625_v49  ;;  %v4812_v41 = vld [vmem:[#allocation2 + $0x70] sm:$0xff]  ;;  %v3331_v35 = vunpack.c.l.bf16 %v3163_v25 }
 0x2c5   : > { %2998 = vmatpush.msrb.mxu2 %v2326_v33  ;;  %3017 = vmatpush.msrb.mxu3 %v2360_v45  ;;  %v3167_v43 = vld [vmem:[%s5273_s1 + $0x160] sm:$0xff]  ;;  %v3347_v33 = vunpack.c.l.bf16 %v3171_v36  ;;  %v3348_v45 = vunpack.c.h.bf16 %v3171_v36  ;;  %v3180_v36 = vld [vmem:[%s5273_s1 + $0x1c8] sm:$0xff] }
 0x2c6   : > { %2959 = vmatpush.msrb.mxu0 %v2260_v53  ;;  %v2664_v44 = vpop.f32.mrf.mxu1  ;;  %2978 = vmatpush.msrb.mxu1 %v2294_v61  ;;  %v3339_v49 = vunpack.c.l.bf16 %v3167_v43  ;;  %v3340_v9 = vunpack.c.h.bf16 %v3167_v43  ;;  %v3159_v61 = vld [vmem:[%s5273_s1 + $0x120] sm:$0xff]  ;;  %v3176_v43 = vld [vmem:[%s5273_s1 + $0x1a8] sm:$0xff] }
 0x2c7   : > { %2999 = vmatpush.msrb.mxu2 %v2324_v3  ;;  %3018 = vmatpush.msrb.mxu3 %v2358_v62  ;;  %v2665_v58 = vadd.f32 %v2664_v44, %v2645_v34  ;;  %v3155_v62 = vld [vmem:[%s5273_s1 + $0x100] sm:$0xff]  ;;  %v3323_v22 = vunpack.c.l.bf16 %v3159_v61  ;;  %v3307_v44 = vunpack.c.l.bf16 %v3151_v27  ;;  %v3357_v25 = vunpack.c.l.bf16 %v3176_v43 }
 0x2c8   : > { %2960 = vmatpush.msrb.mxu0 %v2258_v12  ;;  %2979 = vmatpush.msrb.mxu1 %v2292_v57  ;;  %v3324_v57 = vunpack.c.h.bf16 %v3159_v61  ;;  %v3315_v54 = vunpack.c.l.bf16 %v3155_v62  ;;  %v3147_v8 = vld [vmem:[%s5273_s1 + $0xc0] sm:$0xff]  ;;  %v3168_v61 = vld [vmem:[%s5273_s1 + $0x168] sm:$0xff] }
 0x2c9   : > { %3000 = vmatpush.msrb.mxu2 %v2322_v1  ;;  %3019 = vmatpush.msrb.mxu3 %v2356_v47  ;;  %v2684_v2 = vpop.f32.mrf.mxu2  ;;  %v3316_v47 = vunpack.c.h.bf16 %v3155_v62  ;;  %v3143_v60 = vld [vmem:[%s5273_s1 + $0xa0] sm:$0xff]  ;;  %v3299_v28 = vunpack.c.l.bf16 %v3147_v8 }
 0x2ca   : > { %2961 = vmatpush.msrb.mxu0 %v2256_v30  ;;  %2980 = vmatpush.msrb.mxu1 %v2290_v55  ;;  %v2685_v26 = vadd.f32 %v2684_v2, %v2665_v58  ;;  %v3308_v55 = vunpack.c.h.bf16 %v3151_v27  ;;  %v3139_v56 = vld [vmem:[%s5273_s1 + $0x80] sm:$0xff]  ;;  %v3291_v5 = vunpack.c.l.bf16 %v3143_v60  ;;  %v3292_v24 = vunpack.c.h.bf16 %v3143_v60  ;;  %v3152_v60 = vld [vmem:[%s5273_s1 + $0xe8] sm:$0xff] }
 0x2cb   : > { %3001 = vmatpush.msrb.mxu2 %v2320_v50  ;;  %3020 = vmatpush.msrb.mxu3 %v2354_v40  ;;  %v3300_v40 = vunpack.c.h.bf16 %v3147_v8  ;;  %v3283_v58 = vunpack.c.l.bf16 %v3139_v56  ;;  %v3284_v18 = vunpack.c.h.bf16 %v3139_v56  ;;  %v3156_v8 = vld [vmem:[%s5273_s1 + $0x108] sm:$0xff] }
 0x2cc   : > { %2962 = vmatpush.msrb.mxu0 %v2254_v14  ;;  %2981 = vmatpush.msrb.mxu1 %v2288_v29  ;;  %v2704_v32 = vpop.f32.mrf.mxu3 }
 0x2cd   : > { %3002 = vmatpush.msrb.mxu2 %v2318_v38  ;;  %3021 = vmatpush.msrb.mxu3 %v2352_v19  ;;  %v6383_v4 = vadd.f32 %v2704_v32, %v2685_v26  ;;  %v3135_v38 = vld [vmem:[%s5273_s1 + $0x60] sm:$0xff] }
 0x2ce   : > { %2963 = vmatmul.f32.vlgmr.msrb.gmra.mxu0 %v4810_v20  ;;  %3003 = vmatmul.f32.vlgmr.msrb.gmra.mxu2 %v4811_v42  ;;  %v3131_v19 = vld [vmem:[%s5273_s1 + $0x40] sm:$0xff]  ;;  %v3275_v15 = vunpack.c.l.bf16 %v3135_v38  ;;  %v3276_v39 = vunpack.c.h.bf16 %v3135_v38  ;;  %v3184_v20 = vld [vmem:[%s5273_s1 + $0x1e8] sm:$0xff]  ;;  %v3310_v38 = vunpack.c.h.bf16 %v3152_v60 }
 0x2cf   : > { %2982 = vmatpush.msrb.mxu1 %v2286_v21  ;;  %3022 = vmatpush.msrb.mxu3 %v2350_v11  ;;  %v6387_v17 = vmul.f32 0.70710677, %v6383_v4  ;;  %v3127_v26 = vld [vmem:[%s5273_s1 + $0x20] sm:$0xff]  ;;  %v3267_v11 = vunpack.c.l.bf16 %v3131_v19 }
 0x2d0   : > { %3507 = vmatpush.msra.mxu0 %v3371_v31  ;;  %3547 = vmatpush.msra.mxu2 %v3372_v51  ;;  %v3268_v31 = vunpack.c.h.bf16 %v3131_v19  ;;  %v3123_v51 = vld [vmem:[%s5273_s1] sm:$0xff]  ;;  %v3259_v32 = vunpack.c.l.bf16 %v3127_v26  ;;  %v3260_v42 = vunpack.c.h.bf16 %v3127_v26  ;;  %v3140_v19 = vld [vmem:[%s5273_s1 + $0x88] sm:$0xff] }
 0x2d1   : > { %2983 = vmatmul.f32.vlgmr.msrb.gmra.mxu1 %v4812_v41  ;;  %3023 = vmatmul.f32.vlgmr.msrb.gmra.mxu3 %v4813_v7  ;;  %v3031_v13 = vmul.f32 %v6387_v17, %v6387_v17  ;;  %v3373_v41 = vunpack.c.l.bf16 %v3184_v20  ;;  %v3136_v26 = vld [vmem:[%s5273_s1 + $0x68] sm:$0xff] }
 0x2d2   : > { %3508 = vmatpush.msra.mxu0 %v3363_v0  ;;  %3548 = vmatpush.msra.mxu2 %v3364_v59  ;;  %v3251_v59 = vunpack.c.l.bf16 %v3123_v51 }
 0x2d3   : > { %v6393_v53 = vmin.f32 %v3031_v13, 16.0  ;;  %v3366_v13 = vunpack.c.h.bf16 %v3180_v36 }
 0x2d4   : > { %3509 = vmatpush.msra.mxu0 %v3355_v37  ;;  %3549 = vmatpush.msra.mxu2 %v3356_v16  ;;  %v3252_v37 = vunpack.c.h.bf16 %v3123_v51  ;;  %v3374_v16 = vunpack.c.h.bf16 %v3184_v20  ;;  %v3132_v51 = vld [vmem:[%s5273_s1 + $0x48] sm:$0xff] }
 0x2d5   : > { %v3033_v10 = vmul.f32 2.1237322e-06, %v6393_v53  ;;  %v3044_v3 = vmul.f32 3.8918573e-05, %v6393_v53  ;;  %v3269_v20 = vunpack.c.l.bf16 %v3132_v51 }
 0x2d6   : > { %3510 = vmatpush.msra.mxu0 %v3347_v33  ;;  %3550 = vmatpush.msra.mxu2 %v3348_v45  ;;  %v3365_v33 = vunpack.c.l.bf16 %v3180_v36  ;;  %v3172_v45 = vld [vmem:[%s5273_s1 + $0x188] sm:$0xff]  ;;  %v3185_v36 = vld [vmem:[%s5273_s1 + $0x1f0] sm:$0xff] }
 0x2d7   : > { %v3034_v46 = vadd.f32 0.00028619796, %v3033_v10  ;;  %v3045_v12 = vadd.f32 0.001143296, %v3044_v3  ;;  %v3350_v62 = vunpack.c.h.bf16 %v3172_v45 }
 0x2d8   : > { %3511 = vmatpush.msra.mxu0 %v3339_v49  ;;  %3551 = vmatpush.msra.mxu2 %v3340_v9  ;;  %v3358_v9 = vunpack.c.h.bf16 %v3176_v43 }
 0x2d9   : > { %v3035_v1 = vmul.f32 %v3034_v46, %v6393_v53  ;;  %v3046_v34 = vmul.f32 %v3045_v12, %v6393_v53  ;;  %v3341_v12 = vunpack.c.l.bf16 %v3168_v61 }
 0x2da   : > { %3512 = vmatpush.msra.mxu0 %v3331_v35  ;;  %3552 = vmatpush.msra.mxu2 %v3332_v52  ;;  %v3349_v35 = vunpack.c.l.bf16 %v3172_v45  ;;  %v3164_v52 = vld [vmem:[%s5273_s1 + $0x148] sm:$0xff] }
 0x2db   : > { %v3047_v30 = vadd.f32 0.014752088, %v3046_v34  ;;  %v3036_v23 = vadd.f32 0.0036580483, %v3035_v1  ;;  %v3333_v27 = vunpack.c.l.bf16 %v3164_v52  ;;  %v3160_v1 = vld [vmem:[%s5273_s1 + $0x128] sm:$0xff] }
 0x2dc   : > { %3513 = vmatpush.msra.mxu0 %v3323_v22  ;;  %3553 = vmatpush.msra.mxu2 %v3324_v57  ;;  %v3342_v57 = vunpack.c.h.bf16 %v3168_v61 }
 0x2dd   : > { %v3048_v50 = vmul.f32 %v3047_v30, %v6393_v53  ;;  %v3037_v29 = vmul.f32 %v3036_v23, %v6393_v53 }
 0x2de   : > { %3514 = vmatpush.msra.mxu0 %v3315_v54  ;;  %3554 = vmatpush.msra.mxu2 %v3316_v47  ;;  %v3334_v47 = vunpack.c.h.bf16 %v3164_v52  ;;  %v3165_v52 = vld [vmem:[%s5273_s1 + $0x150] sm:$0xff] }
 0x2df   : > { %v3049_v14 = vadd.f32 0.112945676, %v3048_v50  ;;  %v3038_v21 = vadd.f32 0.05243302, %v3037_v29 }
 0x2e0   : > { %3515 = vmatpush.msra.mxu0 %v3307_v44  ;;  %3555 = vmatpush.msra.mxu2 %v3308_v55  ;;  %v3325_v44 = vunpack.c.l.bf16 %v3160_v1  ;;  %v3326_v55 = vunpack.c.h.bf16 %v3160_v1 }
 0x2e1   : > { %v3050_v6 = vmul.f32 %v3049_v14, %v6393_v53  ;;  %v3039_v0 = vmul.f32 %v3038_v21, %v6393_v53  ;;  %v3318_v14 = vunpack.c.h.bf16 %v3156_v8 }
 0x2e2   : > { %3516 = vmatpush.msra.mxu0 %v3299_v28  ;;  %3556 = vmatpush.msra.mxu2 %v3300_v40  ;;  %v3317_v40 = vunpack.c.l.bf16 %v3156_v8  ;;  %v3149_v8 = vld [vmem:[%s5273_s1 + $0xd0] sm:$0xff] }
 0x2e3   : > { %v3051_v2 = vadd.f32 0.4994258, %v3050_v6  ;;  %v3040_v7 = vadd.f32 0.18741608, %v3039_v0  ;;  %v3144_v6 = vld [vmem:[%s5273_s1 + $0xa8] sm:$0xff]  ;;  %v3270_v0 = vunpack.c.h.bf16 %v3132_v51  ;;  %v3186_v51 = vld [vmem:[%s5273_s1 + $0x1f8] sm:$0xff] }
 0x2e4   : > { %3517 = vmatpush.msra.mxu0 %v3291_v5  ;;  %3557 = vmatpush.msra.mxu2 %v3292_v24  ;;  %v3148_v5 = vld [vmem:[%s5273_s1 + $0xc8] sm:$0xff]  ;;  %v3309_v24 = vunpack.c.l.bf16 %v3152_v60  ;;  %v3293_v21 = vunpack.c.l.bf16 %v3144_v6  ;;  %v3304_v60 = vunpack.c.h.bf16 %v3149_v8 }
 0x2e5   : > { %v3052_v48 = vmul.f32 %v3051_v2, %v6393_v53  ;;  %v3041_v10 = vmul.f32 %v3040_v7, %v6393_v53  ;;  %v3027_v2 = vmul.f32 0.5, %v6383_v4  ;;  %v3278_v4 = vunpack.c.h.bf16 %v3136_v26 }
 0x2e6   : > { %3518 = vmatpush.msra.mxu0 %v3283_v58  ;;  %3558 = vmatpush.msra.mxu2 %v3284_v18  ;;  %v3301_v18 = vunpack.c.l.bf16 %v3148_v5  ;;  %v3375_v7 = vunpack.c.l.bf16 %v3185_v36 }
 0x2e7   : > { %v6413_v63 = vadd.f32 1.0, %v3052_v48  ;;  %v3042_v34 = vadd.f32 1.1283791, %v3041_v10  ;;  %v3169_v10 = vld [vmem:[%s5273_s1 + $0x170] sm:$0xff] }
 0x2e8   : > { %3519 = vmatpush.msra.mxu0 %v3275_v15  ;;  %3559 = vmatpush.msra.mxu2 %v3276_v39  ;;  %v3294_v39 = vunpack.c.h.bf16 %v3144_v6  ;;  %v3133_v6 = vld [vmem:[%s5273_s1 + $0x50] sm:$0xff] }
 0x2e9   : > { %4538 = vrcp.f32 %v6413_v63  ;;  %v3065_v22 = vand.u32 2147483648, %v6413_v63  ;;  %v3063_v54 = vand.u32 2147483647, %v6413_v63  ;;  %vm3059_vm2 = vweird.f32 %v6413_v63 }
 0x2ea   : > { %3520 = vmatpush.msra.mxu0 %v3267_v11  ;;  %3560 = vmatpush.msra.mxu2 %v3268_v31  ;;  %v3043_v50 = vmul.f32 %v3042_v34, %v6387_v17  ;;  %v3302_v17 = vunpack.c.h.bf16 %v3148_v5  ;;  %v3285_v11 = vunpack.c.l.bf16 %v3140_v19  ;;  %v3286_v31 = vunpack.c.h.bf16 %v3140_v19  ;;  %v3137_v5 = vld [vmem:[%s5273_s1 + $0x70] sm:$0xff] }
 0x2eb   : > { %v3066_v23 = vor.u32 1.1754944e-38, %v3065_v22  ;;  %vm3064_vm4 = vcmp.eq.f32.partialorder %v3063_v54, 8.507059e+37  ;;  %v3335_v22 = vunpack.c.l.bf16 %v3165_v52  ;;  %v3129_v19 = vld [vmem:[%s5273_s1 + $0x30] sm:$0xff] }
 0x2ec   : > { %3521 = vmatpush.msra.mxu0 %v3259_v32  ;;  %3561 = vmatpush.msra.mxu2 %v3260_v42  ;;  %v3128_v32 = vld [vmem:[%s5273_s1 + $0x28] sm:$0xff] }
 0x2ed   : > { %v3124_v42 = vld [vmem:[%s5273_s1 + $0x8] sm:$0xff] }
 0x2ee   : > { %3522 = vmatpush.msra.mxu0 %v3251_v59  ;;  %3562 = vmatpush.msra.mxu2 %v3252_v37  ;;  %v3261_v59 = vunpack.c.l.bf16 %v3128_v32  ;;  %v3262_v37 = vunpack.c.h.bf16 %v3128_v32  ;;  %v3254_v43 = vunpack.c.h.bf16 %v3124_v42 }
 0x2ef   : > { %v4539_v49 = vpop.eup %4538 }
 0x2f0   : > { %3587 = vmatpush.msrb.mxu0 %v3373_v41  ;;  %3627 = vmatpush.msrb.mxu2 %v3374_v16  ;;  %v3055_v3 = vmul.f32 %v4539_v49, %v6413_v63  ;;  %vm3060_vm1 = vweird.f32 %v4539_v49  ;;  %v3277_v63 = vunpack.c.l.bf16 %v3136_v26  ;;  %v3253_v41 = vunpack.c.l.bf16 %v3124_v42  ;;  %v3181_v16 = vld [vmem:[%s5273_s1 + $0x1d0] sm:$0xff] }
 0x2f1   : > { %vm3061_vm3 = vmor %vm3059_vm2, %vm3060_vm1  ;;  %v3367_v45 = vunpack.c.l.bf16 %v3181_v16  ;;  %v3263_v26 = vunpack.c.l.bf16 %v3129_v19 }
 0x2f2   : > { %3588 = vmatpush.msrb.mxu0 %v3365_v33  ;;  %3628 = vmatpush.msrb.mxu2 %v3366_v13  ;;  %v3056_v46 = vsub.f32 1.0, %v3055_v3  ;;  %v3376_v33 = vunpack.c.h.bf16 %v3185_v36  ;;  %v3177_v13 = vld [vmem:[%s5273_s1 + $0x1b0] sm:$0xff]  ;;  %v3178_v36 = vld [vmem:[%s5273_s1 + $0x1b8] sm:$0xff] }
 0x2f3   : > { %v3360_v61 = vunpack.c.h.bf16 %v3177_v13 }
 0x2f4   : > { %3589 = vmatpush.msrb.mxu0 %v3357_v25  ;;  %3629 = vmatpush.msrb.mxu2 %v3358_v9  ;;  %v3057_v53 = vmul.f32 %v4539_v49, %v3056_v46  ;;  %v3368_v25 = vunpack.c.h.bf16 %v3181_v16  ;;  %v3359_v9 = vunpack.c.l.bf16 %v3177_v13  ;;  %v3344_v46 = vunpack.c.h.bf16 %v3169_v10  ;;  %v3174_v13 = vld [vmem:[%s5273_s1 + $0x198] sm:$0xff] }
 0x2f6   : > { %3590 = vmatpush.msrb.mxu0 %v3349_v35  ;;  %3630 = vmatpush.msrb.mxu2 %v3350_v62  ;;  %v3058_v30 = vadd.f32 %v4539_v49, %v3057_v53  ;;  %v3343_v62 = vunpack.c.l.bf16 %v3169_v10  ;;  %v3153_v53 = vld [vmem:[%s5273_s1 + $0xf0] sm:$0xff]  ;;  %v3362_v10 = vunpack.c.h.bf16 %v3178_v36 }
 0x2f8   : > { %3591 = vmatpush.msrb.mxu0 %v3341_v12  ;;  %3631 = vmatpush.msrb.mxu2 %v3342_v57  ;;  %v3062_v28 = vsel %vm3061_vm3, %v4539_v49, %v3058_v30  ;;  %v3173_v49 = vld [vmem:[%s5273_s1 + $0x190] sm:$0xff]  ;;  %v3336_v57 = vunpack.c.h.bf16 %v3165_v52  ;;  %v3311_v30 = vunpack.c.l.bf16 %v3153_v53 }
 0x2f9   : > { %v3067_v56 = vsel %vm3064_vm4, %v3066_v23, %v3062_v28  ;;  %v3351_v3 = vunpack.c.l.bf16 %v3173_v49  ;;  %v3352_v35 = vunpack.c.h.bf16 %v3173_v49  ;;  %v3161_v12 = vld [vmem:[%s5273_s1 + $0x130] sm:$0xff] }
 0x2fa   : > { %3592 = vmatpush.msrb.mxu0 %v3333_v27  ;;  %3632 = vmatpush.msrb.mxu2 %v3334_v47  ;;  %v3068_v29 = vmul.f32 %v3067_v56, %v3043_v50  ;;  %v3157_v27 = vld [vmem:[%s5273_s1 + $0x110] sm:$0xff]  ;;  %v3327_v1 = vunpack.c.l.bf16 %v3161_v12  ;;  %v3328_v34 = vunpack.c.h.bf16 %v3161_v12 }
 0x2fb   : > { %v3319_v54 = vunpack.c.l.bf16 %v3157_v27  ;;  %v3320_v47 = vunpack.c.h.bf16 %v3157_v27  ;;  %v3145_v23 = vld [vmem:[%s5273_s1 + $0xb0] sm:$0xff]  ;;  %v3235_v27 = vld [vmem:[%s5273_s1 + $0x380] sm:$0xff] }
 0x2fc   : > { %3593 = vmatpush.msrb.mxu0 %v3325_v44  ;;  %3633 = vmatpush.msrb.mxu2 %v3326_v55  ;;  %v4403_v58 = vclamps-f32 %v3068_v29, 1.0  ;;  %v3312_v44 = vunpack.c.h.bf16 %v3153_v53  ;;  %v3303_v55 = vunpack.c.l.bf16 %v3149_v8  ;;  %v3141_v50 = vld [vmem:[%s5273_s1 + $0x90] sm:$0xff]  ;;  %v3295_v28 = vunpack.c.l.bf16 %v3145_v23  ;;  %v3162_v8 = vld [vmem:[%s5273_s1 + $0x138] sm:$0xff] }
 0x2fd   : > { %v3476_v53 = vunpack.c.h.bf16 %v3235_v27 }
 0x2fe   : > { %3594 = vmatpush.msrb.mxu0 %v3317_v40  ;;  %3634 = vmatpush.msrb.mxu2 %v3318_v14  ;;  %v3111_v15 = vadd.f32 1.0, %v4403_v58  ;;  %v4814_v40 = vld [vmem:[%s5271_s30] sm:$0x3]  ;;  %v3296_v14 = vunpack.c.h.bf16 %v3145_v23  ;;  %v3279_v58 = vunpack.c.l.bf16 %v3137_v5 }
 0x2ff   : > { %v2384_v56 = vperm.slane %v4814_v40, 1  ;;  %v3227_v40 = vld [vmem:[%s5273_s1 + $0x340] sm:$0xff] }
 0x300   : > { %3595 = vmatpush.msrb.mxu0 %v3309_v24  ;;  %3635 = vmatpush.msrb.mxu2 %v3310_v38  ;;  %v6437_v48 = vmul.f32 %v3111_v15, %v3027_v2  ;;  %v3287_v24 = vunpack.c.l.bf16 %v3141_v50  ;;  %v3288_v38 = vunpack.c.h.bf16 %v3141_v50  ;;  %v3271_v15 = vunpack.c.l.bf16 %v3133_v6 }
 0x302   : > { %3596 = vmatpush.msrb.mxu0 %v3301_v18  ;;  %3636 = vmatpush.msrb.mxu2 %v3302_v17  ;;  %v3280_v17 = vunpack.c.h.bf16 %v3137_v5  ;;  %v3460_v5 = vunpack.c.h.bf16 %v3227_v40 }
 0x303   : > { %3563 = vmatmul.f32.vlgmr.msra.gmra.mxu2 %v6437_v48  ;;  %3523 = vmatmul.f32.vlgmr.msra.gmra.mxu0 %v6437_v48 }
 0x304   : > { %3597 = vmatpush.msrb.mxu0 %v3293_v21  ;;  %3637 = vmatpush.msrb.mxu2 %v3294_v39  ;;  %v3272_v21 = vunpack.c.h.bf16 %v3133_v6  ;;  %v3125_v39 = vld [vmem:[%s5273_s1 + $0x10] sm:$0xff]  ;;  %v3223_v6 = vld [vmem:[%s5273_s1 + $0x320] sm:$0xff] }
 0x305   : > { %v2724_v29 = vpop.f32.mrf.mxu0  ;;  %v3256_v32 = vunpack.c.h.bf16 %v3125_v39 }
 0x306   : > { %3598 = vmatpush.msrb.mxu0 %v3285_v11  ;;  %3638 = vmatpush.msrb.mxu2 %v3286_v31  ;;  %v2725_v18 = vadd.f32 %v2724_v29, %v2384_v56  ;;  %v3264_v31 = vunpack.c.h.bf16 %v3129_v19  ;;  %v3329_v56 = vunpack.c.l.bf16 %v3162_v8  ;;  %v3452_v19 = vunpack.c.h.bf16 %v3223_v6 }
 0x308   : > { %3599 = vmatpush.msrb.mxu0 %v3277_v63  ;;  %3639 = vmatpush.msrb.mxu2 %v3278_v4  ;;  %v2744_v2 = vpop.f32.mrf.mxu1  ;;  %v3255_v4 = vunpack.c.l.bf16 %v3125_v39 }
 0x309   : > { %v2745_v11 = vadd.f32 %v2744_v2, %v2725_v18 }
 0x30a   : > { %3600 = vmatpush.msrb.mxu0 %v3269_v20  ;;  %3640 = vmatpush.msrb.mxu2 %v3270_v0  ;;  %v3182_v20 = vld [vmem:[%s5273_s1 + $0x1d8] sm:$0xff]  ;;  %v3377_v0 = vunpack.c.l.bf16 %v3186_v51 }
 0x30b   : > { %v2764_v63 = vpop.f32.mrf.mxu2  ;;  %v3369_v16 = vunpack.c.l.bf16 %v3182_v20 }
 0x30c   : > { %3601 = vmatpush.msrb.mxu0 %v3261_v59  ;;  %3641 = vmatpush.msrb.mxu2 %v3262_v37  ;;  %v2765_v42 = vadd.f32 %v2764_v63, %v2745_v11  ;;  %v3378_v59 = vunpack.c.h.bf16 %v3186_v51  ;;  %v3247_v37 = vld [vmem:[%s5273_s1 + $0x3e0] sm:$0xff]  ;;  %v3146_v63 = vld [vmem:[%s5273_s1 + $0xb8] sm:$0xff] }
 0x30e   : > { %3602 = vmatpush.msrb.mxu0 %v3253_v41  ;;  %3642 = vmatpush.msrb.mxu2 %v3254_v43  ;;  %v2784_v41 = vpop.f32.mrf.mxu3  ;;  %v3499_v43 = vunpack.c.l.bf16 %v3247_v37 }
 0x30f   : > { %3603 = vmatmul.f32.vlgmr.msrb.gmra.mxu0 %v6437_v48  ;;  %3643 = vmatmul.f32.vlgmr.msrb.gmra.mxu2 %v6437_v48 }
 0x310   : > { %3667 = vmatpush.msra.mxu0 %v3375_v7  ;;  %3707 = vmatpush.msra.mxu2 %v3376_v33  ;;  %v3500_v7 = vunpack.c.h.bf16 %v3247_v37  ;;  %v3370_v33 = vunpack.c.h.bf16 %v3182_v20  ;;  %v3211_v37 = vld [vmem:[%s5273_s1 + $0x2c0] sm:$0xff] }
 0x311   : > { %3527 = vmatpush.msra.mxu1 %v3499_v43  ;;  %v2804_v52 = vpop.f32.mrf.mxu0  ;;  %v3427_v43 = vunpack.c.l.bf16 %v3211_v37 }
 0x312   : > { %3668 = vmatpush.msra.mxu0 %v3367_v45  ;;  %3708 = vmatpush.msra.mxu2 %v3368_v25  ;;  %v3243_v45 = vld [vmem:[%s5273_s1 + $0x3c0] sm:$0xff]  ;;  %v3361_v25 = vunpack.c.l.bf16 %v3178_v36  ;;  %v3142_v36 = vld [vmem:[%s5273_s1 + $0x98] sm:$0xff] }
 0x313   : > { %v3491_v49 = vunpack.c.l.bf16 %v3243_v45  ;;  %3567 = vmatpush.msra.mxu3 %v3500_v7  ;;  %v3428_v7 = vunpack.c.h.bf16 %v3211_v37 }
 0x314   : > { %3669 = vmatpush.msra.mxu0 %v3359_v9  ;;  %3709 = vmatpush.msra.mxu2 %v3360_v61  ;;  %v3492_v9 = vunpack.c.h.bf16 %v3243_v45  ;;  %v2785_v61 = vadd.f32 %v2784_v41, %v2765_v42  ;;  %v3138_v45 = vld [vmem:[%s5273_s1 + $0x78] sm:$0xff] }
 0x315   : > { %3528 = vmatpush.msra.mxu1 %v3491_v49  ;;  %v3289_v49 = vunpack.c.l.bf16 %v3142_v36 }
 0x316   : > { %3670 = vmatpush.msra.mxu0 %v3351_v3  ;;  %3710 = vmatpush.msra.mxu2 %v3352_v35  ;;  %v3170_v3 = vld [vmem:[%s5273_s1 + $0x178] sm:$0xff]  ;;  %v3239_v35 = vld [vmem:[%s5273_s1 + $0x3a0] sm:$0xff] }
 0x317   : > { %v3484_v12 = vunpack.c.h.bf16 %v3239_v35  ;;  %3568 = vmatpush.msra.mxu3 %v3492_v9 }
 0x318   : > { %3671 = vmatpush.msra.mxu0 %v3343_v62  ;;  %3711 = vmatpush.msra.mxu2 %v3344_v46  ;;  %v3353_v62 = vunpack.c.l.bf16 %v3174_v13  ;;  %v3483_v46 = vunpack.c.l.bf16 %v3239_v35  ;;  %v3134_v35 = vld [vmem:[%s5273_s1 + $0x58] sm:$0xff] }
 0x319   : > { %3569 = vmatpush.msra.mxu3 %v3484_v12 }
 0x31a   : > { %3672 = vmatpush.msra.mxu0 %v3335_v22  ;;  %3712 = vmatpush.msra.mxu2 %v3336_v57  ;;  %v3354_v22 = vunpack.c.h.bf16 %v3174_v13  ;;  %v3166_v57 = vld [vmem:[%s5273_s1 + $0x158] sm:$0xff]  ;;  %v3298_v13 = vunpack.c.h.bf16 %v3146_v63 }
 0x31b   : > { %3529 = vmatpush.msra.mxu1 %v3483_v46  ;;  %v3337_v23 = vunpack.c.l.bf16 %v3166_v57  ;;  %v3338_v50 = vunpack.c.h.bf16 %v3166_v57  ;;  %3570 = vmatpush.msra.mxu3 %v3476_v53  ;;  %v3281_v46 = vunpack.c.l.bf16 %v3138_v45  ;;  %v3282_v57 = vunpack.c.h.bf16 %v3138_v45 }
 0x31c   : > { %3673 = vmatpush.msra.mxu0 %v3327_v1  ;;  %3713 = vmatpush.msra.mxu2 %v3328_v34  ;;  %v3345_v1 = vunpack.c.l.bf16 %v3170_v3  ;;  %v3475_v34 = vunpack.c.l.bf16 %v3235_v27  ;;  %v3130_v27 = vld [vmem:[%s5273_s1 + $0x38] sm:$0xff]  ;;  %v3273_v53 = vunpack.c.l.bf16 %v3134_v35 }
 0x31e   : > { %3674 = vmatpush.msra.mxu0 %v3319_v54  ;;  %3714 = vmatpush.msra.mxu2 %v3320_v47  ;;  %v2805_v54 = vadd.f32 %v2804_v52, %v2785_v61  ;;  %v3346_v47 = vunpack.c.h.bf16 %v3170_v3  ;;  %v3290_v3 = vunpack.c.h.bf16 %v3142_v36  ;;  %v3203_v52 = vld [vmem:[%s5273_s1 + $0x280] sm:$0xff] }
 0x31f   : > { %3530 = vmatpush.msra.mxu1 %v3475_v34  ;;  %v3411_v12 = vunpack.c.l.bf16 %v3203_v52 }
 0x320   : > { %3675 = vmatpush.msra.mxu0 %v3311_v30  ;;  %3715 = vmatpush.msra.mxu2 %v3312_v44  ;;  %v3231_v30 = vld [vmem:[%s5273_s1 + $0x360] sm:$0xff]  ;;  %v2824_v44 = vpop.f32.mrf.mxu1 }
 0x321   : > { %v2825_v29 = vadd.f32 %v2824_v44, %v2805_v54  ;;  %v3126_v44 = vld [vmem:[%s5273_s1 + $0x18] sm:$0xff] }
 0x322   : > { %3676 = vmatpush.msra.mxu0 %v3303_v55  ;;  %3716 = vmatpush.msra.mxu2 %v3304_v60  ;;  %v3467_v55 = vunpack.c.l.bf16 %v3231_v30  ;;  %v3468_v60 = vunpack.c.h.bf16 %v3231_v30  ;;  %v3274_v30 = vunpack.c.h.bf16 %v3134_v35 }
 0x324   : > { %3677 = vmatpush.msra.mxu0 %v3295_v28  ;;  %3717 = vmatpush.msra.mxu2 %v3296_v14  ;;  %v3158_v28 = vld [vmem:[%s5273_s1 + $0x118] sm:$0xff]  ;;  %v3459_v14 = vunpack.c.l.bf16 %v3227_v40  ;;  %v3266_v40 = vunpack.c.h.bf16 %v3130_v27 }
 0x325   : > { %3531 = vmatpush.msra.mxu1 %v3467_v55  ;;  %v3321_v18 = vunpack.c.l.bf16 %v3158_v28  ;;  %3571 = vmatpush.msra.mxu3 %v3468_v60  ;;  %v3322_v2 = vunpack.c.h.bf16 %v3158_v28  ;;  %v3265_v55 = vunpack.c.l.bf16 %v3130_v27 }
 0x326   : > { %3678 = vmatpush.msra.mxu0 %v3287_v24  ;;  %3718 = vmatpush.msra.mxu2 %v3288_v38  ;;  %v3330_v24 = vunpack.c.h.bf16 %v3162_v8  ;;  %v3154_v38 = vld [vmem:[%s5273_s1 + $0xf8] sm:$0xff] }
 0x327   : > { %3532 = vmatpush.msra.mxu1 %v3459_v14  ;;  %v3313_v39 = vunpack.c.l.bf16 %v3154_v38  ;;  %3572 = vmatpush.msra.mxu3 %v3460_v5  ;;  %v3314_v51 = vunpack.c.h.bf16 %v3154_v38  ;;  %v3257_v5 = vunpack.c.l.bf16 %v3126_v44  ;;  %v3258_v38 = vunpack.c.h.bf16 %v3126_v44 }
 0x328   : > { %3679 = vmatpush.msra.mxu0 %v3279_v58  ;;  %3719 = vmatpush.msra.mxu2 %v3280_v17  ;;  %v2844_v58 = vpop.f32.mrf.mxu2  ;;  %v3451_v17 = vunpack.c.l.bf16 %v3223_v6  ;;  %v3187_v6 = vld [vmem:[%s5273_s1 + $0x200] sm:$0xff] }
 0x329   : > { %3573 = vmatpush.msra.mxu3 %v3452_v19  ;;  %v2884_v41 = vpop.f32.mrf.mxu0 }
 0x32a   : > { %3680 = vmatpush.msra.mxu0 %v3271_v15  ;;  %3720 = vmatpush.msra.mxu2 %v3272_v21  ;;  %v3150_v15 = vld [vmem:[%s5273_s1 + $0xd8] sm:$0xff]  ;;  %v3219_v21 = vld [vmem:[%s5273_s1 + $0x300] sm:$0xff] }
 0x32b   : > { %v3444_v11 = vunpack.c.h.bf16 %v3219_v21  ;;  %3533 = vmatpush.msra.mxu1 %v3451_v17  ;;  %v3305_v20 = vunpack.c.l.bf16 %v3150_v15 }
 0x32c   : > { %3681 = vmatpush.msra.mxu0 %v3263_v26  ;;  %3721 = vmatpush.msra.mxu2 %v3264_v31  ;;  %v3443_v26 = vunpack.c.l.bf16 %v3219_v21  ;;  %v2845_v31 = vadd.f32 %v2844_v58, %v2825_v29  ;;  %v3379_v58 = vunpack.c.l.bf16 %v3187_v6 }
 0x32d   : > { %3574 = vmatpush.msra.mxu3 %v3444_v11 }
 0x32e   : > { %3682 = vmatpush.msra.mxu0 %v3255_v4  ;;  %3722 = vmatpush.msra.mxu2 %v3256_v32  ;;  %v3215_v4 = vld [vmem:[%s5273_s1 + $0x2e0] sm:$0xff]  ;;  %v2864_v32 = vpop.f32.mrf.mxu3 }
 0x32f   : > { %3683 = vmatmul.f32.vlgmr.msra.gmra.mxu0 %v6437_v48  ;;  %3723 = vmatmul.f32.vlgmr.msra.gmra.mxu2 %v6437_v48  ;;  %v3436_v42 = vunpack.c.h.bf16 %v3215_v4 }
 0x330   : > { %3747 = vmatpush.msrb.mxu0 %v3377_v0  ;;  %3787 = vmatpush.msrb.mxu2 %v3378_v59  ;;  %v3435_v0 = vunpack.c.l.bf16 %v3215_v4  ;;  %v3306_v59 = vunpack.c.h.bf16 %v3150_v15  ;;  %v2924_v34 = vpop.f32.mrf.mxu2 }
 0x331   : > { %3534 = vmatpush.msra.mxu1 %v3443_v26  ;;  %3575 = vmatpush.msra.mxu3 %v3436_v42 }
 0x332   : > { %3748 = vmatpush.msrb.mxu0 %v3369_v16  ;;  %3788 = vmatpush.msrb.mxu2 %v3370_v33  ;;  %v3297_v16 = vunpack.c.l.bf16 %v3146_v63  ;;  %v2865_v33 = vadd.f32 %v2864_v32, %v2845_v31  ;;  %v3240_v63 = vld [vmem:[%s5273_s1 + $0x3a8] sm:$0xff] }
 0x333   : > { %3535 = vmatpush.msra.mxu1 %v3435_v0  ;;  %3576 = vmatpush.msra.mxu3 %v3428_v7  ;;  %v3485_v4 = vunpack.c.l.bf16 %v3240_v63  ;;  %v3486_v32 = vunpack.c.h.bf16 %v3240_v63 }
 0x334   : > { %3749 = vmatpush.msrb.mxu0 %v3361_v25  ;;  %3789 = vmatpush.msrb.mxu2 %v3362_v10  ;;  %v3207_v25 = vld [vmem:[%s5273_s1 + $0x2a0] sm:$0xff]  ;;  %v2885_v10 = vadd.f32 %v2884_v41, %v2865_v33 }
 0x335   : > { %v3419_v9 = vunpack.c.l.bf16 %v3207_v25  ;;  %v3420_v61 = vunpack.c.h.bf16 %v3207_v25  ;;  %3536 = vmatpush.msra.mxu1 %v3427_v43  ;;  %v3228_v43 = vld [vmem:[%s5273_s1 + $0x348] sm:$0xff] }
 0x336   : > { %3750 = vmatpush.msrb.mxu0 %v3353_v62  ;;  %3790 = vmatpush.msrb.mxu2 %v3354_v22  ;;  %v2904_v62 = vpop.f32.mrf.mxu1  ;;  %v3412_v22 = vunpack.c.h.bf16 %v3203_v52  ;;  %v2944_v14 = vpop.f32.mrf.mxu3  ;;  %v3461_v33 = vunpack.c.l.bf16 %v3228_v43  ;;  %v3462_v45 = vunpack.c.h.bf16 %v3228_v43  ;;  %v3224_v25 = vld [vmem:[%s5273_s1 + $0x328] sm:$0xff] }
 0x337   : > { %3537 = vmatpush.msra.mxu1 %v3419_v9  ;;  %3577 = vmatpush.msra.mxu3 %v3420_v61  ;;  %v2905_v8 = vadd.f32 %v2904_v62, %v2885_v10  ;;  %v3454_v61 = vunpack.c.h.bf16 %v3224_v25  ;;  %v3220_v10 = vld [vmem:[%s5273_s1 + $0x308] sm:$0xff] }
 0x338   : > { %3751 = vmatpush.msrb.mxu0 %v3345_v1  ;;  %3791 = vmatpush.msrb.mxu2 %v3346_v47  ;;  %v3199_v1 = vld [vmem:[%s5273_s1 + $0x260] sm:$0xff]  ;;  %v3446_v52 = vunpack.c.h.bf16 %v3220_v10  ;;  %v3216_v62 = vld [vmem:[%s5273_s1 + $0x2e8] sm:$0xff] }
 0x339   : > { %v3403_v54 = vunpack.c.l.bf16 %v3199_v1  ;;  %v3404_v47 = vunpack.c.h.bf16 %v3199_v1  ;;  %3538 = vmatpush.msra.mxu1 %v3411_v12  ;;  %3578 = vmatpush.msra.mxu3 %v3412_v22  ;;  %v2925_v28 = vadd.f32 %v2924_v34, %v2905_v8  ;;  %v3438_v22 = vunpack.c.h.bf16 %v3216_v62 }
 0x33a   : > { %3752 = vmatpush.msrb.mxu0 %v3337_v23  ;;  %3792 = vmatpush.msrb.mxu2 %v3338_v50  ;;  %v3195_v23 = vld [vmem:[%s5273_s1 + $0x240] sm:$0xff] }
 0x33b   : > { %v3395_v60 = vunpack.c.l.bf16 %v3195_v23  ;;  %v3396_v50 = vunpack.c.h.bf16 %v3195_v23  ;;  %3539 = vmatpush.msra.mxu1 %v3403_v54  ;;  %3579 = vmatpush.msra.mxu3 %v3404_v47  ;;  %v2945_v17 = vadd.f32 %v2944_v14, %v2925_v28  ;;  %v3208_v54 = vld [vmem:[%s5273_s1 + $0x2a8] sm:$0xff] }
 0x33c   : > { %3753 = vmatpush.msrb.mxu0 %v3329_v56  ;;  %3793 = vmatpush.msrb.mxu2 %v3330_v24  ;;  %v3191_v56 = vld [vmem:[%s5273_s1 + $0x220] sm:$0xff]  ;;  %v3421_v47 = vunpack.c.l.bf16 %v3208_v54  ;;  %v3422_v44 = vunpack.c.h.bf16 %v3208_v54  ;;  %v3204_v23 = vld [vmem:[%s5273_s1 + $0x288] sm:$0xff] }
 0x33d   : > { %v3387_v29 = vunpack.c.l.bf16 %v3191_v56  ;;  %v3388_v24 = vunpack.c.h.bf16 %v3191_v56  ;;  %3540 = vmatpush.msra.mxu1 %v3395_v60  ;;  %3580 = vmatpush.msra.mxu3 %v3396_v50  ;;  %v3414_v28 = vunpack.c.h.bf16 %v3204_v23 }
 0x33e   : > { %3754 = vmatpush.msrb.mxu0 %v3321_v18  ;;  %3794 = vmatpush.msrb.mxu2 %v3322_v2  ;;  %v3248_v18 = vld [vmem:[%s5273_s1 + $0x3e8] sm:$0xff]  ;;  %v3380_v2 = vunpack.c.h.bf16 %v3187_v6 }
 0x33f   : > { %3541 = vmatpush.msra.mxu1 %v3387_v29  ;;  %v3501_v15 = vunpack.c.l.bf16 %v3248_v18  ;;  %3581 = vmatpush.msra.mxu3 %v3388_v24  ;;  %v3502_v21 = vunpack.c.h.bf16 %v3248_v18  ;;  %v3196_v29 = vld [vmem:[%s5273_s1 + $0x248] sm:$0xff] }
 0x340   : > { %3755 = vmatpush.msrb.mxu0 %v3313_v39  ;;  %3795 = vmatpush.msrb.mxu2 %v3314_v51  ;;  %v3244_v39 = vld [vmem:[%s5273_s1 + $0x3c8] sm:$0xff] }
 0x341   : > { %v3493_v11 = vunpack.c.l.bf16 %v3244_v39  ;;  %3542 = vmatpush.msra.mxu1 %v3379_v58  ;;  %v3494_v51 = vunpack.c.h.bf16 %v3244_v39  ;;  %3582 = vmatpush.msra.mxu3 %v3380_v2  ;;  %v3398_v58 = vunpack.c.h.bf16 %v3196_v29  ;;  %v3192_v18 = vld [vmem:[%s5273_s1 + $0x228] sm:$0xff] }
 0x342   : > { %3756 = vmatpush.msrb.mxu0 %v3305_v20  ;;  %3796 = vmatpush.msrb.mxu2 %v3306_v59  ;;  %v3236_v20 = vld [vmem:[%s5273_s1 + $0x388] sm:$0xff]  ;;  %v3390_v2 = vunpack.c.h.bf16 %v3192_v18 }
 0x343   : > { %3607 = vmatpush.msrb.mxu1 %v3501_v15  ;;  %3647 = vmatpush.msrb.mxu3 %v3502_v21  ;;  %v3477_v42 = vunpack.c.l.bf16 %v3236_v20  ;;  %v3478_v36 = vunpack.c.h.bf16 %v3236_v20  ;;  %v3188_v15 = vld [vmem:[%s5273_s1 + $0x208] sm:$0xff] }
 0x344   : > { %3757 = vmatpush.msrb.mxu0 %v3297_v16  ;;  %3797 = vmatpush.msrb.mxu2 %v3298_v13  ;;  %v3381_v39 = vunpack.c.l.bf16 %v3188_v15 }
 0x345   : > { %3608 = vmatpush.msrb.mxu1 %v3493_v11  ;;  %3648 = vmatpush.msrb.mxu3 %v3494_v51  ;;  %v3382_v11 = vunpack.c.h.bf16 %v3188_v15 }
 0x346   : > { %3758 = vmatpush.msrb.mxu0 %v3289_v49  ;;  %3798 = vmatpush.msrb.mxu2 %v3290_v3  ;;  %v3453_v49 = vunpack.c.l.bf16 %v3224_v25  ;;  %v3445_v3 = vunpack.c.l.bf16 %v3220_v10  ;;  %v3249_v10 = vld [vmem:[%s5273_s1 + $0x3f0] sm:$0xff] }
 0x347   : > { %3609 = vmatpush.msrb.mxu1 %v3485_v4  ;;  %3649 = vmatpush.msrb.mxu3 %v3486_v32 }
 0x348   : > { %3759 = vmatpush.msrb.mxu0 %v3281_v46  ;;  %3799 = vmatpush.msrb.mxu2 %v3282_v57  ;;  %v3437_v46 = vunpack.c.l.bf16 %v3216_v62  ;;  %v3212_v57 = vld [vmem:[%s5273_s1 + $0x2c8] sm:$0xff]  ;;  %v3503_v62 = vunpack.c.l.bf16 %v3249_v10 }
 0x349   : > { %3610 = vmatpush.msrb.mxu1 %v3477_v42  ;;  %3650 = vmatpush.msrb.mxu3 %v3478_v36  ;;  %v3429_v27 = vunpack.c.l.bf16 %v3212_v57 }
 0x34a   : > { %3760 = vmatpush.msrb.mxu0 %v3273_v53  ;;  %3800 = vmatpush.msrb.mxu2 %v3274_v30  ;;  %v3430_v53 = vunpack.c.h.bf16 %v3212_v57 }
 0x34b   : > { %v2964_v19 = vpop.f32.mrf.mxu0 }
 0x34c   : > { %3761 = vmatpush.msrb.mxu0 %v3265_v55  ;;  %3801 = vmatpush.msrb.mxu2 %v3266_v40  ;;  %v2965_v26 = vadd.f32 %v2964_v19, %v2945_v17  ;;  %v3413_v55 = vunpack.c.l.bf16 %v3204_v23  ;;  %v3200_v40 = vld [vmem:[%s5273_s1 + $0x268] sm:$0xff]  ;;  %v3389_v17 = vunpack.c.l.bf16 %v3192_v18  ;;  %v3205_v18 = vld [vmem:[%s5273_s1 + $0x290] sm:$0xff] }
 0x34d   : > { %v3405_v56 = vunpack.c.l.bf16 %v3200_v40  ;;  %v3415_v15 = vunpack.c.l.bf16 %v3205_v18 }
 0x34e   : > { %3762 = vmatpush.msrb.mxu0 %v3257_v5  ;;  %3802 = vmatpush.msrb.mxu2 %v3258_v38  ;;  %v2984_v31 = vpop.f32.mrf.mxu1  ;;  %v3406_v5 = vunpack.c.h.bf16 %v3200_v40  ;;  %v3397_v38 = vunpack.c.l.bf16 %v3196_v29  ;;  %v3217_v40 = vld [vmem:[%s5273_s1 + $0x2f0] sm:$0xff] }
 0x34f   : > { %3763 = vmatmul.f32.vlgmr.msrb.gmra.mxu0 %v6437_v48  ;;  %3803 = vmatmul.f32.vlgmr.msrb.gmra.mxu2 %v6437_v48  ;;  %v2985_v0 = vadd.f32 %v2984_v31, %v2965_v26  ;;  %v3232_v48 = vld [vmem:[%s5273_s1 + $0x368] sm:$0xff]  ;;  %v3439_v29 = vunpack.c.l.bf16 %v3217_v40 }
 0x350   : > { %v3469_v41 = vunpack.c.l.bf16 %v3232_v48  ;;  %v3470_v16 = vunpack.c.h.bf16 %v3232_v48 }
 0x351   : > { %v3004_v59 = vpop.f32.mrf.mxu2 }
 0x352   : > { %v3005_v37 = vadd.f32 %v3004_v59, %v2985_v0  ;;  %3611 = vmatpush.msrb.mxu1 %v3469_v41  ;;  %3651 = vmatpush.msrb.mxu3 %v3470_v16 }
 0x354   : > { %v3024_v7 = vpop.f32.mrf.mxu3  ;;  %3612 = vmatpush.msrb.mxu1 %v3461_v33  ;;  %3652 = vmatpush.msrb.mxu3 %v3462_v45 }
 0x355   : > { %v6505_v13 = vadd.f32 %v3024_v7, %v3005_v37 }
 0x356   : > { %3613 = vmatpush.msrb.mxu1 %v3453_v49  ;;  %3653 = vmatpush.msrb.mxu3 %v3454_v61 }
 0x357   : > { %v6509_v9 = vmul.f32 0.70710677, %v6505_v13 }
 0x358   : > { %3614 = vmatpush.msrb.mxu1 %v3445_v3  ;;  %3654 = vmatpush.msrb.mxu3 %v3446_v52  ;;  %v3028_v3 = vmul.f32 0.5, %v6505_v13  ;;  %v3245_v52 = vld [vmem:[%s5273_s1 + $0x3d0] sm:$0xff] }
 0x359   : > { %v3071_v35 = vmul.f32 %v6509_v9, %v6509_v9  ;;  %v3495_v57 = vunpack.c.l.bf16 %v3245_v52 }
 0x35a   : > { %3615 = vmatpush.msrb.mxu1 %v3437_v46  ;;  %3655 = vmatpush.msrb.mxu3 %v3438_v22  ;;  %v3504_v46 = vunpack.c.h.bf16 %v3249_v10  ;;  %v3241_v22 = vld [vmem:[%s5273_s1 + $0x3b0] sm:$0xff]  ;;  %v3230_v10 = vld [vmem:[%s5273_s1 + $0x358] sm:$0xff] }
 0x35b   : > { %v3072_v12 = vmin.f32 %v3071_v35, 16.0  ;;  %v3487_v13 = vunpack.c.l.bf16 %v3241_v22 }
 0x35c   : > { %3616 = vmatpush.msrb.mxu1 %v3429_v27  ;;  %3656 = vmatpush.msrb.mxu3 %v3430_v53  ;;  %v3237_v27 = vld [vmem:[%s5273_s1 + $0x390] sm:$0xff] }
 0x35d   : > { %v3073_v1 = vmul.f32 2.1237322e-06, %v3072_v12  ;;  %v3084_v34 = vmul.f32 3.8918573e-05, %v3072_v12  ;;  %v3479_v53 = vunpack.c.l.bf16 %v3237_v27  ;;  %v3480_v54 = vunpack.c.h.bf16 %v3237_v27  ;;  %v3218_v27 = vld [vmem:[%s5273_s1 + $0x2f8] sm:$0xff] }
 0x35e   : > { %3617 = vmatpush.msrb.mxu1 %v3421_v47  ;;  %3657 = vmatpush.msrb.mxu3 %v3422_v44  ;;  %v3229_v47 = vld [vmem:[%s5273_s1 + $0x350] sm:$0xff] }
 0x35f   : > { %v3074_v8 = vadd.f32 0.00028619796, %v3073_v1  ;;  %v3085_v30 = vadd.f32 0.001143296, %v3084_v34  ;;  %v3488_v1 = vunpack.c.h.bf16 %v3241_v22  ;;  %v3233_v34 = vld [vmem:[%s5273_s1 + $0x370] sm:$0xff]  ;;  %v3463_v23 = vunpack.c.l.bf16 %v3229_v47  ;;  %v3222_v22 = vld [vmem:[%s5273_s1 + $0x318] sm:$0xff] }
 0x360   : > { %3618 = vmatpush.msrb.mxu1 %v3413_v55  ;;  %3658 = vmatpush.msrb.mxu3 %v3414_v28  ;;  %v3225_v44 = vld [vmem:[%s5273_s1 + $0x330] sm:$0xff]  ;;  %v3464_v55 = vunpack.c.h.bf16 %v3229_v47  ;;  %v3210_v47 = vld [vmem:[%s5273_s1 + $0x2b8] sm:$0xff] }
 0x361   : > { %v3075_v60 = vmul.f32 %v3074_v8, %v3072_v12  ;;  %v3086_v50 = vmul.f32 %v3085_v30, %v3072_v12  ;;  %v3471_v8 = vunpack.c.l.bf16 %v3233_v34  ;;  %v3472_v30 = vunpack.c.h.bf16 %v3233_v34  ;;  %v3214_v34 = vld [vmem:[%s5273_s1 + $0x2d8] sm:$0xff] }
 0x362   : > { %3619 = vmatpush.msrb.mxu1 %v3405_v56  ;;  %3659 = vmatpush.msrb.mxu3 %v3406_v5  ;;  %v3456_v28 = vunpack.c.h.bf16 %v3225_v44  ;;  %v3213_v5 = vld [vmem:[%s5273_s1 + $0x2d0] sm:$0xff] }
 0x363   : > { %v3087_v14 = vadd.f32 0.014752088, %v3086_v50  ;;  %v3076_v24 = vadd.f32 0.0036580483, %v3075_v60  ;;  %v3221_v60 = vld [vmem:[%s5273_s1 + $0x310] sm:$0xff]  ;;  %v3455_v50 = vunpack.c.l.bf16 %v3225_v44  ;;  %v3206_v44 = vld [vmem:[%s5273_s1 + $0x298] sm:$0xff] }
 0x364   : > { %3620 = vmatpush.msrb.mxu1 %v3397_v38  ;;  %3660 = vmatpush.msrb.mxu3 %v3398_v58  ;;  %v3447_v56 = vunpack.c.l.bf16 %v3221_v60  ;;  %v3209_v38 = vld [vmem:[%s5273_s1 + $0x2b0] sm:$0xff]  ;;  %v3432_v58 = vunpack.c.h.bf16 %v3213_v5 }
 0x365   : > { %v3088_v6 = vmul.f32 %v3087_v14, %v3072_v12  ;;  %v3077_v21 = vmul.f32 %v3076_v24, %v3072_v12  ;;  %v3448_v14 = vunpack.c.h.bf16 %v3221_v60  ;;  %v3440_v24 = vunpack.c.h.bf16 %v3217_v40  ;;  %v3202_v60 = vld [vmem:[%s5273_s1 + $0x278] sm:$0xff] }
 0x366   : > { %3621 = vmatpush.msrb.mxu1 %v3389_v17  ;;  %3661 = vmatpush.msrb.mxu3 %v3390_v2  ;;  %v3423_v17 = vunpack.c.l.bf16 %v3209_v38  ;;  %v3201_v2 = vld [vmem:[%s5273_s1 + $0x270] sm:$0xff]  ;;  %v3198_v40 = vld [vmem:[%s5273_s1 + $0x258] sm:$0xff] }
 0x367   : > { %v3089_v19 = vadd.f32 0.112945676, %v3088_v6  ;;  %v3078_v51 = vadd.f32 0.05243302, %v3077_v21  ;;  %v3431_v6 = vunpack.c.l.bf16 %v3213_v5  ;;  %v3416_v21 = vunpack.c.h.bf16 %v3205_v18  ;;  %v3194_v5 = vld [vmem:[%s5273_s1 + $0x238] sm:$0xff] }
 0x368   : > { %3622 = vmatpush.msrb.mxu1 %v3381_v39  ;;  %3662 = vmatpush.msrb.mxu3 %v3382_v11  ;;  %v3197_v39 = vld [vmem:[%s5273_s1 + $0x250] sm:$0xff]  ;;  %v3408_v11 = vunpack.c.h.bf16 %v3201_v2 }
 0x369   : > { %v3090_v26 = vmul.f32 %v3089_v19, %v3072_v12  ;;  %v3079_v32 = vmul.f32 %v3078_v51, %v3072_v12  ;;  %v3424_v19 = vunpack.c.h.bf16 %v3209_v38  ;;  %v3399_v51 = vunpack.c.l.bf16 %v3197_v39  ;;  %v3190_v38 = vld [vmem:[%s5273_s1 + $0x218] sm:$0xff] }
 0x36a   : > { %v3385_v18 = vunpack.c.l.bf16 %v3190_v38 }
 0x36b   : > { %v3091_v31 = vadd.f32 0.4994258, %v3090_v26  ;;  %v3080_v20 = vadd.f32 0.18741608, %v3079_v32  ;;  %v3407_v26 = vunpack.c.l.bf16 %v3201_v2  ;;  %v3115_v2 = vld [vmem:[#allocation3 + $0x28] sm:$0xff] }
 0x36d   : > { %v3092_v63 = vmul.f32 %v3091_v31, %v3072_v12  ;;  %v3081_v42 = vmul.f32 %v3080_v20, %v3072_v12  ;;  %v3193_v31 = vld [vmem:[%s5273_s1 + $0x230] sm:$0xff] }
 0x36e   : > { %v3391_v32 = vunpack.c.l.bf16 %v3193_v31  ;;  %v3392_v20 = vunpack.c.h.bf16 %v3193_v31 }
 0x36f   : > { %v3093_v4 = vadd.f32 1.0, %v3092_v63  ;;  %v3082_v37 = vadd.f32 1.1283791, %v3081_v42  ;;  %v3400_v63 = vunpack.c.h.bf16 %v3197_v39 }
 0x371   : > { %4540 = vrcp.f32 %v3093_v4  ;;  %v3105_v48 = vand.u32 2147483648, %v3093_v4  ;;  %v3103_v16 = vand.u32 2147483647, %v3093_v4  ;;  %vm3099_vm6 = vweird.f32 %v3093_v4 }
 0x372   : > { %v3083_v33 = vmul.f32 %v3082_v37, %v6509_v9  ;;  %v3496_v9 = vunpack.c.h.bf16 %v3245_v52  ;;  %v3226_v52 = vld [vmem:[%s5273_s1 + $0x338] sm:$0xff] }
 0x373   : > { %v3106_v7 = vor.u32 1.1754944e-38, %v3105_v48  ;;  %vm3104_vm8 = vcmp.eq.f32.partialorder %v3103_v16, 8.507059e+37 }
 0x377   : > { %v4541_v0 = vpop.eup %4540 }
 0x378   : > { %v3095_v59 = vmul.f32 %v4541_v0, %v3093_v4  ;;  %vm3100_vm5 = vweird.f32 %v4541_v0  ;;  %v3189_v4 = vld [vmem:[%s5273_s1 + $0x210] sm:$0xff] }
 0x379   : > { %vm3101_vm7 = vmor %vm3099_vm6, %vm3100_vm5  ;;  %v3383_v42 = vunpack.c.l.bf16 %v3189_v4 }
 0x37a   : > { %v3096_v36 = vsub.f32 1.0, %v3095_v59  ;;  %v3384_v59 = vunpack.c.h.bf16 %v3189_v4  ;;  %v3117_v4 = vld [vmem:[#allocation3 + $0x10] sm:$0xff] }
 0x37c   : > { %v3097_v41 = vmul.f32 %v4541_v0, %v3096_v36  ;;  %v3246_v36 = vld [vmem:[%s5273_s1 + $0x3d8] sm:$0xff] }
 0x37d   : > { %v3497_v16 = vunpack.c.l.bf16 %v3246_v36 }
 0x37e   : > { %v3098_v43 = vadd.f32 %v4541_v0, %v3097_v41  ;;  %v3242_v41 = vld [vmem:[%s5273_s1 + $0x3b8] sm:$0xff] }
 0x380   : > { %v3102_v45 = vsel %vm3101_vm7, %v4541_v0, %v3098_v43  ;;  %v3250_v0 = vld [vmem:[%s5273_s1 + $0x3f8] sm:$0xff]  ;;  %v3498_v43 = vunpack.c.h.bf16 %v3246_v36 }
 0x381   : > { %v3107_v25 = vsel %vm3104_vm8, %v3106_v7, %v3102_v45  ;;  %v3505_v48 = vunpack.c.l.bf16 %v3250_v0  ;;  %v3506_v37 = vunpack.c.h.bf16 %v3250_v0  ;;  %v3238_v7 = vld [vmem:[%s5273_s1 + $0x398] sm:$0xff]  ;;  %v3490_v45 = vunpack.c.h.bf16 %v3242_v41 }
 0x382   : > { %v3108_v49 = vmul.f32 %v3107_v25, %v3083_v33  ;;  %v3489_v33 = vunpack.c.l.bf16 %v3242_v41  ;;  %v3234_v25 = vld [vmem:[%s5273_s1 + $0x378] sm:$0xff] }
 0x384   : > { %v4404_v61 = vclamps-f32 %v3108_v49, 1.0  ;;  %v3481_v49 = vunpack.c.l.bf16 %v3238_v7 }
 0x386   : > { %v3112_v35 = vadd.f32 1.0, %v4404_v61  ;;  %v3482_v61 = vunpack.c.h.bf16 %v3238_v7 }
 0x388   : > { %v6526_v12 = vmul.f32 %v3112_v35, %v3028_v3  ;;  %v3473_v3 = vunpack.c.l.bf16 %v3234_v25  ;;  %v3474_v35 = vunpack.c.h.bf16 %v3234_v25  ;;  %v3120_v25 = vld [vmem:[#allocation3 + $0x8] sm:$0xff] }
 0x38a   : > { %3543 = vmatmul.f32.vlgmr.msra.gmra.mxu1 %v6526_v12  ;;  %3583 = vmatmul.f32.vlgmr.msra.gmra.mxu3 %v6526_v12 }
 0x38b   : > { %3687 = vmatpush.msra.mxu1 %v3503_v62  ;;  %3727 = vmatpush.msra.mxu3 %v3504_v46  ;;  %v3465_v62 = vunpack.c.l.bf16 %v3230_v10  ;;  %v3466_v46 = vunpack.c.h.bf16 %v3230_v10 }
 0x38d   : > { %3688 = vmatpush.msra.mxu1 %v3495_v57  ;;  %3728 = vmatpush.msra.mxu3 %v3496_v9  ;;  %v3457_v57 = vunpack.c.l.bf16 %v3226_v52  ;;  %v3458_v9 = vunpack.c.h.bf16 %v3226_v52 }
 0x38f   : > { %3689 = vmatpush.msra.mxu1 %v3487_v13  ;;  %3729 = vmatpush.msra.mxu3 %v3488_v1  ;;  %v3449_v13 = vunpack.c.l.bf16 %v3222_v22  ;;  %v3450_v1 = vunpack.c.h.bf16 %v3222_v22 }
 0x391   : > { %3690 = vmatpush.msra.mxu1 %v3479_v53  ;;  %3730 = vmatpush.msra.mxu3 %v3480_v54  ;;  %v3441_v53 = vunpack.c.l.bf16 %v3218_v27  ;;  %v3442_v54 = vunpack.c.h.bf16 %v3218_v27 }
 0x392   : > { %3623 = vmatmul.f32.vlgmr.msrb.gmra.mxu1 %v6526_v12  ;;  %3663 = vmatmul.f32.vlgmr.msrb.gmra.mxu3 %v6526_v12 }
 0x393   : > { %3691 = vmatpush.msra.mxu1 %v3471_v8  ;;  %3731 = vmatpush.msra.mxu3 %v3472_v30  ;;  %v3433_v8 = vunpack.c.l.bf16 %v3214_v34  ;;  %v3434_v30 = vunpack.c.h.bf16 %v3214_v34 }
 0x395   : > { %3692 = vmatpush.msra.mxu1 %v3463_v23  ;;  %3732 = vmatpush.msra.mxu3 %v3464_v55  ;;  %v3425_v23 = vunpack.c.l.bf16 %v3210_v47  ;;  %v3426_v55 = vunpack.c.h.bf16 %v3210_v47 }
 0x397   : > { %3693 = vmatpush.msra.mxu1 %v3455_v50  ;;  %3733 = vmatpush.msra.mxu3 %v3456_v28  ;;  %v3417_v50 = vunpack.c.l.bf16 %v3206_v44  ;;  %v3418_v28 = vunpack.c.h.bf16 %v3206_v44 }
 0x399   : > { %3694 = vmatpush.msra.mxu1 %v3447_v56  ;;  %3734 = vmatpush.msra.mxu3 %v3448_v14  ;;  %v3409_v56 = vunpack.c.l.bf16 %v3202_v60  ;;  %v3410_v14 = vunpack.c.h.bf16 %v3202_v60 }
 0x39b   : > { %3695 = vmatpush.msra.mxu1 %v3439_v29  ;;  %3735 = vmatpush.msra.mxu3 %v3440_v24  ;;  %v3401_v29 = vunpack.c.l.bf16 %v3198_v40  ;;  %v3402_v24 = vunpack.c.h.bf16 %v3198_v40 }
 0x39d   : > { %3696 = vmatpush.msra.mxu1 %v3431_v6  ;;  %3736 = vmatpush.msra.mxu3 %v3432_v58  ;;  %v3393_v6 = vunpack.c.l.bf16 %v3194_v5  ;;  %v3394_v58 = vunpack.c.h.bf16 %v3194_v5 }
 0x39f   : > { %3697 = vmatpush.msra.mxu1 %v3423_v17  ;;  %3737 = vmatpush.msra.mxu3 %v3424_v19  ;;  %v3386_v17 = vunpack.c.h.bf16 %v3190_v38  ;;  %v3524_v19 = vpop.f32.mrf.mxu0 }
 0x3a1   : > { %3698 = vmatpush.msra.mxu1 %v3415_v15  ;;  %3738 = vmatpush.msra.mxu3 %v3416_v21 }
 0x3a3   : > { %3699 = vmatpush.msra.mxu1 %v3407_v26  ;;  %3739 = vmatpush.msra.mxu3 %v3408_v11  ;;  %v3564_v26 = vpop.f32.mrf.mxu2  ;;  %v3116_v11 = vld [vmem:[#allocation3] sm:$0xff] }
 0x3a5   : > { %3700 = vmatpush.msra.mxu1 %v3399_v51  ;;  %3740 = vmatpush.msra.mxu3 %v3400_v63 }
 0x3a7   : > { %3701 = vmatpush.msra.mxu1 %v3391_v32  ;;  %3741 = vmatpush.msra.mxu3 %v3392_v20  ;;  %v3604_v63 = vpop.f32.mrf.mxu0 }
 0x3a9   : > { %3702 = vmatpush.msra.mxu1 %v3383_v42  ;;  %3742 = vmatpush.msra.mxu3 %v3384_v59 }
 0x3aa   : > { %3703 = vmatmul.f32.vlgmr.msra.gmra.mxu1 %v6526_v12  ;;  %3743 = vmatmul.f32.vlgmr.msra.gmra.mxu3 %v6526_v12 }
 0x3ab   : > { %3767 = vmatpush.msrb.mxu1 %v3505_v48  ;;  %3807 = vmatpush.msrb.mxu3 %v3506_v37  ;;  %v3644_v59 = vpop.f32.mrf.mxu2 }
 0x3ad   : > { %3768 = vmatpush.msrb.mxu1 %v3497_v16  ;;  %3808 = vmatpush.msrb.mxu3 %v3498_v43  ;;  %v3119_v16 = vld [vmem:[#allocation3 + $0x18] sm:$0xff] }
 0x3af   : > { %3769 = vmatpush.msrb.mxu1 %v3489_v33  ;;  %3809 = vmatpush.msrb.mxu3 %v3490_v45  ;;  %v3684_v41 = vpop.f32.mrf.mxu0 }
 0x3b1   : > { %3770 = vmatpush.msrb.mxu1 %v3481_v49  ;;  %3810 = vmatpush.msrb.mxu3 %v3482_v61 }
 0x3b3   : > { %3771 = vmatpush.msrb.mxu1 %v3473_v3  ;;  %3811 = vmatpush.msrb.mxu3 %v3474_v35  ;;  %v3724_v45 = vpop.f32.mrf.mxu2  ;;  %v3121_v35 = vld [vmem:[#allocation3 + $0x38] sm:$0xff] }
 0x3b5   : > { %3772 = vmatpush.msrb.mxu1 %v3465_v62  ;;  %3812 = vmatpush.msrb.mxu3 %v3466_v46 }
 0x3b7   : > { %3773 = vmatpush.msrb.mxu1 %v3457_v57  ;;  %3813 = vmatpush.msrb.mxu3 %v3458_v9  ;;  %v3122_v57 = vld [vmem:[#allocation3 + $0x30] sm:$0xff] }
 0x3b9   : > { %3774 = vmatpush.msrb.mxu1 %v3449_v13  ;;  %3814 = vmatpush.msrb.mxu3 %v3450_v1 }
 0x3bb   : > { %3775 = vmatpush.msrb.mxu1 %v3441_v53  ;;  %3815 = vmatpush.msrb.mxu3 %v3442_v54 }
 0x3bd   : > { %3776 = vmatpush.msrb.mxu1 %v3433_v8  ;;  %3816 = vmatpush.msrb.mxu3 %v3434_v30 }
 0x3bf   : > { %3777 = vmatpush.msrb.mxu1 %v3425_v23  ;;  %3817 = vmatpush.msrb.mxu3 %v3426_v55 }
 0x3c1   : > { %3778 = vmatpush.msrb.mxu1 %v3417_v50  ;;  %3818 = vmatpush.msrb.mxu3 %v3418_v28 }
 0x3c3   : > { %3779 = vmatpush.msrb.mxu1 %v3409_v56  ;;  %3819 = vmatpush.msrb.mxu3 %v3410_v14 }
 0x3c5   : > { %3780 = vmatpush.msrb.mxu1 %v3401_v29  ;;  %3820 = vmatpush.msrb.mxu3 %v3402_v24 }
 0x3c7   : > { %3781 = vmatpush.msrb.mxu1 %v3393_v6  ;;  %3821 = vmatpush.msrb.mxu3 %v3394_v58 }
 0x3c9   : > { %3782 = vmatpush.msrb.mxu1 %v3385_v18  ;;  %3822 = vmatpush.msrb.mxu3 %v3386_v17 }
 0x3ca   : > { %3783 = vmatmul.f32.vlgmr.msrb.gmra.mxu1 %v6526_v12  ;;  %3823 = vmatmul.f32.vlgmr.msrb.gmra.mxu3 %v6526_v12  ;;  %v3118_v12 = vld [vmem:[#allocation3 + $0x20] sm:$0xff] }
 0x3cc   : > { %v3764_v3 = vpop.f32.mrf.mxu0 }
 0x3d2   : > { %v3804_v22 = vpop.f32.mrf.mxu2 }
 0x407   : > { %v3544_v15 = vpop.f32.mrf.mxu1 }
 0x408   : > { %v3545_v21 = vadd.f32 %v3544_v15, %v3524_v19 }
 0x40a   : > { %v3827_v39 = vadd.f32 %v3545_v21, %v3115_v2 }
 0x40c   : > { %3835 = vst [vmem:[#allocation3 + $0x28] sm:$0xff] %v3827_v39 }
 0x40d   : > { %v3584_v31 = vpop.f32.mrf.mxu3 }
 0x40e   : > { %v3585_v51 = vadd.f32 %v3584_v31, %v3564_v26 }
 0x40f   : > { %v3624_v32 = vpop.f32.mrf.mxu1 }
 0x410   : > { %v3828_v20 = vadd.f32 %v3585_v51, %v3116_v11  ;;  %v3625_v0 = vadd.f32 %v3624_v32, %v3604_v63 }
 0x412   : > { %3836 = vst [vmem:[#allocation3] sm:$0xff] %v3828_v20  ;;  %v3829_v42 = vadd.f32 %v3625_v0, %v3117_v4 }
 0x414   : > { %3837 = vst [vmem:[#allocation3 + $0x10] sm:$0xff] %v3829_v42 }
 0x415   : > { %v3664_v36 = vpop.f32.mrf.mxu3 }
 0x416   : > { %v3665_v48 = vadd.f32 %v3664_v36, %v3644_v59 }
 0x418   : > { %v3830_v37 = vadd.f32 %v3665_v48, %v3118_v12 }
 0x41a   : > { %3838 = vst [vmem:[#allocation3 + $0x20] sm:$0xff] %v3830_v37 }
 0x427   : > { %v3704_v43 = vpop.f32.mrf.mxu1 }
 0x428   : > { %v3705_v7 = vadd.f32 %v3704_v43, %v3684_v41 }
 0x42a   : > { %v3831_v33 = vadd.f32 %v3705_v7, %v3119_v16 }
 0x42c   : > { %3839 = vst [vmem:[#allocation3 + $0x18] sm:$0xff] %v3831_v33 }
 0x42d   : > { %v3744_v49 = vpop.f32.mrf.mxu3 }
 0x42e   : > { %v3745_v61 = vadd.f32 %v3744_v49, %v3724_v45 }
 0x430   : > { %v3832_v10 = vadd.f32 %v3745_v61, %v3120_v25 }
 0x432   : > { %3840 = vst [vmem:[#allocation3 + $0x8] sm:$0xff] %v3832_v10 }
 0x447   : > { %v3784_v52 = vpop.f32.mrf.mxu1 }
 0x448   : > { %v3785_v62 = vadd.f32 %v3784_v52, %v3764_v3 }
 0x44a   : > { %v3833_v46 = vadd.f32 %v3785_v62, %v3121_v35 }
 0x44c   : > { %3841 = vst [vmem:[#allocation3 + $0x38] sm:$0xff] %v3833_v46 }
 0x44d   : > { %v3824_v9 = vpop.f32.mrf.mxu3 }
 0x44e   : > { %v3825_v27 = vadd.f32 %v3824_v9, %v3804_v22  ;;  %3846 = sbr.rel (%p4405_p5) target bundleno = 1220 (0x4c4), region = 80 }
 0x450   : > { %v3834_v13 = vadd.f32 %v3825_v27, %v3122_v57 }
 0x452   : > { %3842 = vst [vmem:[#allocation3 + $0x30] sm:$0xff] %v3834_v13 }
 0x453   : > { %v3847_v1 = vld [vmem:[#allocation3 + $0x28] sm:$0xff]  ;;  %v6567_v34 = vld [vmem:[#allocation11] sm:$0xff]  ;;  %v3848_v53 = vld [vmem:[#allocation3] sm:$0xff] }
 0x454   : > { %v3857_v54 = vperm.slane %v6567_v34, 0  ;;  %v3858_v47 = vperm.slane %v6567_v34, 1  ;;  %v3849_v8 = vld [vmem:[#allocation3 + $0x10] sm:$0xff]  ;;  %v3859_v30 = vperm.slane %v6567_v34, 2  ;;  %v3850_v44 = vld [vmem:[#allocation3 + $0x20] sm:$0xff]  ;;  %v3860_v23 = vperm.slane %v6567_v34, 3 }
 0x455   : > { %v3861_v58 = vperm.slane %v6567_v34, 4  ;;  %v3851_v19 = vld [vmem:[#allocation3 + $0x18] sm:$0xff]  ;;  %v3862_v21 = vperm.slane %v6567_v34, 5  ;;  %v3852_v16 = vld [vmem:[#allocation3 + $0x8] sm:$0xff] }
 0x456   : > { %v6573_v55 = vadd.f32 %v3857_v54, %v3847_v1  ;;  %v6575_v60 = vadd.f32 %v3858_v47, %v3848_v53  ;;  %v6577_v50 = vadd.f32 %v3859_v30, %v3849_v8  ;;  %v6579_v28 = vadd.f32 %v3860_v23, %v3850_v44 }
 0x457   : > { %v6617_v4 = vadd.f32 %v3861_v58, %v3851_v19  ;;  %v6629_v52 = vadd.f32 %v3862_v21, %v3852_v16 }
 0x458   : > { %v6582_v40 = vmul.f32 0.70710677, %v6573_v55  ;;  %v6585_v56 = vmul.f32 0.70710677, %v6575_v60  ;;  %v6588_v14 = vmul.f32 0.70710677, %v6577_v50 }
 0x459   : > { %v6591_v5 = vmul.f32 0.70710677, %v6579_v28  ;;  %v6627_v45 = vmul.f32 0.70710677, %v6617_v4 }
 0x45a   : > { %v3897_v29 = vmul.f32 %v6582_v40, %v6582_v40  ;;  %v3937_v24 = vmul.f32 %v6585_v56, %v6585_v56  ;;  %v3977_v38 = vmul.f32 %v6588_v14, %v6588_v14 }
 0x45b   : > { %v4017_v6 = vmul.f32 %v6591_v5, %v6591_v5  ;;  %v4057_v23 = vmul.f32 %v6627_v45, %v6627_v45 }
 0x45c   : > { %v6602_v18 = vmin.f32 %v3897_v29, 16.0  ;;  %v6604_v17 = vmin.f32 %v3937_v24, 16.0  ;;  %v6606_v2 = vmin.f32 %v3977_v38, 16.0  ;;  %v6642_v29 = vmul.f32 0.70710677, %v6629_v52 }
 0x45d   : > { %v6608_v15 = vmin.f32 %v4017_v6, 16.0 }
 0x45e   : > { %v3899_v39 = vmul.f32 2.1237322e-06, %v6602_v18  ;;  %v3910_v26 = vmul.f32 3.8918573e-05, %v6602_v18  ;;  %v3939_v11 = vmul.f32 2.1237322e-06, %v6604_v17  ;;  %v4097_v16 = vmul.f32 %v6642_v29, %v6642_v29 }
 0x45f   : > { %v3950_v31 = vmul.f32 3.8918573e-05, %v6604_v17  ;;  %v3979_v51 = vmul.f32 2.1237322e-06, %v6606_v2  ;;  %v3990_v63 = vmul.f32 3.8918573e-05, %v6606_v2 }
 0x460   : > { %v3900_v32 = vadd.f32 0.00028619796, %v3899_v39  ;;  %v3911_v20 = vadd.f32 0.001143296, %v3910_v26  ;;  %v3940_v0 = vadd.f32 0.00028619796, %v3939_v11 }
 0x461   : > { %v3951_v42 = vadd.f32 0.001143296, %v3950_v31  ;;  %v3980_v59 = vadd.f32 0.00028619796, %v3979_v51  ;;  %v3991_v12 = vadd.f32 0.001143296, %v3990_v63 }
 0x462   : > { %v3901_v36 = vmul.f32 %v3900_v32, %v6602_v18  ;;  %v3912_v48 = vmul.f32 %v3911_v20, %v6602_v18  ;;  %v3941_v37 = vmul.f32 %v3940_v0, %v6604_v17  ;;  %v4019_v41 = vmul.f32 2.1237322e-06, %v6608_v15 }
 0x463   : > { %v3952_v43 = vmul.f32 %v3951_v42, %v6604_v17  ;;  %v3981_v7 = vmul.f32 %v3980_v59, %v6606_v2  ;;  %v3992_v33 = vmul.f32 %v3991_v12, %v6606_v2  ;;  %v4030_v1 = vmul.f32 3.8918573e-05, %v6608_v15 }
 0x464   : > { %v3902_v25 = vadd.f32 0.0036580483, %v3901_v36  ;;  %v3913_v49 = vadd.f32 0.014752088, %v3912_v48  ;;  %v3942_v61 = vadd.f32 0.0036580483, %v3941_v37 }
 0x465   : > { %v3953_v10 = vadd.f32 0.014752088, %v3952_v43  ;;  %v3982_v3 = vadd.f32 0.0036580483, %v3981_v7  ;;  %v3993_v35 = vadd.f32 0.014752088, %v3992_v33 }
 0x466   : > { %v3903_v62 = vmul.f32 %v3902_v25, %v6602_v18  ;;  %v3914_v46 = vmul.f32 %v3913_v49, %v6602_v18  ;;  %v3943_v22 = vmul.f32 %v3942_v61, %v6604_v17  ;;  %v4020_v57 = vadd.f32 0.00028619796, %v4019_v41  ;;  %v3853_v43 = vld [vmem:[#allocation3 + $0x38] sm:$0xff] }
 0x467   : > { %v3954_v9 = vmul.f32 %v3953_v10, %v6604_v17  ;;  %v3983_v27 = vmul.f32 %v3982_v3, %v6606_v2  ;;  %v3994_v13 = vmul.f32 %v3993_v35, %v6606_v2  ;;  %v4031_v26 = vadd.f32 0.001143296, %v4030_v1 }
 0x468   : > { %v3904_v53 = vadd.f32 0.05243302, %v3903_v62  ;;  %v3915_v54 = vadd.f32 0.112945676, %v3914_v46  ;;  %v3944_v47 = vadd.f32 0.05243302, %v3943_v22  ;;  %v4021_v8 = vmul.f32 %v4020_v57, %v6608_v15 }
 0x469   : > { %v3955_v30 = vadd.f32 0.112945676, %v3954_v9  ;;  %v3984_v44 = vadd.f32 0.05243302, %v3983_v27  ;;  %v3995_v58 = vadd.f32 0.112945676, %v3994_v13  ;;  %v4032_v41 = vmul.f32 %v4031_v26, %v6608_v15 }
 0x46a   : > { %v3905_v24 = vmul.f32 %v3904_v53, %v6602_v18  ;;  %v3916_v38 = vmul.f32 %v3915_v54, %v6602_v18  ;;  %v3945_v6 = vmul.f32 %v3944_v47, %v6604_v17  ;;  %v4022_v39 = vadd.f32 0.0036580483, %v4021_v8 }
 0x46b   : > { %v3956_v19 = vmul.f32 %v3955_v30, %v6604_v17  ;;  %v3985_v21 = vmul.f32 %v3984_v44, %v6606_v2  ;;  %v3996_v63 = vmul.f32 %v3995_v58, %v6606_v2  ;;  %v3863_v42 = vperm.slane %v6567_v34, 6 }
 0x46c   : > { %v3906_v11 = vadd.f32 0.18741608, %v3905_v24  ;;  %v3917_v31 = vadd.f32 0.4994258, %v3916_v38  ;;  %v3946_v51 = vadd.f32 0.18741608, %v3945_v6  ;;  %v4023_v0 = vmul.f32 %v4022_v39, %v6608_v15 }
 0x46d   : > { %v3957_v32 = vadd.f32 0.4994258, %v3956_v19  ;;  %v3986_v20 = vadd.f32 0.18741608, %v3985_v21  ;;  %v3997_v48 = vadd.f32 0.4994258, %v3996_v63  ;;  %v6666_v62 = vadd.f32 %v3863_v42, %v3853_v43 }
 0x46e   : > { %v3907_v59 = vmul.f32 %v3906_v11, %v6602_v18  ;;  %v3918_v12 = vmul.f32 %v3917_v31, %v6602_v18  ;;  %v3947_v36 = vmul.f32 %v3946_v51, %v6604_v17  ;;  %v4024_v49 = vadd.f32 0.05243302, %v4023_v0 }
 0x46f   : > { %v3958_v37 = vmul.f32 %v3957_v32, %v6604_v17  ;;  %v3987_v25 = vmul.f32 %v3986_v20, %v6606_v2  ;;  %v6661_v61 = vmul.f32 0.5, %v6573_v55  ;;  %v3998_v10 = vmul.f32 %v3997_v48, %v6606_v2 }
 0x470   : > { %v3908_v7 = vadd.f32 1.1283791, %v3907_v59  ;;  %v3919_v33 = vadd.f32 1.0, %v3918_v12  ;;  %v4033_v3 = vadd.f32 0.014752088, %v4032_v41  ;;  %v6664_v35 = vmin.f32 %v4057_v23, 16.0 }
 0x471   : > { %v3959_v18 = vadd.f32 1.0, %v3958_v37  ;;  %v3948_v17 = vadd.f32 1.1283791, %v3947_v36  ;;  %v6669_v57 = vmul.f32 0.5, %v6575_v60  ;;  %v3988_v55 = vadd.f32 1.1283791, %v3987_v25 }
 0x472   : > { %4815 = vrcp.f32 %v3919_v33  ;;  %v3929_v46 = vand.u32 2147483647, %v3919_v33  ;;  %v3931_v22 = vand.u32 2147483648, %v3919_v33  ;;  %v6672_v9 = vmul.f32 %v3908_v7, %v6582_v40 }
 0x473   : > { %4817 = vrcp.f32 %v3959_v18  ;;  %v4025_v27 = vmul.f32 %v4024_v49, %v6608_v15  ;;  %v6675_v2 = vmin.f32 %v4097_v16, 16.0  ;;  %v3969_v13 = vand.u32 2147483647, %v3959_v18 }
 0x474   : > { %v3971_v1 = vand.u32 2147483648, %v3959_v18  ;;  %v6677_v53 = vadd.f32 1.0, %v3998_v10  ;;  %v4034_v54 = vmul.f32 %v4033_v3, %v6608_v15  ;;  %vm3925_vm9 = vweird.f32 %v3919_v33 }
 0x475   : > { %v3949_v47 = vmul.f32 %v3948_v17, %v6585_v56  ;;  %vm3965_vm10 = vweird.f32 %v3959_v18  ;;  %v4059_v60 = vmul.f32 2.1237322e-06, %v6664_v35  ;;  %vm6682_vm11 = vcmp.eq.f32.partialorder %v3929_v46, 8.507059e+37 }
 0x476   : > { %v3932_v8 = vor.u32 1.1754944e-38, %v3931_v22  ;;  %4819 = vrcp.f32 %v6677_v53  ;;  %v4070_v30 = vmul.f32 3.8918573e-05, %v6664_v35  ;;  %v6689_v23 = vmul.f32 %v3988_v55, %v6588_v14 }
 0x477   : > { %v4026_v24 = vadd.f32 0.18741608, %v4025_v27  ;;  %v4035_v38 = vadd.f32 0.112945676, %v4034_v54  ;;  %v4060_v6 = vadd.f32 0.00028619796, %v4059_v60  ;;  %vm4005_vm13 = vweird.f32 %v6677_v53 }
 0x478   : > { %v4816_v44 = vpop.eup %4815  ;;  %vm6691_vm12 = vcmp.eq.f32.partialorder %v3969_v13, 8.507059e+37  ;;  %v3972_v21 = vor.u32 1.1754944e-38, %v3971_v1  ;;  %v4009_v26 = vand.u32 2147483647, %v6677_v53  ;;  %v4071_v51 = vadd.f32 0.001143296, %v4070_v30 }
 0x479   : > { %v4818_v56 = vpop.eup %4817  ;;  %v3921_v58 = vmul.f32 %v4816_v44, %v3919_v33  ;;  %vm3926_vm14 = vweird.f32 %v4816_v44  ;;  %v4036_v11 = vmul.f32 %v4035_v38, %v6608_v15  ;;  %v4061_v31 = vmul.f32 %v4060_v6, %v6664_v35 }
 0x47a   : > { %v3961_v39 = vmul.f32 %v4818_v56, %v3959_v18  ;;  %v4099_v63 = vmul.f32 2.1237322e-06, %v6675_v2  ;;  %vm3966_vm15 = vweird.f32 %v4818_v56  ;;  %v4011_v20 = vand.u32 2147483648, %v6677_v53  ;;  %vm6704_vm0 = vmor %vm3925_vm9, %vm3926_vm14 }
 0x47b   : > { %v3922_v14 = vsub.f32 1.0, %v3921_v58  ;;  %v4037_v0 = vadd.f32 0.4994258, %v4036_v11  ;;  %v4062_v12 = vadd.f32 0.0036580483, %v4061_v31  ;;  %v4072_v36 = vmul.f32 %v4071_v51, %v6664_v35  ;;  %vm6712_vm1 = vmor %vm3965_vm10, %vm3966_vm15 }
 0x47c   : > { %v3962_v32 = vsub.f32 1.0, %v3961_v39  ;;  %v4820_v42 = vpop.eup %4819  ;;  %v4100_v48 = vadd.f32 0.00028619796, %v4099_v63  ;;  %v4110_v7 = vmul.f32 3.8918573e-05, %v6675_v2  ;;  %v4027_v27 = vmul.f32 %v4026_v24, %v6608_v15 }
 0x47d   : > { %v3923_v59 = vmul.f32 %v4816_v44, %v3922_v14  ;;  %v4001_v16 = vmul.f32 %v4820_v42, %v6677_v53  ;;  %v4038_v43 = vmul.f32 %v4037_v0, %v6608_v15  ;;  %vm4006_vm2 = vweird.f32 %v4820_v42 }
 0x47e   : > { %v3963_v41 = vmul.f32 %v4818_v56, %v3962_v32  ;;  %v4063_v33 = vmul.f32 %v4062_v12, %v6664_v35  ;;  %v4073_v10 = vadd.f32 0.014752088, %v4072_v36  ;;  %v4101_v22 = vmul.f32 %v4100_v48, %v6675_v2  ;;  %vm6735_vm3 = vmor %vm4005_vm13, %vm4006_vm2 }
 0x47f   : > { %v3924_v25 = vadd.f32 %v4816_v44, %v3923_v59  ;;  %v4002_v17 = vsub.f32 1.0, %v4001_v16  ;;  %v6717_v46 = vadd.f32 1.0, %v4038_v43  ;;  %vm4010_vm4 = vcmp.eq.f32.partialorder %v4009_v26, 8.507059e+37  ;;  %v3854_v16 = vld [vmem:[#allocation3 + $0x30] sm:$0xff] }
 0x480   : > { %v3964_v3 = vadd.f32 %v4818_v56, %v3963_v41  ;;  %v4064_v18 = vadd.f32 0.05243302, %v4063_v33  ;;  %v4074_v13 = vmul.f32 %v4073_v10, %v6664_v35  ;;  %v4012_v40 = vor.u32 1.1754944e-38, %v4011_v20 }
 0x481   : > { %v3928_v55 = vsel %vm6704_vm0, %v4816_v44, %v3924_v25  ;;  %v4003_v60 = vmul.f32 %v4820_v42, %v4002_v17  ;;  %4821 = vrcp.f32 %v6717_v46  ;;  %v4102_v24 = vadd.f32 0.0036580483, %v4101_v22 }
 0x482   : > { %v3933_v1 = vsel %vm6682_vm11, %v3932_v8, %v3928_v55  ;;  %v3968_v54 = vsel %vm6712_vm1, %v4818_v56, %v3964_v3  ;;  %v4111_v6 = vadd.f32 0.001143296, %v4110_v7  ;;  %v3883_v58 = vmul.f32 0.5, %v6577_v50 }
 0x483   : > { %v3934_v30 = vmul.f32 %v3933_v1, %v6672_v9  ;;  %v3973_v38 = vsel %vm6691_vm12, %v3972_v21, %v3968_v54  ;;  %v4004_v44 = vadd.f32 %v4820_v42, %v4003_v60  ;;  %v4028_v9 = vadd.f32 1.1283791, %v4027_v27 }
 0x484   : > { %v3974_v8 = vmul.f32 %v3973_v38, %v3949_v47  ;;  %v4075_v39 = vadd.f32 0.112945676, %v4074_v13  ;;  %vm4045_vm5 = vweird.f32 %v6717_v46  ;;  %v4065_v53 = vmul.f32 %v4064_v18, %v6664_v35 }
 0x485   : > { %v4406_v56 = vclamps-f32 %v3934_v30, 1.0  ;;  %v4008_v21 = vsel %vm6735_vm3, %v4820_v42, %v4004_v44  ;;  %v4049_v47 = vand.u32 2147483647, %v6717_v46  ;;  %v4103_v63 = vmul.f32 %v4102_v24, %v6675_v2 }
 0x486   : > { %v4407_v19 = vclamps-f32 %v3974_v8, 1.0  ;;  %v4013_v26 = vsel %vm4010_vm4, %v4012_v40, %v4008_v21  ;;  %v4076_v14 = vmul.f32 %v4075_v39, %v6664_v35  ;;  %v4112_v32 = vmul.f32 %v4111_v6, %v6675_v2 }
 0x487   : > { %v4217_v11 = vadd.f32 1.0, %v4406_v56  ;;  %v4822_v31 = vpop.eup %4821  ;;  %v4014_v50 = vmul.f32 %v4013_v26, %v6689_v23  ;;  %v4051_v42 = vand.u32 2147483648, %v6717_v46  ;;  %v4066_v48 = vadd.f32 0.18741608, %v4065_v53 }
 0x488   : > { %v4218_v51 = vadd.f32 1.0, %v4407_v19  ;;  %v4041_v0 = vmul.f32 %v4822_v31, %v6717_v46  ;;  %v4077_v59 = vadd.f32 0.4994258, %v4076_v14  ;;  %vm4046_vm6 = vweird.f32 %v4822_v31 }
 0x489   : > { %v4225_v20 = vmul.f32 %v4217_v11, %v6661_v61  ;;  %v4408_v36 = vclamps-f32 %v4014_v50, 1.0  ;;  %v4113_v41 = vadd.f32 0.014752088, %v4112_v32  ;;  %v6758_v61 = vmul.f32 0.70710677, %v6666_v62  ;;  %vm6770_vm7 = vmor %vm4045_vm5, %vm4046_vm6 }
 0x48a   : > { %v4226_v12 = vmul.f32 %v4218_v51, %v6669_v57  ;;  %v4042_v23 = vsub.f32 1.0, %v4041_v0  ;;  %v4078_v37 = vmul.f32 %v4077_v59, %v6664_v35  ;;  %v4104_v43 = vadd.f32 0.05243302, %v4103_v63 }
 0x48b   : > { %4233 = vst [vmem:[%s6908_s13] sm:$0xff] %v4225_v20  ;;  %v4219_v57 = vadd.f32 1.0, %v4408_v36  ;;  %v3864_v7 = vperm.slane %v6567_v34, 7  ;;  %v4114_v33 = vmul.f32 %v4113_v41, %v6675_v2  ;;  %v4137_v10 = vmul.f32 %v6758_v61, %v6758_v61 }
 0x48c   : > { %4234 = vst [vmem:[%s6908_s13 + $0x8] sm:$0xff] %v4226_v12  ;;  %v4043_v25 = vmul.f32 %v4822_v31, %v4042_v23  ;;  %v4079_v49 = vadd.f32 1.0, %v4078_v37  ;;  %v4052_v22 = vor.u32 1.1754944e-38, %v4051_v42  ;;  %v4029_v34 = vmul.f32 %v4028_v9, %v6591_v5 }
 0x48d   : > { %v4227_v3 = vmul.f32 %v4219_v57, %v3883_v58  ;;  %v6774_v55 = vadd.f32 %v3864_v7, %v3854_v16  ;;  %vm4050_vm8 = vcmp.eq.f32.partialorder %v4049_v47, 8.507059e+37  ;;  %v4067_v18 = vmul.f32 %v4066_v48, %v6664_v35 }
 0x48e   : > { %v4044_v27 = vadd.f32 %v4822_v31, %v4043_v25  ;;  %4823 = vrcp.f32 %v4079_v49  ;;  %v4105_v46 = vmul.f32 %v4104_v43, %v6675_v2  ;;  %v4115_v13 = vadd.f32 0.112945676, %v4114_v33 }
 0x48f   : > { %4235 = vst [vmem:[%s6908_s13 + $0x10] sm:$0xff] %v4227_v3  ;;  %v6784_v54 = vmin.f32 %v4137_v10, 16.0  ;;  %v6787_v60 = vmul.f32 0.70710677, %v6774_v55  ;;  %v3884_v5 = vmul.f32 0.5, %v6579_v28  ;;  %vm4085_vm9 = vweird.f32 %v4079_v49 }
 0x490   : > { %v4048_v1 = vsel %vm6770_vm7, %v4822_v31, %v4044_v27  ;;  %v4116_v38 = vmul.f32 %v4115_v13, %v6675_v2  ;;  %v4068_v44 = vadd.f32 1.1283791, %v4067_v18  ;;  %v4106_v24 = vadd.f32 0.18741608, %v4105_v46 }
 0x491   : > { %v4053_v30 = vsel %vm4050_vm8, %v4052_v22, %v4048_v1  ;;  %v4139_v40 = vmul.f32 2.1237322e-06, %v6784_v54  ;;  %v4150_v35 = vmul.f32 3.8918573e-05, %v6784_v54  ;;  %v4177_v8 = vmul.f32 %v6787_v60, %v6787_v60 }
 0x492   : > { %v4054_v15 = vmul.f32 %v4053_v30, %v4029_v34  ;;  %v4117_v6 = vadd.f32 0.4994258, %v4116_v38  ;;  %v4089_v21 = vand.u32 2147483647, %v4079_v49  ;;  %v4091_v53 = vand.u32 2147483648, %v4079_v49 }
 0x493   : > { %v4140_v9 = vadd.f32 0.00028619796, %v4139_v40  ;;  %v4151_v39 = vadd.f32 0.001143296, %v4150_v35  ;;  %v6795_v28 = vmin.f32 %v4177_v8, 16.0  ;;  %v4069_v59 = vmul.f32 %v4068_v44, %v6627_v45 }
 0x494   : > { %v4824_v56 = vpop.eup %4823  ;;  %v4409_v58 = vclamps-f32 %v4054_v15, 1.0  ;;  %v4118_v11 = vmul.f32 %v4117_v6, %v6675_v2  ;;  %v4092_v36 = vor.u32 1.1754944e-38, %v4091_v53  ;;  %vm4090_vm12 = vcmp.eq.f32.partialorder %v4089_v21, 8.507059e+37 }
 0x495   : > { %v4081_v19 = vmul.f32 %v4824_v56, %v4079_v49  ;;  %v4141_v47 = vmul.f32 %v4140_v9, %v6784_v54  ;;  %v4152_v14 = vmul.f32 %v4151_v39, %v6784_v54  ;;  %v4179_v31 = vmul.f32 2.1237322e-06, %v6795_v28 }
 0x496   : > { %v4220_v26 = vadd.f32 1.0, %v4409_v58  ;;  %vm4086_vm10 = vweird.f32 %v4824_v56  ;;  %v4119_v50 = vadd.f32 1.0, %v4118_v11  ;;  %v4190_v63 = vmul.f32 3.8918573e-05, %v6795_v28 }
 0x497   : > { %v4082_v51 = vsub.f32 1.0, %v4081_v19  ;;  %v4142_v20 = vadd.f32 0.0036580483, %v4141_v47  ;;  %v4153_v0 = vadd.f32 0.014752088, %v4152_v14  ;;  %vm4087_vm11 = vmor %vm4085_vm9, %vm4086_vm10  ;;  %v4107_v16 = vmul.f32 %v4106_v24, %v6675_v2 }
 0x498   : > { %v4228_v32 = vmul.f32 %v4220_v26, %v3884_v5  ;;  %v4180_v42 = vadd.f32 0.00028619796, %v4179_v31  ;;  %4825 = vrcp.f32 %v4119_v50  ;;  %v4191_v45 = vadd.f32 0.001143296, %v4190_v63 }
 0x499   : > { %v4083_v12 = vmul.f32 %v4824_v56, %v4082_v51  ;;  %v4143_v48 = vmul.f32 %v4142_v20, %v6784_v54  ;;  %v4154_v23 = vmul.f32 %v4153_v0, %v6784_v54  ;;  %v3885_v17 = vmul.f32 0.5, %v6617_v4 }
 0x49a   : > { %4236 = vst [vmem:[%s6908_s13 + $0x18] sm:$0xff] %v4228_v32  ;;  %v4181_v37 = vmul.f32 %v4180_v42, %v6795_v28  ;;  %v4192_v25 = vmul.f32 %v4191_v45, %v6795_v28  ;;  %v4108_v34 = vadd.f32 1.1283791, %v4107_v16  ;;  %vm4125_vm13 = vweird.f32 %v4119_v50 }
 0x49b   : > { %v4084_v41 = vadd.f32 %v4824_v56, %v4083_v12  ;;  %v4155_v57 = vadd.f32 0.112945676, %v4154_v23  ;;  %v4144_v7 = vadd.f32 0.05243302, %v4143_v48  ;;  %v4129_v46 = vand.u32 2147483647, %v4119_v50 }
 0x49c   : > { %v4182_v10 = vadd.f32 0.0036580483, %v4181_v37  ;;  %v4193_v27 = vadd.f32 0.014752088, %v4192_v25  ;;  %v4131_v1 = vand.u32 2147483648, %v4119_v50  ;;  %v4109_v8 = vmul.f32 %v4108_v34, %v6642_v29 }
 0x49d   : > { %v4088_v43 = vsel %vm4087_vm11, %v4824_v56, %v4084_v41  ;;  %v4156_v49 = vmul.f32 %v4155_v57, %v6784_v54  ;;  %v4145_v5 = vmul.f32 %v4144_v7, %v6784_v54  ;;  %vm4130_vm0 = vcmp.eq.f32.partialorder %v4129_v46, 8.507059e+37 }
 0x49e   : > { %v4093_v33 = vsel %vm4090_vm12, %v4092_v36, %v4088_v43  ;;  %v4826_v3 = vpop.eup %4825  ;;  %v4194_v30 = vmul.f32 %v4193_v27, %v6795_v28  ;;  %v4183_v40 = vmul.f32 %v4182_v10, %v6795_v28  ;;  %v4132_v56 = vor.u32 1.1754944e-38, %v4131_v1 }
 0x49f   : > { %v4094_v22 = vmul.f32 %v4093_v33, %v4069_v59  ;;  %v4121_v18 = vmul.f32 %v4826_v3, %v4119_v50  ;;  %v4157_v2 = vadd.f32 0.4994258, %v4156_v49  ;;  %vm4126_vm14 = vweird.f32 %v4826_v3 }
 0x4a0   : > { %v4195_v35 = vadd.f32 0.112945676, %v4194_v30  ;;  %vm4127_vm15 = vmor %vm4125_vm13, %vm4126_vm14  ;;  %v4146_v58 = vadd.f32 0.18741608, %v4145_v5  ;;  %v4184_v19 = vadd.f32 0.05243302, %v4183_v40 }
 0x4a1   : > { %v4410_v13 = vclamps-f32 %v4094_v22, 1.0  ;;  %v4122_v38 = vsub.f32 1.0, %v4121_v18  ;;  %v4158_v15 = vmul.f32 %v4157_v2, %v6784_v54  ;;  %v3886_v51 = vmul.f32 0.5, %v6629_v52 }
 0x4a2   : > { %v4196_v9 = vmul.f32 %v4195_v35, %v6795_v28  ;;  %v4147_v11 = vmul.f32 %v4146_v58, %v6784_v54  ;;  %v4185_v47 = vmul.f32 %v4184_v19, %v6795_v28  ;;  %v3888_v1 = vmul.f32 0.5, %v6774_v55 }
 0x4a3   : > { %v4221_v4 = vadd.f32 1.0, %v4410_v13  ;;  %v4123_v44 = vmul.f32 %v4826_v3, %v4122_v38  ;;  %v4159_v24 = vadd.f32 1.0, %v4158_v15 }
 0x4a4   : > { %v4197_v21 = vadd.f32 0.4994258, %v4196_v9  ;;  %v4148_v32 = vadd.f32 1.1283791, %v4147_v11  ;;  %v4186_v59 = vadd.f32 0.18741608, %v4185_v47 }
 0x4a5   : > { %v4229_v6 = vmul.f32 %v4221_v4, %v3885_v17  ;;  %v4124_v39 = vadd.f32 %v4826_v3, %v4123_v44  ;;  %4827 = vrcp.f32 %v4159_v24  ;;  %v4171_v42 = vand.u32 2147483648, %v4159_v24 }
 0x4a6   : > { %v4198_v14 = vmul.f32 %v4197_v21, %v6795_v28  ;;  %vm4165_vm1 = vweird.f32 %v4159_v24  ;;  %v4169_v54 = vand.u32 2147483647, %v4159_v24  ;;  %v4187_v23 = vmul.f32 %v4186_v59, %v6795_v28 }
 0x4a7   : > { %4237 = vst [vmem:[%s6908_s13 + $0x20] sm:$0xff] %v4229_v6  ;;  %v4128_v53 = vsel %vm4127_vm15, %v4826_v3, %v4124_v39  ;;  %v4172_v52 = vor.u32 1.1754944e-38, %v4171_v42  ;;  %v4149_v37 = vmul.f32 %v4148_v32, %v6758_v61  ;;  %v3887_v3 = vmul.f32 0.5, %v6666_v62 }
 0x4a8   : > { %v4133_v29 = vsel %vm4130_vm0, %v4132_v56, %v4128_v53  ;;  %v4199_v63 = vadd.f32 1.0, %v4198_v14  ;;  %vm4170_vm4 = vcmp.eq.f32.partialorder %v4169_v54, 8.507059e+37  ;;  %v4188_v7 = vadd.f32 1.1283791, %v4187_v23 }
 0x4a9   : > { %v4134_v26 = vmul.f32 %v4133_v29, %v4109_v8 }
 0x4aa   : > { %4829 = vrcp.f32 %v4199_v63  ;;  %vm4205_vm5 = vweird.f32 %v4199_v63  ;;  %v4211_v25 = vand.u32 2147483648, %v4199_v63  ;;  %v4209_v10 = vand.u32 2147483647, %v4199_v63 }
 0x4ab   : > { %v4828_v31 = vpop.eup %4827  ;;  %v4411_v50 = vclamps-f32 %v4134_v26, 1.0  ;;  %v4189_v34 = vmul.f32 %v4188_v7, %v6787_v60 }
 0x4ac   : > { %v4161_v20 = vmul.f32 %v4828_v31, %v4159_v24  ;;  %vm4166_vm2 = vweird.f32 %v4828_v31  ;;  %v4212_v28 = vor.u32 1.1754944e-38, %v4211_v25  ;;  %vm4210_vm8 = vcmp.eq.f32.partialorder %v4209_v10, 8.507059e+37 }
 0x4ad   : > { %v4222_v0 = vadd.f32 1.0, %v4411_v50  ;;  %vm4167_vm3 = vmor %vm4165_vm1, %vm4166_vm2 }
 0x4ae   : > { %v4162_v12 = vsub.f32 1.0, %v4161_v20 }
 0x4af   : > { %v4230_v36 = vmul.f32 %v4222_v0, %v3886_v51 }
 0x4b0   : > { %v4163_v48 = vmul.f32 %v4828_v31, %v4162_v12  ;;  %v4830_v16 = vpop.eup %4829 }
 0x4b1   : > { %4238 = vst [vmem:[%s6908_s13 + $0x28] sm:$0xff] %v4230_v36  ;;  %v4201_v57 = vmul.f32 %v4830_v16, %v4199_v63  ;;  %vm4206_vm6 = vweird.f32 %v4830_v16 }
 0x4b2   : > { %v4164_v41 = vadd.f32 %v4828_v31, %v4163_v48  ;;  %vm4207_vm7 = vmor %vm4205_vm5, %vm4206_vm6 }
 0x4b3   : > { %v4202_v49 = vsub.f32 1.0, %v4201_v57 }
 0x4b4   : > { %v4168_v45 = vsel %vm4167_vm3, %v4828_v31, %v4164_v41 }
 0x4b5   : > { %v4173_v43 = vsel %vm4170_vm4, %v4172_v52, %v4168_v45  ;;  %v4203_v22 = vmul.f32 %v4830_v16, %v4202_v49 }
 0x4b6   : > { %v4174_v33 = vmul.f32 %v4173_v43, %v4149_v37 }
 0x4b7   : > { %v4204_v27 = vadd.f32 %v4830_v16, %v4203_v22 }
 0x4b8   : > { %v4412_v17 = vclamps-f32 %v4174_v33, 1.0 }
 0x4b9   : > { %v4208_v46 = vsel %vm4207_vm7, %v4830_v16, %v4204_v27 }
 0x4ba   : > { %v4223_v61 = vadd.f32 1.0, %v4412_v17  ;;  %v4213_v2 = vsel %vm4210_vm8, %v4212_v28, %v4208_v46 }
 0x4bb   : > { %v4214_v13 = vmul.f32 %v4213_v2, %v4189_v34 }
 0x4bc   : > { %v4231_v18 = vmul.f32 %v4223_v61, %v3887_v3 }
 0x4bd   : > { %v4413_v62 = vclamps-f32 %v4214_v13, 1.0 }
 0x4be   : > { %4239 = vst [vmem:[%s6908_s13 + $0x30] sm:$0xff] %v4231_v18 }
 0x4bf   : > { %v4224_v5 = vadd.f32 1.0, %v4413_v62 }
 0x4c1   : > { %v4232_v30 = vmul.f32 %v4224_v5, %v3888_v1 }
 0x4c3   : > { %4240 = vst [vmem:[%s6908_s13 + $0x38] sm:$0xff] %v4232_v30 }
 0x4c4 PF: > { %s6911_s27 = sld [smem:[#allocation17_spill]]  ;;  %s6914_s24 = smov %s5049_s25 }
 0x4c5   : > { %s6912_s12 = sld [smem:[#allocation16_spill]] }
 0x4c6   : > { %s6913_s26 = sld [smem:[#allocation18_spill]] }
 0x4ca   : > { %p16_p8 = scmp.ge.s32.totalorder %s6911_s27, 10  }
 0x4cb   : > { %s6915_s25 = smov %s6912_s12 }
 0x4cc   :  { %18 = sbr.rel (!%p16_p8) target bundleno = 7 (0x7), region = 125 }
 0x4d1   :  { %4252 = vsyncpa [#allocation5], 1 }
 0x4d2   :  { %4254 = vsyncpa [#allocation5 + $0x1], 1 }
 0x4d3   :  { %4255 = vsyncpa [#allocation7], 1 }

</bundles_post_ra>
